<compile_context>
chip_gen: v7x
topology: tpu7x:2x2x1
jax: 0.10.0
libtpu: 0.0.40
codegen_flags: <defaults>
</compile_context>

<pallas_src>
import numpy as np
import jax
import jax.numpy as jnp
from jax import lax
from jax.experimental import pallas as pl
from jax.experimental.pallas import tpu as pltpu

MATMUL_DTYPE = jnp.bfloat16   # MXU operand dtype (accumulation is always f32)
ACT_DTYPE = jnp.bfloat16      # inter-kernel activation storage; use f32 for tight parity


def _block_diag(w2d, reps):
    """kron(I_reps, w2d): block-diagonal weight for the width-folded matmul."""
    k, m = w2d.shape
    eye = jnp.eye(reps, dtype=w2d.dtype)
    return jnp.einsum('ij,kl->ikjl', eye, w2d).reshape(reps * k, reps * m)


def _pick_nb(n, h):
    """Images batched per grid step so the matmul M (= nb*H) is reasonably large."""
    target = max(1, 256 // max(h, 1))
    nb = 1
    for cand in range(1, n + 1):
        if n % cand == 0 and cand <= target:
            nb = cand
    return nb


# ----------- kernel 1: up-scale + pad + concat + conv1 + BN1 partial stats ----------

def fused_up_conv1(x2, x1, up_w, up_b, c1_w, c1_b, dy, dx):
    """x2: (N, H2, W2, Cin) NHWC; x1: (N, Hx, Wx, Cs) NHWC (skip connection).
    Returns the raw (pre-BN) conv1 output, width-folded (N, Hx, Wx*Cout) in
    ACT_DTYPE, plus per-grid-block BN1 partial sums / sums-of-squares."""
    n, h2, w2, cin = x2.shape
    _, hx, wx, cs = x1.shape
    cout = up_w.shape[1]
    hu, wu = 2 * h2, 2 * w2
    hp, wp = hx + 2, wx + 2
    nb = _pick_nb(n, hx)
    gn = n // nb
    # placement of the up-scaled block inside the zero-padded scratch
    # (1 ring row/col for the 3x3 'same' pad + the F.pad diff alignment to x1)
    pt = 1 + dy // 2
    pxl = (1 + dx // 2) * cout
    ku = 9 * wx * cout                 # K offset where the skip-connection taps start
    kbig = 9 * wx * (cout + cs)

    # ---- constant operands (tiny; resident across grid steps) ----
    # pixel-shuffle-fused ConvTranspose2d weights, one per output-row phase a
    wb = jnp.transpose(up_w, (2, 0, 3, 1)).reshape(2, cin, 2 * cout)   # [a][ci, b*C+c]
    wu0 = _block_diag(wb[0], w2).astype(MATMUL_DTYPE)                  # (W2*Cin, Wu*Cout)
    wu1 = _block_diag(wb[1], w2).astype(MATMUL_DTYPE)
    b_up = jnp.tile(up_b, wu).reshape(1, wu * cout).astype(jnp.float32)
    # 2x row-upsample as a 0/1 duplication matmul + row-parity blend (constants)
    r = np.arange(nb * hu)
    img, yy = r // hu, r % hu
    dup_np = np.zeros((nb * hu, nb * h2), np.float32)
    dup_np[r, img * h2 + yy // 2] = 1.0
    dup = jnp.asarray(dup_np, MATMUL_DTYPE)
    par = jnp.asarray((yy % 2).astype(np.float32).reshape(nb * hu, 1))
    # conv1 weights, big-K layout: [9 up-scale taps | 9 skip taps], block-diag width
    wt = jnp.transpose(c1_w, (2, 3, 1, 0)).reshape(9, cout + cs, cout)
    w1_big = jnp.concatenate(
        [_block_diag(wt[t, :cout, :], wx) for t in range(9)]
        + [_block_diag(wt[t, cout:, :], wx) for t in range(9)], axis=0
    ).astype(MATMUL_DTYPE)                                             # (kbig, Wx*Cout)
    b1 = jnp.tile(c1_b, wx).reshape(1, wx * cout).astype(jnp.float32)

    x2_f = x2.reshape(n, h2, w2 * cin)          # free NHWC row-major reshapes
    x1_f = x1.reshape(n, hx, wx * cs)

    def kernel(x2_ref, x1_ref, dup_ref, par_ref, wu0_ref, wu1_ref, bu_ref,
               w1_ref, b1_ref, o_ref, s_ref, q_ref, upad, spad, panel):
        # --- ConvTranspose2d(2, s=2): one weight per output-row phase; rows are
        #     upsampled by the duplication matmul and blended by the parity column ---
        x2b = x2_ref[...].astype(MATMUL_DTYPE).reshape(nb * h2, w2 * cin)
        xd = jnp.dot(dup_ref[...], x2b,
                     preferred_element_type=jnp.float32).astype(MATMUL_DTYPE)
        u0 = jnp.dot(xd, wu0_ref[...], preferred_element_type=jnp.float32)
        u1 = jnp.dot(xd, wu1_ref[...], preferred_element_type=jnp.float32)
        p = par_ref[...]
        u = u0 * (1.0 - p) + u1 * p + bu_ref[...]                # (nb*Hu, Wu*Cout)
        # --- zero-ring padded copies built in VMEM scratch (no XLA pad / HBM pass) ---
        upad[...] = jnp.zeros_like(upad)
        spad[...] = jnp.zeros_like(spad)
        upad[:, pt:pt + hu, pxl:pxl + wu * cout] = u.reshape(nb, hu, wu * cout)
        spad[:, 1:1 + hx, cs:cs + wx * cs] = x1_ref[...].astype(jnp.float32)
        # --- im2col panel: 18 shifted windows -> ONE big-K MXU matmul ---
        for t in range(9):
            kh, kw = t // 3, t % 3
            win_u = upad[:, kh:kh + hx, kw * cout:kw * cout + wx * cout]
            win_s = spad[:, kh:kh + hx, kw * cs:kw * cs + wx * cs]
            panel[:, t * wx * cout:(t + 1) * wx * cout] = (
                win_u.reshape(nb * hx, wx * cout).astype(MATMUL_DTYPE))
            panel[:, ku + t * wx * cs:ku + (t + 1) * wx * cs] = (
                win_s.reshape(nb * hx, wx * cs).astype(MATMUL_DTYPE))
        yc = jnp.dot(panel[...], w1_ref[...],
                     preferred_element_type=jnp.float32) + b1_ref[...]
        # --- fused BN1 batch-stat partials (tiny final reduce happens outside) ---
        s_ref[...] = jnp.sum(yc, axis=0, keepdims=True)
        q_ref[...] = jnp.sum(yc * yc, axis=0, keepdims=True)
        # --- single lane-dense store of the raw conv1 output ---
        o_ref[...] = yc.reshape(nb, hx, wx * cout).astype(o_ref.dtype)

    return pl.pallas_call(
        kernel,
        out_shape=(jax.ShapeDtypeStruct((n, hx, wx * cout), ACT_DTYPE),
                   jax.ShapeDtypeStruct((gn, 1, wx * cout), jnp.float32),
                   jax.ShapeDtypeStruct((gn, 1, wx * cout), jnp.float32)),
        grid=(gn,),
        in_specs=[pl.BlockSpec((nb, h2, w2 * cin), lambda i: (i, 0, 0)),
                  pl.BlockSpec((nb, hx, wx * cs), lambda i: (i, 0, 0)),
                  pl.BlockSpec((nb * hu, nb * h2), lambda i: (0, 0)),
                  pl.BlockSpec((nb * hu, 1), lambda i: (0, 0)),
                  pl.BlockSpec((w2 * cin, wu * cout), lambda i: (0, 0)),
                  pl.BlockSpec((w2 * cin, wu * cout), lambda i: (0, 0)),
                  pl.BlockSpec((1, wu * cout), lambda i: (0, 0)),
                  pl.BlockSpec((kbig, wx * cout), lambda i: (0, 0)),
                  pl.BlockSpec((1, wx * cout), lambda i: (0, 0))],
        out_specs=(pl.BlockSpec((nb, hx, wx * cout), lambda i: (i, 0, 0)),
                   pl.BlockSpec((None, 1, wx * cout), lambda i: (i, 0, 0)),
                   pl.BlockSpec((None, 1, wx * cout), lambda i: (i, 0, 0))),
        scratch_shapes=[pltpu.VMEM((nb, hp, wp * cout), jnp.float32),
                        pltpu.VMEM((nb, hp, wp * cs), jnp.float32),
                        pltpu.VMEM((nb * hx, kbig), MATMUL_DTYPE)],
        compiler_params=pltpu.CompilerParams(dimension_semantics=("parallel",)),
    )(x2_f, x1_f, dup, par, wu0, wu1, b_up, w1_big, b1)


# ----------- kernel 2: BN1+ReLU (fused input path) + conv2 + BN2 partial stats ------

def conv2_fused(y1, c2_w, c2_b, scale1, shift1):
    """y1: (N, Hx, Wx*Ci) raw conv1 output (width-folded).  BN1 affine + ReLU is
    applied in-kernel, the zero 'same' ring is built in VMEM scratch, and the 3x3
    conv runs as one big-K matmul with fused BN2 partial statistics."""
    n, hx, wc = y1.shape
    cout, ci = c2_w.shape[0], c2_w.shape[1]
    wx = wc // ci
    hp, wp = hx + 2, wx + 2
    nb = _pick_nb(n, hx)
    gn = n // nb
    kbig = 9 * wx * ci

    wt = jnp.transpose(c2_w, (2, 3, 1, 0)).reshape(9, ci, cout)
    w2_big = jnp.concatenate([_block_diag(wt[t], wx) for t in range(9)],
                             axis=0).astype(MATMUL_DTYPE)              # (kbig, Wx*Cout)
    b2 = jnp.tile(c2_b, wx).reshape(1, wx * cout).astype(jnp.float32)
    sc = jnp.tile(scale1, wx).reshape(1, wx * ci).astype(jnp.float32)
    sh = jnp.tile(shift1, wx).reshape(1, wx * ci).astype(jnp.float32)

    def kernel(x_ref, w_ref, b_ref, sc_ref, sh_ref, o_ref, s_ref, q_ref,
               xpad, panel):
        x = x_ref[...].astype(jnp.float32)                       # (nb, Hx, Wx*Ci)
        a = jnp.maximum(x * sc_ref[...] + sh_ref[...], 0.0)      # BN1 + ReLU fused
        xpad[...] = jnp.zeros_like(xpad)
        xpad[:, 1:1 + hx, ci:ci + wx * ci] = a                   # zero 'same' ring
        for t in range(9):
            kh, kw = t // 3, t % 3
            win = xpad[:, kh:kh + hx, kw * ci:kw * ci + wx * ci]
            panel[:, t * wx * ci:(t + 1) * wx * ci] = (
                win.reshape(nb * hx, wx * ci).astype(MATMUL_DTYPE))
        yc = jnp.dot(panel[...], w_ref[...],
                     preferred_element_type=jnp.float32) + b_ref[...]
        s_ref[...] = jnp.sum(yc, axis=0, keepdims=True)          # fused BN2 stats
        q_ref[...] = jnp.sum(yc * yc, axis=0, keepdims=True)
        o_ref[...] = yc.reshape(nb, hx, wx * cout).astype(o_ref.dtype)

    return pl.pallas_call(
        kernel,
        out_shape=(jax.ShapeDtypeStruct((n, hx, wx * cout), ACT_DTYPE),
                   jax.ShapeDtypeStruct((gn, 1, wx * cout), jnp.float32),
                   jax.ShapeDtypeStruct((gn, 1, wx * cout), jnp.float32)),
        grid=(gn,),
        in_specs=[pl.BlockSpec((nb, hx, wc), lambda i: (i, 0, 0)),
                  pl.BlockSpec((kbig, wx * cout), lambda i: (0, 0)),
                  pl.BlockSpec((1, wx * cout), lambda i: (0, 0)),
                  pl.BlockSpec((1, wx * ci), lambda i: (0, 0)),
                  pl.BlockSpec((1, wx * ci), lambda i: (0, 0))],
        out_specs=(pl.BlockSpec((nb, hx, wx * cout), lambda i: (i, 0, 0)),
                   pl.BlockSpec((None, 1, wx * cout), lambda i: (i, 0, 0)),
                   pl.BlockSpec((None, 1, wx * cout), lambda i: (i, 0, 0))),
        scratch_shapes=[pltpu.VMEM((nb, hp, wp * ci), jnp.float32),
                        pltpu.VMEM((nb * hx, kbig), MATMUL_DTYPE)],
        compiler_params=pltpu.CompilerParams(dimension_semantics=("parallel",)),
    )(y1, w2_big, b2, sc, sh)


# --------------------------- kernel 3: final BN2 + ReLU -----------------------------

def bn_relu_apply(x, scale, shift):
    """y = relu(scale*x + shift) per channel; x is (..., W*C) with channels fastest.
    Re-folded so the lane dim presented to out_specs is >=128 where possible."""
    c = scale.shape[0]
    total = x.size
    lane = x.shape[-1]
    for cand in (1024, 512, 256, 128):
        if total % cand == 0 and cand % c == 0:
            lane = cand
            break
    rows = total // lane
    tb = rows
    for cand in (512, 256, 128, 64, 32, 16, 8):
        if rows % cand == 0:
            tb = cand
            break
    x2d = x.reshape(rows, lane)                                   # free reshape
    sc = jnp.tile(scale, lane // c).reshape(1, lane).astype(jnp.float32)
    sh = jnp.tile(shift, lane // c).reshape(1, lane).astype(jnp.float32)

    def kernel(x_ref, sc_ref, sh_ref, o_ref):
        o_ref[...] = jnp.maximum(
            x_ref[...].astype(jnp.float32) * sc_ref[...] + sh_ref[...], 0.0)

    out = pl.pallas_call(
        kernel,
        out_shape=jax.ShapeDtypeStruct((rows, lane), jnp.float32),
        grid=(rows // tb,),
        in_specs=[pl.BlockSpec((tb, lane), lambda i: (i, 0)),
                  pl.BlockSpec((1, lane), lambda i: (0, 0)),
                  pl.BlockSpec((1, lane), lambda i: (0, 0))],
        out_specs=pl.BlockSpec((tb, lane), lambda i: (i, 0)),
        compiler_params=pltpu.CompilerParams(dimension_semantics=("parallel",)),
    )(x2d, sc, sh)
    return out.reshape(x.shape)


def _bn_scale_shift(psum, psq, count, gamma, beta, c, eps=1e-5):
    """Finish the two-stage BN reduction (tiny) and build the affine form."""
    s = psum.reshape(-1, c).sum(0)
    sq = psq.reshape(-1, c).sum(0)
    mean = s / count
    var = jnp.maximum(sq / count - mean * mean, 0.0)   # clamp E[x^2]-E[x]^2 cancellation
    scale = gamma * lax.rsqrt(var + eps)
    shift = beta - mean * scale
    return scale, shift


# ---------------------------- parameters & forward ---------------------------------

def init_params(key, in_ch, out_ch):
    ks = jax.random.split(key, 6)

    def u(k, shape, fan_in):
        bound = 1.0 / jnp.sqrt(float(fan_in))
        return jax.random.uniform(k, shape, jnp.float32, -bound, bound)

    return {
        "up_w": u(ks[0], (in_ch, out_ch, 2, 2), in_ch * 4),
        "up_b": u(ks[1], (out_ch,), in_ch * 4),
        "c1_w": u(ks[2], (out_ch, in_ch, 3, 3), in_ch * 9),
        "c1_b": u(ks[3], (out_ch,), in_ch * 9),
        "bn1_g": jnp.ones((out_ch,), jnp.float32),
        "bn1_b": jnp.zeros((out_ch,), jnp.float32),
        "c2_w": u(ks[4], (out_ch, out_ch, 3, 3), out_ch * 9),
        "c2_b": u(ks[5], (out_ch,), out_ch * 9),
        "bn2_g": jnp.ones((out_ch,), jnp.float32),
        "bn2_b": jnp.zeros((out_ch,), jnp.float32),
    }


def up_layer_forward(params, x1_nchw, x2_nchw):
    # NCHW (PyTorch) -> NHWC (kernel layout)
    x1 = jnp.transpose(x1_nchw, (0, 2, 3, 1)).astype(jnp.float32)
    x2 = jnp.transpose(x2_nchw, (0, 2, 3, 1)).astype(jnp.float32)
    n, hx, wx, _ = x1.shape
    _, h2, w2, _ = x2.shape
    cout = params["up_w"].shape[1]
    dy, dx = hx - 2 * h2, wx - 2 * w2
    if dy < 0 or dx < 0:
        # TODO(synk): negative-diff (crop) branch of F.pad is not supported.
        raise ValueError("up-scaled x2 larger than x1 is not supported")

    # --- up-scale + pad + concat + conv1 (+ fused BN1 batch-stat partials) ---
    y1, s1, q1 = fused_up_conv1(x2, x1, params["up_w"], params["up_b"],
                                params["c1_w"], params["c1_b"], dy, dx)
    scale1, shift1 = _bn_scale_shift(s1, q1, n * hx * wx,
                                     params["bn1_g"], params["bn1_b"], cout)

    # --- BN1+ReLU (fused input path) + conv2 (+ fused BN2 batch-stat partials) ---
    y2, s2, q2 = conv2_fused(y1, params["c2_w"], params["c2_b"], scale1, shift1)
    scale2, shift2 = _bn_scale_shift(s2, q2, n * hx * wx,
                                     params["bn2_g"], params["bn2_b"], cout)

    # --- final BN2 + ReLU (single lane-dense element-wise pass) ---
    y = bn_relu_apply(y2, scale2, shift2)                  # (N, Hx, Wx*Cout) f32
    y = y.reshape(n, hx, wx, cout)                         # free reshape
    # TODO(synk): fold this small NHWC->NCHW layout transpose into the last kernel.
    return jnp.transpose(y, (0, 3, 1, 2))


if __name__ == "__main__":
    in_ch, out_ch = 8, 4
    N, H2, W2 = 2, 8, 8                    # x2 spatial; x1 (skip connection) is 2x

    key = jax.random.PRNGKey(0)
    k1, k2, kp = jax.random.split(key, 3)
    x1 = jax.random.normal(k1, (N, out_ch, 2 * H2, 2 * W2), jnp.float32)
    x2 = jax.random.normal(k2, (N, in_ch, H2, W2), jnp.float32)
    params = init_params(kp, in_ch, out_ch)

    out = jax.jit(up_layer_forward)(params, x1, x2)
    out = jax.block_until_ready(out)
    assert out.shape == (N, out_ch, 2 * H2, 2 * W2), out.shape
    assert bool(jnp.all(jnp.isfinite(out)))
    print("KERNEL_OK")
</pallas_src>

<mosaic_0001>
module attributes {stable_mosaic.version = 11 : i64} {
  func.func @kernel(%arg0: i32, %arg1: memref<2x8x64xf32, #tpu.memory_space<vmem>>, %arg2: memref<2x16x64xf32, #tpu.memory_space<vmem>>, %arg3: memref<32x16xbf16, #tpu.memory_space<vmem>>, %arg4: memref<32x1xf32, #tpu.memory_space<vmem>>, %arg5: memref<64x64xbf16, #tpu.memory_space<vmem>>, %arg6: memref<64x64xbf16, #tpu.memory_space<vmem>>, %arg7: memref<1x64xf32, #tpu.memory_space<vmem>>, %arg8: memref<1152x64xbf16, #tpu.memory_space<vmem>>, %arg9: memref<1x64xf32, #tpu.memory_space<vmem>>, %arg10: memref<2x16x64xbf16, #tpu.memory_space<vmem>>, %arg11: memref<1x1x64xf32, #tpu.memory_space<vmem>>, %arg12: memref<1x1x64xf32, #tpu.memory_space<vmem>>, %arg13: memref<2x18x72xf32, #tpu.memory_space<vmem>>, %arg14: memref<2x18x72xf32, #tpu.memory_space<vmem>>, %arg15: memref<32x1152xbf16, #tpu.memory_space<vmem>>) attributes {dimension_semantics = [#tpu.dimension_semantics<parallel>], iteration_bounds = array<i64: 1>, scalar_prefetch = 0 : i64, scratch_operands = 3 : i64, tpu.core_type = #tpu.core_type<tc>, window_params = [{transform_indices = @transform_0, window_bounds = array<i64: 2, 8, 64>}, {transform_indices = @transform_1, window_bounds = array<i64: 2, 16, 64>}, {pipeline_mode = #tpu.pipeline_mode<synchronous>, transform_indices = @transform_2, window_bounds = array<i64: 32, 16>}, {pipeline_mode = #tpu.pipeline_mode<synchronous>, transform_indices = @transform_3, window_bounds = array<i64: 32, 1>}, {pipeline_mode = #tpu.pipeline_mode<synchronous>, transform_indices = @transform_4, window_bounds = array<i64: 64, 64>}, {pipeline_mode = #tpu.pipeline_mode<synchronous>, transform_indices = @transform_5, window_bounds = array<i64: 64, 64>}, {pipeline_mode = #tpu.pipeline_mode<synchronous>, transform_indices = @transform_6, window_bounds = array<i64: 1, 64>}, {pipeline_mode = #tpu.pipeline_mode<synchronous>, transform_indices = @transform_7, window_bounds = array<i64: 1152, 64>}, {pipeline_mode = #tpu.pipeline_mode<synchronous>, transform_indices = @transform_8, window_bounds = array<i64: 1, 64>}, {transform_indices = @transform_9, window_bounds = array<i64: 2, 16, 64>}, {transform_indices = @transform_10, window_bounds = array<i64: 1, 1, 64>}, {transform_indices = @transform_11, window_bounds = array<i64: 1, 1, 64>}]} {
    %c0 = arith.constant 0 : index
    %c0_0 = arith.constant 0 : index
    %c0_1 = arith.constant 0 : index
    %0 = vector.load %arg1[%c0, %c0_0, %c0_1] : memref<2x8x64xf32, #tpu.memory_space<vmem>>, vector<2x8x64xf32>
    %1 = arith.truncf %0 : vector<2x8x64xf32> to vector<2x8x64xbf16>
    %2 = vector.shape_cast %1 : vector<2x8x64xbf16> to vector<16x64xbf16>
    %c0_2 = arith.constant 0 : index
    %c0_3 = arith.constant 0 : index
    %3 = vector.load %arg3[%c0_2, %c0_3] : memref<32x16xbf16, #tpu.memory_space<vmem>>, vector<32x16xbf16>
    %cst = arith.constant dense<0.000000e+00> : vector<32x64xf32>
    %4 = tpu.matmul %3, %2, %cst {dimension_numbers = #tpu.dot_dimension_numbers<[1], [0], [0], [1], [0, 0, 1, 1], [], []>} : vector<32x16xbf16>, vector<16x64xbf16>, vector<32x64xf32> -> vector<32x64xf32>
    %5 = arith.truncf %4 : vector<32x64xf32> to vector<32x64xbf16>
    %c0_4 = arith.constant 0 : index
    %c0_5 = arith.constant 0 : index
    %6 = vector.load %arg5[%c0_4, %c0_5] : memref<64x64xbf16, #tpu.memory_space<vmem>>, vector<64x64xbf16>
    %cst_6 = arith.constant dense<0.000000e+00> : vector<32x64xf32>
    %7 = tpu.matmul %5, %6, %cst_6 {dimension_numbers = #tpu.dot_dimension_numbers<[1], [0], [0], [1], [0, 0, 1, 1], [], []>} : vector<32x64xbf16>, vector<64x64xbf16>, vector<32x64xf32> -> vector<32x64xf32>
    %c0_7 = arith.constant 0 : index
    %c0_8 = arith.constant 0 : index
    %8 = vector.load %arg6[%c0_7, %c0_8] : memref<64x64xbf16, #tpu.memory_space<vmem>>, vector<64x64xbf16>
    %cst_9 = arith.constant dense<0.000000e+00> : vector<32x64xf32>
    %9 = tpu.matmul %5, %8, %cst_9 {dimension_numbers = #tpu.dot_dimension_numbers<[1], [0], [0], [1], [0, 0, 1, 1], [], []>} : vector<32x64xbf16>, vector<64x64xbf16>, vector<32x64xf32> -> vector<32x64xf32>
    %c0_10 = arith.constant 0 : index
    %c0_11 = arith.constant 0 : index
    %10 = vector.load %arg4[%c0_10, %c0_11] : memref<32x1xf32, #tpu.memory_space<vmem>>, vector<32x1xf32>
    %cst_12 = arith.constant 1.000000e+00 : f32
    %11 = vector.broadcast %cst_12 : f32 to vector<32x1xf32>
    %12 = arith.subf %11, %10 : vector<32x1xf32>
    %13 = vector.broadcast %12 : vector<32x1xf32> to vector<32x64xf32>
    %14 = arith.mulf %7, %13 : vector<32x64xf32>
    %15 = vector.broadcast %10 : vector<32x1xf32> to vector<32x64xf32>
    %16 = arith.mulf %9, %15 : vector<32x64xf32>
    %17 = arith.addf %14, %16 : vector<32x64xf32>
    %c0_13 = arith.constant 0 : index
    %c0_14 = arith.constant 0 : index
    %18 = vector.load %arg7[%c0_13, %c0_14] : memref<1x64xf32, #tpu.memory_space<vmem>>, vector<1x64xf32>
    %19 = vector.broadcast %18 : vector<1x64xf32> to vector<32x64xf32>
    %20 = arith.addf %17, %19 : vector<32x64xf32>
    %cst_15 = arith.constant 0.000000e+00 : f32
    %21 = vector.broadcast %cst_15 : f32 to vector<2x18x72xf32>
    %c0_16 = arith.constant 0 : index
    %c0_17 = arith.constant 0 : index
    %c0_18 = arith.constant 0 : index
    %22 = vector.load %arg13[%c0_16, %c0_17, %c0_18] : memref<2x18x72xf32, #tpu.memory_space<vmem>>, vector<2x18x72xf32>
    tpu.vector_store %arg13[%c0_16, %c0_17, %c0_18], %21 {strides = array<i32>} : memref<2x18x72xf32, #tpu.memory_space<vmem>>, vector<2x18x72xf32>,
    %cst_19 = arith.constant 0.000000e+00 : f32
    %23 = vector.broadcast %cst_19 : f32 to vector<2x18x72xf32>
    %c0_20 = arith.constant 0 : index
    %c0_21 = arith.constant 0 : index
    %c0_22 = arith.constant 0 : index
    %24 = vector.load %arg14[%c0_20, %c0_21, %c0_22] : memref<2x18x72xf32, #tpu.memory_space<vmem>>, vector<2x18x72xf32>
    tpu.vector_store %arg14[%c0_20, %c0_21, %c0_22], %23 {strides = array<i32>} : memref<2x18x72xf32, #tpu.memory_space<vmem>>, vector<2x18x72xf32>,
    %25 = vector.shape_cast %20 : vector<32x64xf32> to vector<2x16x64xf32>
    %c0_23 = arith.constant 0 : index
    %c1 = arith.constant 1 : index
    %c4 = arith.constant 4 : index
    %26 = vector.load %arg13[%c0_23, %c1, %c4] : memref<2x18x72xf32, #tpu.memory_space<vmem>>, vector<2x16x64xf32>
    tpu.vector_store %arg13[%c0_23, %c1, %c4], %25 {strides = array<i32>} : memref<2x18x72xf32, #tpu.memory_space<vmem>>, vector<2x16x64xf32>,
    %c0_24 = arith.constant 0 : index
    %c0_25 = arith.constant 0 : index
    %c0_26 = arith.constant 0 : index
    %27 = vector.load %arg2[%c0_24, %c0_25, %c0_26] : memref<2x16x64xf32, #tpu.memory_space<vmem>>, vector<2x16x64xf32>
    %c0_27 = arith.constant 0 : index
    %c1_28 = arith.constant 1 : index
    %c4_29 = arith.constant 4 : index
    %28 = vector.load %arg14[%c0_27, %c1_28, %c4_29] : memref<2x18x72xf32, #tpu.memory_space<vmem>>, vector<2x16x64xf32>
    tpu.vector_store %arg14[%c0_27, %c1_28, %c4_29], %27 {strides = array<i32>} : memref<2x18x72xf32, #tpu.memory_space<vmem>>, vector<2x16x64xf32>,
    %c0_30 = arith.constant 0 : index
    %c0_31 = arith.constant 0 : index
    %c0_32 = arith.constant 0 : index
    %29 = vector.load %arg13[%c0_30, %c0_31, %c0_32] : memref<2x18x72xf32, #tpu.memory_space<vmem>>, vector<2x16x64xf32>
    %c0_33 = arith.constant 0 : index
    %c0_34 = arith.constant 0 : index
    %c0_35 = arith.constant 0 : index
    %30 = vector.load %arg14[%c0_33, %c0_34, %c0_35] : memref<2x18x72xf32, #tpu.memory_space<vmem>>, vector<2x16x64xf32>
    %31 = vector.shape_cast %29 : vector<2x16x64xf32> to vector<32x64xf32>
    %32 = arith.truncf %31 : vector<32x64xf32> to vector<32x64xbf16>
    %c0_36 = arith.constant 0 : index
    %c0_37 = arith.constant 0 : index
    %33 = vector.load %arg15[%c0_36, %c0_37] : memref<32x1152xbf16, #tpu.memory_space<vmem>>, vector<32x64xbf16>
    tpu.vector_store %arg15[%c0_36, %c0_37], %32 {strides = array<i32>} : memref<32x1152xbf16, #tpu.memory_space<vmem>>, vector<32x64xbf16>,
    %34 = vector.shape_cast %30 : vector<2x16x64xf32> to vector<32x64xf32>
    %35 = arith.truncf %34 : vector<32x64xf32> to vector<32x64xbf16>
    %c0_38 = arith.constant 0 : index
    %c576 = arith.constant 576 : index
    %36 = vector.load %arg15[%c0_38, %c576] : memref<32x1152xbf16, #tpu.memory_space<vmem>>, vector<32x64xbf16>
    tpu.vector_store %arg15[%c0_38, %c576], %35 {strides = array<i32>} : memref<32x1152xbf16, #tpu.memory_space<vmem>>, vector<32x64xbf16>,
    %c0_39 = arith.constant 0 : index
    %c0_40 = arith.constant 0 : index
    %c4_41 = arith.constant 4 : index
    %37 = vector.load %arg13[%c0_39, %c0_40, %c4_41] : memref<2x18x72xf32, #tpu.memory_space<vmem>>, vector<2x16x64xf32>
    %c0_42 = arith.constant 0 : index
    %c0_43 = arith.constant 0 : index
    %c4_44 = arith.constant 4 : index
    %38 = vector.load %arg14[%c0_42, %c0_43, %c4_44] : memref<2x18x72xf32, #tpu.memory_space<vmem>>, vector<2x16x64xf32>
    %39 = vector.shape_cast %37 : vector<2x16x64xf32> to vector<32x64xf32>
    %40 = arith.truncf %39 : vector<32x64xf32> to vector<32x64xbf16>
    %c0_45 = arith.constant 0 : index
    %c64 = arith.constant 64 : index
    %41 = vector.load %arg15[%c0_45, %c64] : memref<32x1152xbf16, #tpu.memory_space<vmem>>, vector<32x64xbf16>
    tpu.vector_store %arg15[%c0_45, %c64], %40 {strides = array<i32>} : memref<32x1152xbf16, #tpu.memory_space<vmem>>, vector<32x64xbf16>,
    %42 = vector.shape_cast %38 : vector<2x16x64xf32> to vector<32x64xf32>
    %43 = arith.truncf %42 : vector<32x64xf32> to vector<32x64xbf16>
    %c0_46 = arith.constant 0 : index
    %c640 = arith.constant 640 : index
    %44 = vector.load %arg15[%c0_46, %c640] : memref<32x1152xbf16, #tpu.memory_space<vmem>>, vector<32x64xbf16>
    tpu.vector_store %arg15[%c0_46, %c640], %43 {strides = array<i32>} : memref<32x1152xbf16, #tpu.memory_space<vmem>>, vector<32x64xbf16>,
    %c0_47 = arith.constant 0 : index
    %c0_48 = arith.constant 0 : index
    %c8 = arith.constant 8 : index
    %45 = vector.load %arg13[%c0_47, %c0_48, %c8] : memref<2x18x72xf32, #tpu.memory_space<vmem>>, vector<2x16x64xf32>
    %c0_49 = arith.constant 0 : index
    %c0_50 = arith.constant 0 : index
    %c8_51 = arith.constant 8 : index
    %46 = vector.load %arg14[%c0_49, %c0_50, %c8_51] : memref<2x18x72xf32, #tpu.memory_space<vmem>>, vector<2x16x64xf32>
    %47 = vector.shape_cast %45 : vector<2x16x64xf32> to vector<32x64xf32>
    %48 = arith.truncf %47 : vector<32x64xf32> to vector<32x64xbf16>
    %c0_52 = arith.constant 0 : index
    %c128 = arith.constant 128 : index
    %49 = vector.load %arg15[%c0_52, %c128] : memref<32x1152xbf16, #tpu.memory_space<vmem>>, vector<32x64xbf16>
    tpu.vector_store %arg15[%c0_52, %c128], %48 {strides = array<i32>} : memref<32x1152xbf16, #tpu.memory_space<vmem>>, vector<32x64xbf16>,
    %50 = vector.shape_cast %46 : vector<2x16x64xf32> to vector<32x64xf32>
    %51 = arith.truncf %50 : vector<32x64xf32> to vector<32x64xbf16>
    %c0_53 = arith.constant 0 : index
    %c704 = arith.constant 704 : index
    %52 = vector.load %arg15[%c0_53, %c704] : memref<32x1152xbf16, #tpu.memory_space<vmem>>, vector<32x64xbf16>
    tpu.vector_store %arg15[%c0_53, %c704], %51 {strides = array<i32>} : memref<32x1152xbf16, #tpu.memory_space<vmem>>, vector<32x64xbf16>,
    %c0_54 = arith.constant 0 : index
    %c1_55 = arith.constant 1 : index
    %c0_56 = arith.constant 0 : index
    %53 = vector.load %arg13[%c0_54, %c1_55, %c0_56] : memref<2x18x72xf32, #tpu.memory_space<vmem>>, vector<2x16x64xf32>
    %c0_57 = arith.constant 0 : index
    %c1_58 = arith.constant 1 : index
    %c0_59 = arith.constant 0 : index
    %54 = vector.load %arg14[%c0_57, %c1_58, %c0_59] : memref<2x18x72xf32, #tpu.memory_space<vmem>>, vector<2x16x64xf32>
    %55 = vector.shape_cast %53 : vector<2x16x64xf32> to vector<32x64xf32>
    %56 = arith.truncf %55 : vector<32x64xf32> to vector<32x64xbf16>
    %c0_60 = arith.constant 0 : index
    %c192 = arith.constant 192 : index
    %57 = vector.load %arg15[%c0_60, %c192] : memref<32x1152xbf16, #tpu.memory_space<vmem>>, vector<32x64xbf16>
    tpu.vector_store %arg15[%c0_60, %c192], %56 {strides = array<i32>} : memref<32x1152xbf16, #tpu.memory_space<vmem>>, vector<32x64xbf16>,
    %58 = vector.shape_cast %54 : vector<2x16x64xf32> to vector<32x64xf32>
    %59 = arith.truncf %58 : vector<32x64xf32> to vector<32x64xbf16>
    %c0_61 = arith.constant 0 : index
    %c768 = arith.constant 768 : index
    %60 = vector.load %arg15[%c0_61, %c768] : memref<32x1152xbf16, #tpu.memory_space<vmem>>, vector<32x64xbf16>
    tpu.vector_store %arg15[%c0_61, %c768], %59 {strides = array<i32>} : memref<32x1152xbf16, #tpu.memory_space<vmem>>, vector<32x64xbf16>,
    %c0_62 = arith.constant 0 : index
    %c1_63 = arith.constant 1 : index
    %c4_64 = arith.constant 4 : index
    %61 = vector.load %arg13[%c0_62, %c1_63, %c4_64] : memref<2x18x72xf32, #tpu.memory_space<vmem>>, vector<2x16x64xf32>
    %c0_65 = arith.constant 0 : index
    %c1_66 = arith.constant 1 : index
    %c4_67 = arith.constant 4 : index
    %62 = vector.load %arg14[%c0_65, %c1_66, %c4_67] : memref<2x18x72xf32, #tpu.memory_space<vmem>>, vector<2x16x64xf32>
    %63 = vector.shape_cast %61 : vector<2x16x64xf32> to vector<32x64xf32>
    %64 = arith.truncf %63 : vector<32x64xf32> to vector<32x64xbf16>
    %c0_68 = arith.constant 0 : index
    %c256 = arith.constant 256 : index
    %65 = vector.load %arg15[%c0_68, %c256] : memref<32x1152xbf16, #tpu.memory_space<vmem>>, vector<32x64xbf16>
    tpu.vector_store %arg15[%c0_68, %c256], %64 {strides = array<i32>} : memref<32x1152xbf16, #tpu.memory_space<vmem>>, vector<32x64xbf16>,
    %66 = vector.shape_cast %62 : vector<2x16x64xf32> to vector<32x64xf32>
    %67 = arith.truncf %66 : vector<32x64xf32> to vector<32x64xbf16>
    %c0_69 = arith.constant 0 : index
    %c832 = arith.constant 832 : index
    %68 = vector.load %arg15[%c0_69, %c832] : memref<32x1152xbf16, #tpu.memory_space<vmem>>, vector<32x64xbf16>
    tpu.vector_store %arg15[%c0_69, %c832], %67 {strides = array<i32>} : memref<32x1152xbf16, #tpu.memory_space<vmem>>, vector<32x64xbf16>,
    %c0_70 = arith.constant 0 : index
    %c1_71 = arith.constant 1 : index
    %c8_72 = arith.constant 8 : index
    %69 = vector.load %arg13[%c0_70, %c1_71, %c8_72] : memref<2x18x72xf32, #tpu.memory_space<vmem>>, vector<2x16x64xf32>
    %c0_73 = arith.constant 0 : index
    %c1_74 = arith.constant 1 : index
    %c8_75 = arith.constant 8 : index
    %70 = vector.load %arg14[%c0_73, %c1_74, %c8_75] : memref<2x18x72xf32, #tpu.memory_space<vmem>>, vector<2x16x64xf32>
    %71 = vector.shape_cast %69 : vector<2x16x64xf32> to vector<32x64xf32>
    %72 = arith.truncf %71 : vector<32x64xf32> to vector<32x64xbf16>
    %c0_76 = arith.constant 0 : index
    %c320 = arith.constant 320 : index
    %73 = vector.load %arg15[%c0_76, %c320] : memref<32x1152xbf16, #tpu.memory_space<vmem>>, vector<32x64xbf16>
    tpu.vector_store %arg15[%c0_76, %c320], %72 {strides = array<i32>} : memref<32x1152xbf16, #tpu.memory_space<vmem>>, vector<32x64xbf16>,
    %74 = vector.shape_cast %70 : vector<2x16x64xf32> to vector<32x64xf32>
    %75 = arith.truncf %74 : vector<32x64xf32> to vector<32x64xbf16>
    %c0_77 = arith.constant 0 : index
    %c896 = arith.constant 896 : index
    %76 = vector.load %arg15[%c0_77, %c896] : memref<32x1152xbf16, #tpu.memory_space<vmem>>, vector<32x64xbf16>
    tpu.vector_store %arg15[%c0_77, %c896], %75 {strides = array<i32>} : memref<32x1152xbf16, #tpu.memory_space<vmem>>, vector<32x64xbf16>,
    %c0_78 = arith.constant 0 : index
    %c2 = arith.constant 2 : index
    %c0_79 = arith.constant 0 : index
    %77 = vector.load %arg13[%c0_78, %c2, %c0_79] : memref<2x18x72xf32, #tpu.memory_space<vmem>>, vector<2x16x64xf32>
    %c0_80 = arith.constant 0 : index
    %c2_81 = arith.constant 2 : index
    %c0_82 = arith.constant 0 : index
    %78 = vector.load %arg14[%c0_80, %c2_81, %c0_82] : memref<2x18x72xf32, #tpu.memory_space<vmem>>, vector<2x16x64xf32>
    %79 = vector.shape_cast %77 : vector<2x16x64xf32> to vector<32x64xf32>
    %80 = arith.truncf %79 : vector<32x64xf32> to vector<32x64xbf16>
    %c0_83 = arith.constant 0 : index
    %c384 = arith.constant 384 : index
    %81 = vector.load %arg15[%c0_83, %c384] : memref<32x1152xbf16, #tpu.memory_space<vmem>>, vector<32x64xbf16>
    tpu.vector_store %arg15[%c0_83, %c384], %80 {strides = array<i32>} : memref<32x1152xbf16, #tpu.memory_space<vmem>>, vector<32x64xbf16>,
    %82 = vector.shape_cast %78 : vector<2x16x64xf32> to vector<32x64xf32>
    %83 = arith.truncf %82 : vector<32x64xf32> to vector<32x64xbf16>
    %c0_84 = arith.constant 0 : index
    %c960 = arith.constant 960 : index
    %84 = vector.load %arg15[%c0_84, %c960] : memref<32x1152xbf16, #tpu.memory_space<vmem>>, vector<32x64xbf16>
    tpu.vector_store %arg15[%c0_84, %c960], %83 {strides = array<i32>} : memref<32x1152xbf16, #tpu.memory_space<vmem>>, vector<32x64xbf16>,
    %c0_85 = arith.constant 0 : index
    %c2_86 = arith.constant 2 : index
    %c4_87 = arith.constant 4 : index
    %85 = vector.load %arg13[%c0_85, %c2_86, %c4_87] : memref<2x18x72xf32, #tpu.memory_space<vmem>>, vector<2x16x64xf32>
    %c0_88 = arith.constant 0 : index
    %c2_89 = arith.constant 2 : index
    %c4_90 = arith.constant 4 : index
    %86 = vector.load %arg14[%c0_88, %c2_89, %c4_90] : memref<2x18x72xf32, #tpu.memory_space<vmem>>, vector<2x16x64xf32>
    %87 = vector.shape_cast %85 : vector<2x16x64xf32> to vector<32x64xf32>
    %88 = arith.truncf %87 : vector<32x64xf32> to vector<32x64xbf16>
    %c0_91 = arith.constant 0 : index
    %c448 = arith.constant 448 : index
    %89 = vector.load %arg15[%c0_91, %c448] : memref<32x1152xbf16, #tpu.memory_space<vmem>>, vector<32x64xbf16>
    tpu.vector_store %arg15[%c0_91, %c448], %88 {strides = array<i32>} : memref<32x1152xbf16, #tpu.memory_space<vmem>>, vector<32x64xbf16>,
    %90 = vector.shape_cast %86 : vector<2x16x64xf32> to vector<32x64xf32>
    %91 = arith.truncf %90 : vector<32x64xf32> to vector<32x64xbf16>
    %c0_92 = arith.constant 0 : index
    %c1024 = arith.constant 1024 : index
    %92 = vector.load %arg15[%c0_92, %c1024] : memref<32x1152xbf16, #tpu.memory_space<vmem>>, vector<32x64xbf16>
    tpu.vector_store %arg15[%c0_92, %c1024], %91 {strides = array<i32>} : memref<32x1152xbf16, #tpu.memory_space<vmem>>, vector<32x64xbf16>,
    %c0_93 = arith.constant 0 : index
    %c2_94 = arith.constant 2 : index
    %c8_95 = arith.constant 8 : index
    %93 = vector.load %arg13[%c0_93, %c2_94, %c8_95] : memref<2x18x72xf32, #tpu.memory_space<vmem>>, vector<2x16x64xf32>
    %c0_96 = arith.constant 0 : index
    %c2_97 = arith.constant 2 : index
    %c8_98 = arith.constant 8 : index
    %94 = vector.load %arg14[%c0_96, %c2_97, %c8_98] : memref<2x18x72xf32, #tpu.memory_space<vmem>>, vector<2x16x64xf32>
    %95 = vector.shape_cast %93 : vector<2x16x64xf32> to vector<32x64xf32>
    %96 = arith.truncf %95 : vector<32x64xf32> to vector<32x64xbf16>
    %c0_99 = arith.constant 0 : index
    %c512 = arith.constant 512 : index
    %97 = vector.load %arg15[%c0_99, %c512] : memref<32x1152xbf16, #tpu.memory_space<vmem>>, vector<32x64xbf16>
    tpu.vector_store %arg15[%c0_99, %c512], %96 {strides = array<i32>} : memref<32x1152xbf16, #tpu.memory_space<vmem>>, vector<32x64xbf16>,
    %98 = vector.shape_cast %94 : vector<2x16x64xf32> to vector<32x64xf32>
    %99 = arith.truncf %98 : vector<32x64xf32> to vector<32x64xbf16>
    %c0_100 = arith.constant 0 : index
    %c1088 = arith.constant 1088 : index
    %100 = vector.load %arg15[%c0_100, %c1088] : memref<32x1152xbf16, #tpu.memory_space<vmem>>, vector<32x64xbf16>
    tpu.vector_store %arg15[%c0_100, %c1088], %99 {strides = array<i32>} : memref<32x1152xbf16, #tpu.memory_space<vmem>>, vector<32x64xbf16>,
    %c0_101 = arith.constant 0 : index
    %c0_102 = arith.constant 0 : index
    %101 = vector.load %arg15[%c0_101, %c0_102] : memref<32x1152xbf16, #tpu.memory_space<vmem>>, vector<32x1152xbf16>
    %c0_103 = arith.constant 0 : index
    %c0_104 = arith.constant 0 : index
    %102 = vector.load %arg8[%c0_103, %c0_104] : memref<1152x64xbf16, #tpu.memory_space<vmem>>, vector<1152x64xbf16>
    %cst_105 = arith.constant dense<0.000000e+00> : vector<32x64xf32>
    %103 = tpu.matmul %101, %102, %cst_105 {dimension_numbers = #tpu.dot_dimension_numbers<[1], [0], [0], [1], [0, 0, 1, 1], [], []>} : vector<32x1152xbf16>, vector<1152x64xbf16>, vector<32x64xf32> -> vector<32x64xf32>
    %c0_106 = arith.constant 0 : index
    %c0_107 = arith.constant 0 : index
    %104 = vector.load %arg9[%c0_106, %c0_107] : memref<1x64xf32, #tpu.memory_space<vmem>>, vector<1x64xf32>
    %105 = vector.broadcast %104 : vector<1x64xf32> to vector<32x64xf32>
    %106 = arith.addf %103, %105 : vector<32x64xf32>
    %cst_108 = arith.constant dense<0.000000e+00> : vector<64xf32>
    %107 = vector.multi_reduction <add>, %106, %cst_108 [0] : vector<32x64xf32> to vector<64xf32>
    %108 = vector.shape_cast %107 : vector<64xf32> to vector<1x64xf32>
    %c0_109 = arith.constant 0 : index
    %c0_110 = arith.constant 0 : index
    %c0_111 = arith.constant 0 : index
    %109 = vector.load %arg11[%c0_109, %c0_110, %c0_111] : memref<1x1x64xf32, #tpu.memory_space<vmem>>, vector<1x1x64xf32>
    %110 = vector.shape_cast %109 : vector<1x1x64xf32> to vector<1x64xf32>
    %111 = vector.shape_cast %108 : vector<1x64xf32> to vector<1x1x64xf32>
    tpu.vector_store %arg11[%c0_109, %c0_110, %c0_111], %111 {strides = array<i32>} : memref<1x1x64xf32, #tpu.memory_space<vmem>>, vector<1x1x64xf32>,
    %112 = arith.mulf %106, %106 : vector<32x64xf32>
    %cst_112 = arith.constant dense<0.000000e+00> : vector<64xf32>
    %113 = vector.multi_reduction <add>, %112, %cst_112 [0] : vector<32x64xf32> to vector<64xf32>
    %114 = vector.shape_cast %113 : vector<64xf32> to vector<1x64xf32>
    %c0_113 = arith.constant 0 : index
    %c0_114 = arith.constant 0 : index
    %c0_115 = arith.constant 0 : index
    %115 = vector.load %arg12[%c0_113, %c0_114, %c0_115] : memref<1x1x64xf32, #tpu.memory_space<vmem>>, vector<1x1x64xf32>
    %116 = vector.shape_cast %115 : vector<1x1x64xf32> to vector<1x64xf32>
    %117 = vector.shape_cast %114 : vector<1x64xf32> to vector<1x1x64xf32>
    tpu.vector_store %arg12[%c0_113, %c0_114, %c0_115], %117 {strides = array<i32>} : memref<1x1x64xf32, #tpu.memory_space<vmem>>, vector<1x1x64xf32>,
    %118 = vector.shape_cast %106 : vector<32x64xf32> to vector<2x16x64xf32>
    %119 = arith.truncf %118 : vector<2x16x64xf32> to vector<2x16x64xbf16>
    %c0_116 = arith.constant 0 : index
    %c0_117 = arith.constant 0 : index
    %c0_118 = arith.constant 0 : index
    %120 = vector.load %arg10[%c0_116, %c0_117, %c0_118] : memref<2x16x64xbf16, #tpu.memory_space<vmem>>, vector<2x16x64xbf16>
    tpu.vector_store %arg10[%c0_116, %c0_117, %c0_118], %119 {strides = array<i32>} : memref<2x16x64xbf16, #tpu.memory_space<vmem>>, vector<2x16x64xbf16>,
    return
  }
  func.func @transform_0(%arg0: i32) -> (i32, i32, i32) {
    %c0_i32 = arith.constant 0 : i32
    %c0_i32_0 = arith.constant 0 : i32
    %c0_i32_1 = arith.constant 0 : i32
    return %arg0, %c0_i32, %c0_i32_0 : i32, i32, i32
  }
  func.func @transform_1(%arg0: i32) -> (i32, i32, i32) {
    %c0_i32 = arith.constant 0 : i32
    %c0_i32_0 = arith.constant 0 : i32
    %c0_i32_1 = arith.constant 0 : i32
    return %arg0, %c0_i32, %c0_i32_0 : i32, i32, i32
  }
  func.func @transform_2(%arg0: i32) -> (i32, i32) {
    %c0_i32 = arith.constant 0 : i32
    %c0_i32_0 = arith.constant 0 : i32
    %c0_i32_1 = arith.constant 0 : i32
    return %c0_i32, %c0_i32_0 : i32, i32
  }
  func.func @transform_3(%arg0: i32) -> (i32, i32) {
    %c0_i32 = arith.constant 0 : i32
    %c0_i32_0 = arith.constant 0 : i32
    %c0_i32_1 = arith.constant 0 : i32
    return %c0_i32, %c0_i32_0 : i32, i32
  }
  func.func @transform_4(%arg0: i32) -> (i32, i32) {
    %c0_i32 = arith.constant 0 : i32
    %c0_i32_0 = arith.constant 0 : i32
    %c0_i32_1 = arith.constant 0 : i32
    return %c0_i32, %c0_i32_0 : i32, i32
  }
  func.func @transform_5(%arg0: i32) -> (i32, i32) {
    %c0_i32 = arith.constant 0 : i32
    %c0_i32_0 = arith.constant 0 : i32
    %c0_i32_1 = arith.constant 0 : i32
    return %c0_i32, %c0_i32_0 : i32, i32
  }
  func.func @transform_6(%arg0: i32) -> (i32, i32) {
    %c0_i32 = arith.constant 0 : i32
    %c0_i32_0 = arith.constant 0 : i32
    %c0_i32_1 = arith.constant 0 : i32
    return %c0_i32, %c0_i32_0 : i32, i32
  }
  func.func @transform_7(%arg0: i32) -> (i32, i32) {
    %c0_i32 = arith.constant 0 : i32
    %c0_i32_0 = arith.constant 0 : i32
    %c0_i32_1 = arith.constant 0 : i32
    return %c0_i32, %c0_i32_0 : i32, i32
  }
  func.func @transform_8(%arg0: i32) -> (i32, i32) {
    %c0_i32 = arith.constant 0 : i32
    %c0_i32_0 = arith.constant 0 : i32
    %c0_i32_1 = arith.constant 0 : i32
    return %c0_i32, %c0_i32_0 : i32, i32
  }
  func.func @transform_9(%arg0: i32) -> (i32, i32, i32) {
    %c0_i32 = arith.constant 0 : i32
    %c0_i32_0 = arith.constant 0 : i32
    %c0_i32_1 = arith.constant 0 : i32
    return %arg0, %c0_i32, %c0_i32_0 : i32, i32, i32
  }
  func.func @transform_10(%arg0: i32) -> (i32, i32, i32) {
    %c0_i32 = arith.constant 0 : i32
    %c0_i32_0 = arith.constant 0 : i32
    %c0_i32_1 = arith.constant 0 : i32
    return %arg0, %c0_i32, %c0_i32_0 : i32, i32, i32
  }
  func.func @transform_11(%arg0: i32) -> (i32, i32, i32) {
    %c0_i32 = arith.constant 0 : i32
    %c0_i32_0 = arith.constant 0 : i32
    %c0_i32_1 = arith.constant 0 : i32
    return %arg0, %c0_i32, %c0_i32_0 : i32, i32, i32
  }
}

module attributes {stable_mosaic.version = 11 : i64} {
  func.func @kernel(%arg0: i32, %arg1: memref<2x16x64xbf16, #tpu.memory_space<vmem>>, %arg2: memref<576x64xbf16, #tpu.memory_space<vmem>>, %arg3: memref<1x64xf32, #tpu.memory_space<vmem>>, %arg4: memref<1x64xf32, #tpu.memory_space<vmem>>, %arg5: memref<1x64xf32, #tpu.memory_space<vmem>>, %arg6: memref<2x16x64xbf16, #tpu.memory_space<vmem>>, %arg7: memref<1x1x64xf32, #tpu.memory_space<vmem>>, %arg8: memref<1x1x64xf32, #tpu.memory_space<vmem>>, %arg9: memref<2x18x72xf32, #tpu.memory_space<vmem>>, %arg10: memref<32x576xbf16, #tpu.memory_space<vmem>>) attributes {dimension_semantics = [#tpu.dimension_semantics<parallel>], iteration_bounds = array<i64: 1>, scalar_prefetch = 0 : i64, scratch_operands = 2 : i64, tpu.core_type = #tpu.core_type<tc>, window_params = [{transform_indices = @transform_0, window_bounds = array<i64: 2, 16, 64>}, {pipeline_mode = #tpu.pipeline_mode<synchronous>, transform_indices = @transform_1, window_bounds = array<i64: 576, 64>}, {pipeline_mode = #tpu.pipeline_mode<synchronous>, transform_indices = @transform_2, window_bounds = array<i64: 1, 64>}, {pipeline_mode = #tpu.pipeline_mode<synchronous>, transform_indices = @transform_3, window_bounds = array<i64: 1, 64>}, {pipeline_mode = #tpu.pipeline_mode<synchronous>, transform_indices = @transform_4, window_bounds = array<i64: 1, 64>}, {transform_indices = @transform_5, window_bounds = array<i64: 2, 16, 64>}, {transform_indices = @transform_6, window_bounds = array<i64: 1, 1, 64>}, {transform_indices = @transform_7, window_bounds = array<i64: 1, 1, 64>}]} {
    %c0 = arith.constant 0 : index
    %c0_0 = arith.constant 0 : index
    %c0_1 = arith.constant 0 : index
    %0 = vector.load %arg1[%c0, %c0_0, %c0_1] : memref<2x16x64xbf16, #tpu.memory_space<vmem>>, vector<2x16x64xbf16>
    %1 = arith.extf %0 : vector<2x16x64xbf16> to vector<2x16x64xf32>
    %c0_2 = arith.constant 0 : index
    %c0_3 = arith.constant 0 : index
    %2 = vector.load %arg4[%c0_2, %c0_3] : memref<1x64xf32, #tpu.memory_space<vmem>>, vector<1x64xf32>
    %3 = vector.shape_cast %2 : vector<1x64xf32> to vector<1x1x64xf32>
    %4 = vector.broadcast %3 : vector<1x1x64xf32> to vector<2x16x64xf32>
    %5 = arith.mulf %1, %4 : vector<2x16x64xf32>
    %c0_4 = arith.constant 0 : index
    %c0_5 = arith.constant 0 : index
    %6 = vector.load %arg5[%c0_4, %c0_5] : memref<1x64xf32, #tpu.memory_space<vmem>>, vector<1x64xf32>
    %7 = vector.shape_cast %6 : vector<1x64xf32> to vector<1x1x64xf32>
    %8 = vector.broadcast %7 : vector<1x1x64xf32> to vector<2x16x64xf32>
    %9 = arith.addf %5, %8 : vector<2x16x64xf32>
    %cst = arith.constant 0.000000e+00 : f32
    %10 = vector.broadcast %cst : f32 to vector<2x16x64xf32>
    %11 = arith.maximumf %9, %10 : vector<2x16x64xf32>
    %cst_6 = arith.constant 0.000000e+00 : f32
    %12 = vector.broadcast %cst_6 : f32 to vector<2x18x72xf32>
    %c0_7 = arith.constant 0 : index
    %c0_8 = arith.constant 0 : index
    %c0_9 = arith.constant 0 : index
    %13 = vector.load %arg9[%c0_7, %c0_8, %c0_9] : memref<2x18x72xf32, #tpu.memory_space<vmem>>, vector<2x18x72xf32>
    tpu.vector_store %arg9[%c0_7, %c0_8, %c0_9], %12 {strides = array<i32>} : memref<2x18x72xf32, #tpu.memory_space<vmem>>, vector<2x18x72xf32>,
    %c0_10 = arith.constant 0 : index
    %c1 = arith.constant 1 : index
    %c4 = arith.constant 4 : index
    %14 = vector.load %arg9[%c0_10, %c1, %c4] : memref<2x18x72xf32, #tpu.memory_space<vmem>>, vector<2x16x64xf32>
    tpu.vector_store %arg9[%c0_10, %c1, %c4], %11 {strides = array<i32>} : memref<2x18x72xf32, #tpu.memory_space<vmem>>, vector<2x16x64xf32>,
    %c0_11 = arith.constant 0 : index
    %c0_12 = arith.constant 0 : index
    %c0_13 = arith.constant 0 : index
    %15 = vector.load %arg9[%c0_11, %c0_12, %c0_13] : memref<2x18x72xf32, #tpu.memory_space<vmem>>, vector<2x16x64xf32>
    %16 = vector.shape_cast %15 : vector<2x16x64xf32> to vector<32x64xf32>
    %17 = arith.truncf %16 : vector<32x64xf32> to vector<32x64xbf16>
    %c0_14 = arith.constant 0 : index
    %c0_15 = arith.constant 0 : index
    %18 = vector.load %arg10[%c0_14, %c0_15] : memref<32x576xbf16, #tpu.memory_space<vmem>>, vector<32x64xbf16>
    tpu.vector_store %arg10[%c0_14, %c0_15], %17 {strides = array<i32>} : memref<32x576xbf16, #tpu.memory_space<vmem>>, vector<32x64xbf16>,
    %c0_16 = arith.constant 0 : index
    %c0_17 = arith.constant 0 : index
    %c4_18 = arith.constant 4 : index
    %19 = vector.load %arg9[%c0_16, %c0_17, %c4_18] : memref<2x18x72xf32, #tpu.memory_space<vmem>>, vector<2x16x64xf32>
    %20 = vector.shape_cast %19 : vector<2x16x64xf32> to vector<32x64xf32>
    %21 = arith.truncf %20 : vector<32x64xf32> to vector<32x64xbf16>
    %c0_19 = arith.constant 0 : index
    %c64 = arith.constant 64 : index
    %22 = vector.load %arg10[%c0_19, %c64] : memref<32x576xbf16, #tpu.memory_space<vmem>>, vector<32x64xbf16>
    tpu.vector_store %arg10[%c0_19, %c64], %21 {strides = array<i32>} : memref<32x576xbf16, #tpu.memory_space<vmem>>, vector<32x64xbf16>,
    %c0_20 = arith.constant 0 : index
    %c0_21 = arith.constant 0 : index
    %c8 = arith.constant 8 : index
    %23 = vector.load %arg9[%c0_20, %c0_21, %c8] : memref<2x18x72xf32, #tpu.memory_space<vmem>>, vector<2x16x64xf32>
    %24 = vector.shape_cast %23 : vector<2x16x64xf32> to vector<32x64xf32>
    %25 = arith.truncf %24 : vector<32x64xf32> to vector<32x64xbf16>
    %c0_22 = arith.constant 0 : index
    %c128 = arith.constant 128 : index
    %26 = vector.load %arg10[%c0_22, %c128] : memref<32x576xbf16, #tpu.memory_space<vmem>>, vector<32x64xbf16>
    tpu.vector_store %arg10[%c0_22, %c128], %25 {strides = array<i32>} : memref<32x576xbf16, #tpu.memory_space<vmem>>, vector<32x64xbf16>,
    %c0_23 = arith.constant 0 : index
    %c1_24 = arith.constant 1 : index
    %c0_25 = arith.constant 0 : index
    %27 = vector.load %arg9[%c0_23, %c1_24, %c0_25] : memref<2x18x72xf32, #tpu.memory_space<vmem>>, vector<2x16x64xf32>
    %28 = vector.shape_cast %27 : vector<2x16x64xf32> to vector<32x64xf32>
    %29 = arith.truncf %28 : vector<32x64xf32> to vector<32x64xbf16>
    %c0_26 = arith.constant 0 : index
    %c192 = arith.constant 192 : index
    %30 = vector.load %arg10[%c0_26, %c192] : memref<32x576xbf16, #tpu.memory_space<vmem>>, vector<32x64xbf16>
    tpu.vector_store %arg10[%c0_26, %c192], %29 {strides = array<i32>} : memref<32x576xbf16, #tpu.memory_space<vmem>>, vector<32x64xbf16>,
    %c0_27 = arith.constant 0 : index
    %c1_28 = arith.constant 1 : index
    %c4_29 = arith.constant 4 : index
    %31 = vector.load %arg9[%c0_27, %c1_28, %c4_29] : memref<2x18x72xf32, #tpu.memory_space<vmem>>, vector<2x16x64xf32>
    %32 = vector.shape_cast %31 : vector<2x16x64xf32> to vector<32x64xf32>
    %33 = arith.truncf %32 : vector<32x64xf32> to vector<32x64xbf16>
    %c0_30 = arith.constant 0 : index
    %c256 = arith.constant 256 : index
    %34 = vector.load %arg10[%c0_30, %c256] : memref<32x576xbf16, #tpu.memory_space<vmem>>, vector<32x64xbf16>
    tpu.vector_store %arg10[%c0_30, %c256], %33 {strides = array<i32>} : memref<32x576xbf16, #tpu.memory_space<vmem>>, vector<32x64xbf16>,
    %c0_31 = arith.constant 0 : index
    %c1_32 = arith.constant 1 : index
    %c8_33 = arith.constant 8 : index
    %35 = vector.load %arg9[%c0_31, %c1_32, %c8_33] : memref<2x18x72xf32, #tpu.memory_space<vmem>>, vector<2x16x64xf32>
    %36 = vector.shape_cast %35 : vector<2x16x64xf32> to vector<32x64xf32>
    %37 = arith.truncf %36 : vector<32x64xf32> to vector<32x64xbf16>
    %c0_34 = arith.constant 0 : index
    %c320 = arith.constant 320 : index
    %38 = vector.load %arg10[%c0_34, %c320] : memref<32x576xbf16, #tpu.memory_space<vmem>>, vector<32x64xbf16>
    tpu.vector_store %arg10[%c0_34, %c320], %37 {strides = array<i32>} : memref<32x576xbf16, #tpu.memory_space<vmem>>, vector<32x64xbf16>,
    %c0_35 = arith.constant 0 : index
    %c2 = arith.constant 2 : index
    %c0_36 = arith.constant 0 : index
    %39 = vector.load %arg9[%c0_35, %c2, %c0_36] : memref<2x18x72xf32, #tpu.memory_space<vmem>>, vector<2x16x64xf32>
    %40 = vector.shape_cast %39 : vector<2x16x64xf32> to vector<32x64xf32>
    %41 = arith.truncf %40 : vector<32x64xf32> to vector<32x64xbf16>
    %c0_37 = arith.constant 0 : index
    %c384 = arith.constant 384 : index
    %42 = vector.load %arg10[%c0_37, %c384] : memref<32x576xbf16, #tpu.memory_space<vmem>>, vector<32x64xbf16>
    tpu.vector_store %arg10[%c0_37, %c384], %41 {strides = array<i32>} : memref<32x576xbf16, #tpu.memory_space<vmem>>, vector<32x64xbf16>,
    %c0_38 = arith.constant 0 : index
    %c2_39 = arith.constant 2 : index
    %c4_40 = arith.constant 4 : index
    %43 = vector.load %arg9[%c0_38, %c2_39, %c4_40] : memref<2x18x72xf32, #tpu.memory_space<vmem>>, vector<2x16x64xf32>
    %44 = vector.shape_cast %43 : vector<2x16x64xf32> to vector<32x64xf32>
    %45 = arith.truncf %44 : vector<32x64xf32> to vector<32x64xbf16>
    %c0_41 = arith.constant 0 : index
    %c448 = arith.constant 448 : index
    %46 = vector.load %arg10[%c0_41, %c448] : memref<32x576xbf16, #tpu.memory_space<vmem>>, vector<32x64xbf16>
    tpu.vector_store %arg10[%c0_41, %c448], %45 {strides = array<i32>} : memref<32x576xbf16, #tpu.memory_space<vmem>>, vector<32x64xbf16>,
    %c0_42 = arith.constant 0 : index
    %c2_43 = arith.constant 2 : index
    %c8_44 = arith.constant 8 : index
    %47 = vector.load %arg9[%c0_42, %c2_43, %c8_44] : memref<2x18x72xf32, #tpu.memory_space<vmem>>, vector<2x16x64xf32>
    %48 = vector.shape_cast %47 : vector<2x16x64xf32> to vector<32x64xf32>
    %49 = arith.truncf %48 : vector<32x64xf32> to vector<32x64xbf16>
    %c0_45 = arith.constant 0 : index
    %c512 = arith.constant 512 : index
    %50 = vector.load %arg10[%c0_45, %c512] : memref<32x576xbf16, #tpu.memory_space<vmem>>, vector<32x64xbf16>
    tpu.vector_store %arg10[%c0_45, %c512], %49 {strides = array<i32>} : memref<32x576xbf16, #tpu.memory_space<vmem>>, vector<32x64xbf16>,
    %c0_46 = arith.constant 0 : index
    %c0_47 = arith.constant 0 : index
    %51 = vector.load %arg10[%c0_46, %c0_47] : memref<32x576xbf16, #tpu.memory_space<vmem>>, vector<32x576xbf16>
    %c0_48 = arith.constant 0 : index
    %c0_49 = arith.constant 0 : index
    %52 = vector.load %arg2[%c0_48, %c0_49] : memref<576x64xbf16, #tpu.memory_space<vmem>>, vector<576x64xbf16>
    %cst_50 = arith.constant dense<0.000000e+00> : vector<32x64xf32>
    %53 = tpu.matmul %51, %52, %cst_50 {dimension_numbers = #tpu.dot_dimension_numbers<[1], [0], [0], [1], [0, 0, 1, 1], [], []>} : vector<32x576xbf16>, vector<576x64xbf16>, vector<32x64xf32> -> vector<32x64xf32>
    %c0_51 = arith.constant 0 : index
    %c0_52 = arith.constant 0 : index
    %54 = vector.load %arg3[%c0_51, %c0_52] : memref<1x64xf32, #tpu.memory_space<vmem>>, vector<1x64xf32>
    %55 = vector.broadcast %54 : vector<1x64xf32> to vector<32x64xf32>
    %56 = arith.addf %53, %55 : vector<32x64xf32>
    %cst_53 = arith.constant dense<0.000000e+00> : vector<64xf32>
    %57 = vector.multi_reduction <add>, %56, %cst_53 [0] : vector<32x64xf32> to vector<64xf32>
    %58 = vector.shape_cast %57 : vector<64xf32> to vector<1x64xf32>
    %c0_54 = arith.constant 0 : index
    %c0_55 = arith.constant 0 : index
    %c0_56 = arith.constant 0 : index
    %59 = vector.load %arg7[%c0_54, %c0_55, %c0_56] : memref<1x1x64xf32, #tpu.memory_space<vmem>>, vector<1x1x64xf32>
    %60 = vector.shape_cast %59 : vector<1x1x64xf32> to vector<1x64xf32>
    %61 = vector.shape_cast %58 : vector<1x64xf32> to vector<1x1x64xf32>
    tpu.vector_store %arg7[%c0_54, %c0_55, %c0_56], %61 {strides = array<i32>} : memref<1x1x64xf32, #tpu.memory_space<vmem>>, vector<1x1x64xf32>,
    %62 = arith.mulf %56, %56 : vector<32x64xf32>
    %cst_57 = arith.constant dense<0.000000e+00> : vector<64xf32>
    %63 = vector.multi_reduction <add>, %62, %cst_57 [0] : vector<32x64xf32> to vector<64xf32>
    %64 = vector.shape_cast %63 : vector<64xf32> to vector<1x64xf32>
    %c0_58 = arith.constant 0 : index
    %c0_59 = arith.constant 0 : index
    %c0_60 = arith.constant 0 : index
    %65 = vector.load %arg8[%c0_58, %c0_59, %c0_60] : memref<1x1x64xf32, #tpu.memory_space<vmem>>, vector<1x1x64xf32>
    %66 = vector.shape_cast %65 : vector<1x1x64xf32> to vector<1x64xf32>
    %67 = vector.shape_cast %64 : vector<1x64xf32> to vector<1x1x64xf32>
    tpu.vector_store %arg8[%c0_58, %c0_59, %c0_60], %67 {strides = array<i32>} : memref<1x1x64xf32, #tpu.memory_space<vmem>>, vector<1x1x64xf32>,
    %68 = vector.shape_cast %56 : vector<32x64xf32> to vector<2x16x64xf32>
    %69 = arith.truncf %68 : vector<2x16x64xf32> to vector<2x16x64xbf16>
    %c0_61 = arith.constant 0 : index
    %c0_62 = arith.constant 0 : index
    %c0_63 = arith.constant 0 : index
    %70 = vector.load %arg6[%c0_61, %c0_62, %c0_63] : memref<2x16x64xbf16, #tpu.memory_space<vmem>>, vector<2x16x64xbf16>
    tpu.vector_store %arg6[%c0_61, %c0_62, %c0_63], %69 {strides = array<i32>} : memref<2x16x64xbf16, #tpu.memory_space<vmem>>, vector<2x16x64xbf16>,
    return
  }
  func.func @transform_0(%arg0: i32) -> (i32, i32, i32) {
    %c0_i32 = arith.constant 0 : i32
    %c0_i32_0 = arith.constant 0 : i32
    %c0_i32_1 = arith.constant 0 : i32
    return %arg0, %c0_i32, %c0_i32_0 : i32, i32, i32
  }
  func.func @transform_1(%arg0: i32) -> (i32, i32) {
    %c0_i32 = arith.constant 0 : i32
    %c0_i32_0 = arith.constant 0 : i32
    %c0_i32_1 = arith.constant 0 : i32
    return %c0_i32, %c0_i32_0 : i32, i32
  }
  func.func @transform_2(%arg0: i32) -> (i32, i32) {
    %c0_i32 = arith.constant 0 : i32
    %c0_i32_0 = arith.constant 0 : i32
    %c0_i32_1 = arith.constant 0 : i32
    return %c0_i32, %c0_i32_0 : i32, i32
  }
  func.func @transform_3(%arg0: i32) -> (i32, i32) {
    %c0_i32 = arith.constant 0 : i32
    %c0_i32_0 = arith.constant 0 : i32
    %c0_i32_1 = arith.constant 0 : i32
    return %c0_i32, %c0_i32_0 : i32, i32
  }
  func.func @transform_4(%arg0: i32) -> (i32, i32) {
    %c0_i32 = arith.constant 0 : i32
    %c0_i32_0 = arith.constant 0 : i32
    %c0_i32_1 = arith.constant 0 : i32
    return %c0_i32, %c0_i32_0 : i32, i32
  }
  func.func @transform_5(%arg0: i32) -> (i32, i32, i32) {
    %c0_i32 = arith.constant 0 : i32
    %c0_i32_0 = arith.constant 0 : i32
    %c0_i32_1 = arith.constant 0 : i32
    return %arg0, %c0_i32, %c0_i32_0 : i32, i32, i32
  }
  func.func @transform_6(%arg0: i32) -> (i32, i32, i32) {
    %c0_i32 = arith.constant 0 : i32
    %c0_i32_0 = arith.constant 0 : i32
    %c0_i32_1 = arith.constant 0 : i32
    return %arg0, %c0_i32, %c0_i32_0 : i32, i32, i32
  }
  func.func @transform_7(%arg0: i32) -> (i32, i32, i32) {
    %c0_i32 = arith.constant 0 : i32
    %c0_i32_0 = arith.constant 0 : i32
    %c0_i32_1 = arith.constant 0 : i32
    return %arg0, %c0_i32, %c0_i32_0 : i32, i32, i32
  }
}

module attributes {stable_mosaic.version = 11 : i64} {
  func.func @kernel(%arg0: i32, %arg1: memref<2x1024xbf16, #tpu.memory_space<vmem>>, %arg2: memref<1x1024xf32, #tpu.memory_space<vmem>>, %arg3: memref<1x1024xf32, #tpu.memory_space<vmem>>, %arg4: memref<2x1024xf32, #tpu.memory_space<vmem>>) attributes {dimension_semantics = [#tpu.dimension_semantics<parallel>], iteration_bounds = array<i64: 1>, scalar_prefetch = 0 : i64, scratch_operands = 0 : i64, tpu.core_type = #tpu.core_type<tc>, window_params = [{transform_indices = @transform_0, window_bounds = array<i64: 2, 1024>}, {pipeline_mode = #tpu.pipeline_mode<synchronous>, transform_indices = @transform_1, window_bounds = array<i64: 1, 1024>}, {pipeline_mode = #tpu.pipeline_mode<synchronous>, transform_indices = @transform_2, window_bounds = array<i64: 1, 1024>}, {transform_indices = @transform_3, window_bounds = array<i64: 2, 1024>}]} {
    %c0 = arith.constant 0 : index
    %c0_0 = arith.constant 0 : index
    %0 = vector.load %arg1[%c0, %c0_0] : memref<2x1024xbf16, #tpu.memory_space<vmem>>, vector<2x1024xbf16>
    %1 = arith.extf %0 : vector<2x1024xbf16> to vector<2x1024xf32>
    %c0_1 = arith.constant 0 : index
    %c0_2 = arith.constant 0 : index
    %2 = vector.load %arg2[%c0_1, %c0_2] : memref<1x1024xf32, #tpu.memory_space<vmem>>, vector<1x1024xf32>
    %3 = vector.broadcast %2 : vector<1x1024xf32> to vector<2x1024xf32>
    %4 = arith.mulf %1, %3 : vector<2x1024xf32>
    %c0_3 = arith.constant 0 : index
    %c0_4 = arith.constant 0 : index
    %5 = vector.load %arg3[%c0_3, %c0_4] : memref<1x1024xf32, #tpu.memory_space<vmem>>, vector<1x1024xf32>
    %6 = vector.broadcast %5 : vector<1x1024xf32> to vector<2x1024xf32>
    %7 = arith.addf %4, %6 : vector<2x1024xf32>
    %cst = arith.constant 0.000000e+00 : f32
    %8 = vector.broadcast %cst : f32 to vector<2x1024xf32>
    %9 = arith.maximumf %7, %8 : vector<2x1024xf32>
    %c0_5 = arith.constant 0 : index
    %c0_6 = arith.constant 0 : index
    %10 = vector.load %arg4[%c0_5, %c0_6] : memref<2x1024xf32, #tpu.memory_space<vmem>>, vector<2x1024xf32>
    tpu.vector_store %arg4[%c0_5, %c0_6], %9 {strides = array<i32>} : memref<2x1024xf32, #tpu.memory_space<vmem>>, vector<2x1024xf32>,
    return
  }
  func.func @transform_0(%arg0: i32) -> (i32, i32) {
    %c0_i32 = arith.constant 0 : i32
    %c0_i32_0 = arith.constant 0 : i32
    return %arg0, %c0_i32 : i32, i32
  }
  func.func @transform_1(%arg0: i32) -> (i32, i32) {
    %c0_i32 = arith.constant 0 : i32
    %c0_i32_0 = arith.constant 0 : i32
    %c0_i32_1 = arith.constant 0 : i32
    return %c0_i32, %c0_i32_0 : i32, i32
  }
  func.func @transform_2(%arg0: i32) -> (i32, i32) {
    %c0_i32 = arith.constant 0 : i32
    %c0_i32_0 = arith.constant 0 : i32
    %c0_i32_1 = arith.constant 0 : i32
    return %c0_i32, %c0_i32_0 : i32, i32
  }
  func.func @transform_3(%arg0: i32) -> (i32, i32) {
    %c0_i32 = arith.constant 0 : i32
    %c0_i32_0 = arith.constant 0 : i32
    return %arg0, %c0_i32 : i32, i32
  }
}

</mosaic_0001>

<bundles_post_ra>
// kernel: tile.43
= control target key start
LH: loop header
LB: loop body
LE: loop exit
PB: predicated region body
PF: predicated region fallthrough
CT: control target
= control target key end

     0   :  { %s28_s0 = inlined_call_operand.vmem [shape: f32[4], index: 0, kind: input, shape index: {}]   ;;  %s29_s1 = inlined_call_operand.vmem [shape: f32[16,4], index: 1, kind: output, shape index: {}]  }
   0x1   :  { %v4_v0 = vld [vmem:[%s28_s0] ss:$0 sm:$0xff] }
   0x2   :  { %5 = vst [vmem:[%s29_s1] sm:$0xff] %v4_v0  ;;  %8 = vst [vmem:[%s29_s1 + $0x8] sm:$0xff] %v4_v0 }

// kernel: tile.44
= control target key start
LH: loop header
LB: loop body
LE: loop exit
PB: predicated region body
PF: predicated region fallthrough
CT: control target
= control target key end

     0   :  { %s131_s10 = smov 60   ;;  %s132_s11 = smov 52   ;;  %vm3_vm0 = vcmask 31744   ;;  %vm9_vm1 = vcmask 523744   ;;  %vm15_vm2 = vcmask 490944   ;;  %vm21_vm3 = vcmask 458144   ;;  %s207_s0 = inlined_call_operand.vmem [shape: f32[16,4], index: 0, kind: input, shape index: {}]   ;;  %s208_s1 = inlined_call_operand.vmem [shape: f32[1,64], index: 1, kind: output, shape index: {}]  }
   0x1   :  { %v101_v0 = vld [vmem:[%s207_s0 + $0xf] sm:$0x1]   ;;  %v103_v1 = vld [vmem:[%s207_s0 + $0xd] sm:$0x1]   ;;  %v102_v2 = vld [vmem:[%s207_s0 + $0xe] sm:$0x1]  }
   0x2   :  { %7 = vrot.lane.b32.xlu0 %v101_v0, %s131_s10  ;;  %19 = vrot.lane.b32.xlu1 %v103_v1, %s132_s11  ;;  %v104_v3 = vld [vmem:[%s207_s0 + $0xc] sm:$0x1]   ;;  %s133_s16 = smov 56   ;;  %s134_s17 = smov 48   ;;  %v105_v4 = vld [vmem:[%s207_s0 + $0xb] sm:$0x1]  }
   0x3   :  { %v106_v5 = vld [vmem:[%s207_s0 + $0xa] sm:$0x1]   ;;  %v2_v6 = vld [vmem:[%s207_s0] sm:$0x1]   ;;  %s135_s24 = smov 44   ;;  %s136_s25 = smov 40  }
   0x4   :  { %4 = vst.msk [vmem:[#allocation0] sm:$0x1] %vm3_vm0, %v2_v6   ;;  %v107_v7 = vld [vmem:[%s207_s0 + $0x9] sm:$0x1]   ;;  %v108_v8 = vld [vmem:[%s207_s0 + $0x8] sm:$0x1]  }
   0x5   :  { %s137_s30 = smov 36   ;;  %s138_s2 = smov 32   ;;  %v109_v9 = vld [vmem:[%s207_s0 + $0x7] sm:$0x1]   ;;  %v110_v10 = vld [vmem:[%s207_s0 + $0x6] sm:$0x1]  }
   0x6   :  { %13 = vrot.lane.b32.xlu0 %v102_v2, %s133_s16  ;;  %25 = vrot.lane.b32.xlu1 %v104_v3, %s134_s17  ;;  %s139_s7 = smov 28   ;;  %s140_s8 = smov 24   ;;  %v111_v11 = vld [vmem:[%s207_s0 + $0x5] sm:$0x1]   ;;  %v112_v12 = vld [vmem:[%s207_s0 + $0x4] sm:$0x1]  }
   0x7   :  { %s141_s13 = smov 20   ;;  %s142_s14 = smov 16   ;;  %v113_v13 = vld [vmem:[%s207_s0 + $0x3] sm:$0x1]   ;;  %v114_v14 = vld [vmem:[%s207_s0 + $0x2] sm:$0x1]  }
   0x8   :  { %s143_s19 = smov 12   ;;  %s144_s20 = smov 8   ;;  %v115_v15 = vld [vmem:[%s207_s0 + $0x1] sm:$0x1]   ;;  %vm27_vm4 = vcmask 425344   ;;  %vm33_vm5 = vcmask 392544  }
   0x9   :  { %s145_s0 = smov 4   ;;  %vm39_vm6 = vcmask 359744   ;;  %vm45_vm7 = vcmask 326944   ;;  %vm51_vm8 = vcmask 294144   ;;  %vm57_vm9 = vcmask 261344  }
   0xa   :  { %31 = vrot.lane.b32.xlu0 %v105_v4, %s135_s24  ;;  %37 = vrot.lane.b32.xlu1 %v106_v5, %s136_s25  ;;  %vm63_vm10 = vcmask 228544   ;;  %vm69_vm11 = vcmask 195744   ;;  %vm75_vm12 = vcmask 162944   ;;  %vm81_vm13 = vcmask 130144  }
   0xb   :  { %vm87_vm14 = vcmask 97344   ;;  %vm93_vm15 = vcmask 64544  }
   0xe   :  { %43 = vrot.lane.b32.xlu0 %v107_v7, %s137_s30  ;;  %49 = vrot.lane.b32.xlu1 %v108_v8, %s138_s2 }
  0x12   :  { %55 = vrot.lane.b32.xlu0 %v109_v9, %s139_s7  ;;  %61 = vrot.lane.b32.xlu1 %v110_v10, %s140_s8 }
  0x16   :  { %67 = vrot.lane.b32.xlu0 %v111_v11, %s141_s13  ;;  %73 = vrot.lane.b32.xlu1 %v112_v12, %s142_s14 }
  0x1a   :  { %79 = vrot.lane.b32.xlu0 %v113_v13, %s143_s19  ;;  %85 = vrot.lane.b32.xlu1 %v114_v14, %s144_s20 }
  0x1e   :  { %91 = vrot.lane.b32.xlu0 %v115_v15, %s145_s0 }
  0x74   :  { %v8_v16 = vpop.permute.xlu0 %7   ;;  %v20_v17 = vpop.permute.xlu1 %19  }
  0x75   :  { %10 = vst.msk [vmem:[#allocation0] sm:$0x1] %vm9_vm1, %v8_v16  }
  0x78   :  { %v14_v18 = vpop.permute.xlu0 %13   ;;  %v26_v19 = vpop.permute.xlu1 %25  }
  0x79   :  { %16 = vst.msk [vmem:[#allocation0] sm:$0x1] %vm15_vm2, %v14_v18  }
  0x7a   :  { %22 = vst.msk [vmem:[#allocation0] sm:$0x1] %vm21_vm3, %v20_v17  }
  0x7b   :  { %28 = vst.msk [vmem:[#allocation0] sm:$0x1] %vm27_vm4, %v26_v19  }
  0x7c   :  { %v32_v20 = vpop.permute.xlu0 %31   ;;  %v38_v21 = vpop.permute.xlu1 %37  }
  0x7d   :  { %34 = vst.msk [vmem:[#allocation0] sm:$0x1] %vm33_vm5, %v32_v20  }
  0x7e   :  { %40 = vst.msk [vmem:[#allocation0] sm:$0x1] %vm39_vm6, %v38_v21  }
  0x80   :  { %v44_v22 = vpop.permute.xlu0 %43   ;;  %v50_v23 = vpop.permute.xlu1 %49  }
  0x81   :  { %46 = vst.msk [vmem:[#allocation0] sm:$0x1] %vm45_vm7, %v44_v22  }
  0x82   :  { %52 = vst.msk [vmem:[#allocation0] sm:$0x1] %vm51_vm8, %v50_v23  }
  0x84   :  { %v56_v24 = vpop.permute.xlu0 %55   ;;  %v62_v25 = vpop.permute.xlu1 %61  }
  0x85   :  { %58 = vst.msk [vmem:[#allocation0] sm:$0x1] %vm57_vm9, %v56_v24  }
  0x86   :  { %64 = vst.msk [vmem:[#allocation0] sm:$0x1] %vm63_vm10, %v62_v25  }
  0x88   :  { %v68_v26 = vpop.permute.xlu0 %67   ;;  %v74_v27 = vpop.permute.xlu1 %73  }
  0x89   :  { %70 = vst.msk [vmem:[#allocation0] sm:$0x1] %vm69_vm11, %v68_v26  }
  0x8a   :  { %76 = vst.msk [vmem:[#allocation0] sm:$0x1] %vm75_vm12, %v74_v27  }
  0x8c   :  { %v80_v28 = vpop.permute.xlu0 %79   ;;  %v86_v29 = vpop.permute.xlu1 %85  }
  0x8d   :  { %82 = vst.msk [vmem:[#allocation0] sm:$0x1] %vm81_vm13, %v80_v28  }
  0x8e   :  { %88 = vst.msk [vmem:[#allocation0] sm:$0x1] %vm87_vm14, %v86_v29  }
  0x90   :  { %v92_v30 = vpop.permute.xlu0 %91  }
  0x91   :  { %94 = vst.msk [vmem:[#allocation0] sm:$0x1] %vm93_vm15, %v92_v30  }
  0x98   :  { %v98_v31 = vld [vmem:[#allocation0] sm:$0x1] }
  0x99   :  { %100 = vst [vmem:[%s208_s1] sm:$0x1] %v98_v31 }

// kernel: tile.68
= control target key start
LH: loop header
LB: loop body
LE: loop exit
PB: predicated region body
PF: predicated region fallthrough
CT: control target
= control target key end

     0   :  { %s208_s0 = inlined_call_operand.vmem [shape: f32[4], index: 0, kind: input, shape index: {}]   ;;  %s209_s1 = inlined_call_operand.vmem [shape: f32[256,4], index: 1, kind: output, shape index: {}]  }
   0x1   :  { %v4_v0 = vld [vmem:[%s208_s0] ss:$0 sm:$0xff] }
   0x2   :  { %5 = vst [vmem:[%s209_s1] sm:$0xff] %v4_v0  ;;  %68 = vst [vmem:[%s209_s1 + $0x8] sm:$0xff] %v4_v0 }
   0x3   :  { %69 = vst [vmem:[%s209_s1 + $0x10] sm:$0xff] %v4_v0  ;;  %70 = vst [vmem:[%s209_s1 + $0x18] sm:$0xff] %v4_v0 }
   0x4   :  { %71 = vst [vmem:[%s209_s1 + $0x20] sm:$0xff] %v4_v0  ;;  %72 = vst [vmem:[%s209_s1 + $0x28] sm:$0xff] %v4_v0 }
   0x5   :  { %73 = vst [vmem:[%s209_s1 + $0x30] sm:$0xff] %v4_v0  ;;  %74 = vst [vmem:[%s209_s1 + $0x38] sm:$0xff] %v4_v0 }
   0x6   :  { %75 = vst [vmem:[%s209_s1 + $0x40] sm:$0xff] %v4_v0  ;;  %76 = vst [vmem:[%s209_s1 + $0x48] sm:$0xff] %v4_v0 }
   0x7   :  { %77 = vst [vmem:[%s209_s1 + $0x50] sm:$0xff] %v4_v0  ;;  %78 = vst [vmem:[%s209_s1 + $0x58] sm:$0xff] %v4_v0 }
   0x8   :  { %79 = vst [vmem:[%s209_s1 + $0x60] sm:$0xff] %v4_v0  ;;  %80 = vst [vmem:[%s209_s1 + $0x68] sm:$0xff] %v4_v0 }
   0x9   :  { %81 = vst [vmem:[%s209_s1 + $0x70] sm:$0xff] %v4_v0  ;;  %82 = vst [vmem:[%s209_s1 + $0x78] sm:$0xff] %v4_v0 }
   0xa   :  { %83 = vst [vmem:[%s209_s1 + $0x80] sm:$0xff] %v4_v0  ;;  %84 = vst [vmem:[%s209_s1 + $0x88] sm:$0xff] %v4_v0 }
   0xb   :  { %85 = vst [vmem:[%s209_s1 + $0x90] sm:$0xff] %v4_v0  ;;  %86 = vst [vmem:[%s209_s1 + $0x98] sm:$0xff] %v4_v0 }
   0xc   :  { %87 = vst [vmem:[%s209_s1 + $0xa0] sm:$0xff] %v4_v0  ;;  %88 = vst [vmem:[%s209_s1 + $0xa8] sm:$0xff] %v4_v0 }
   0xd   :  { %89 = vst [vmem:[%s209_s1 + $0xb0] sm:$0xff] %v4_v0  ;;  %90 = vst [vmem:[%s209_s1 + $0xb8] sm:$0xff] %v4_v0 }
   0xe   :  { %91 = vst [vmem:[%s209_s1 + $0xc0] sm:$0xff] %v4_v0  ;;  %92 = vst [vmem:[%s209_s1 + $0xc8] sm:$0xff] %v4_v0 }
   0xf   :  { %93 = vst [vmem:[%s209_s1 + $0xd0] sm:$0xff] %v4_v0  ;;  %94 = vst [vmem:[%s209_s1 + $0xd8] sm:$0xff] %v4_v0 }
  0x10   :  { %95 = vst [vmem:[%s209_s1 + $0xe0] sm:$0xff] %v4_v0  ;;  %96 = vst [vmem:[%s209_s1 + $0xe8] sm:$0xff] %v4_v0 }
  0x11   :  { %97 = vst [vmem:[%s209_s1 + $0xf0] sm:$0xff] %v4_v0  ;;  %98 = vst [vmem:[%s209_s1 + $0xf8] sm:$0xff] %v4_v0 }

// kernel: tile.69
= control target key start
LH: loop header
LB: loop body
LE: loop exit
PB: predicated region body
PF: predicated region fallthrough
CT: control target
= control target key end

     0   :  { %vm5_vm0 = vcmask 1041409   ;;  %vm9_vm1 = vcmask 1042434   ;;  %vm13_vm2 = vcmask 1043459   ;;  %vm17_vm3 = vcmask 1044484   ;;  %s1465_s19 = smov 124   ;;  %s1466_s9 = smov 116   ;;  %s2522_s0 = inlined_call_operand.vmem [shape: f32[256,4], index: 0, kind: input, shape index: {}]   ;;  %s2523_s1 = inlined_call_operand.vmem [shape: f32[1,1024], index: 1, kind: output, shape index: {}]  }
   0x1   :  { %v1179_v0 = vld [vmem:[%s2522_s0 + $0x1f] sm:$0x1]   ;;  %vm21_vm4 = vcmask 1045509   ;;  %vm25_vm5 = vcmask 1046534   ;;  %vm29_vm6 = vcmask 1047559   ;;  %s1467_s26 = smov 120  }
   0x2   :  { %v1180_v1 = vld [vmem:[%s2522_s0 + $0x3e] sm:$0x2]   ;;  %v1195_v10 = vld [vmem:[%s2522_s0 + $0x1d] sm:$0x1]   ;;  %v1187_v25 = vld [vmem:[%s2522_s0 + $0x1e] sm:$0x1]  }
   0x3   :  { %v39_v2 = vsel %vm5_vm0, %v1180_v1, %v1179_v0  ;;  %v1181_v3 = vld [vmem:[%s2522_s0 + $0x5d] sm:$0x4]   ;;  %v1196_v11 = vld [vmem:[%s2522_s0 + $0x3c] sm:$0x2]   ;;  %v1188_v26 = vld [vmem:[%s2522_s0 + $0x3d] sm:$0x2]  }
   0x4   :  { %v1182_v4 = vld [vmem:[%s2522_s0 + $0x7c] sm:$0x8]   ;;  %v43_v6 = vsel %vm9_vm1, %v1181_v3, %v39_v2  ;;  %v1197_v12 = vld [vmem:[%s2522_s0 + $0x5b] sm:$0x4]   ;;  %v109_v15 = vsel %vm5_vm0, %v1196_v11, %v1195_v10  ;;  %v1189_v27 = vld [vmem:[%s2522_s0 + $0x5c] sm:$0x4]   ;;  %v74_v30 = vsel %vm5_vm0, %v1188_v26, %v1187_v25 }
   0x5   :  { %v1183_v5 = vld [vmem:[%s2522_s0 + $0x9b] sm:$0x10]   ;;  %v47_v9 = vsel %vm13_vm2, %v1182_v4, %v43_v6  ;;  %v1198_v16 = vld [vmem:[%s2522_s0 + $0x7a] sm:$0x8]   ;;  %v113_v19 = vsel %vm9_vm1, %v1197_v12, %v109_v15  ;;  %v1190_v31 = vld [vmem:[%s2522_s0 + $0x7b] sm:$0x8]   ;;  %v78_v34 = vsel %vm9_vm1, %v1189_v27, %v74_v30 }
   0x6   :  { %v1184_v7 = vld [vmem:[%s2522_s0 + $0xba] sm:$0x20]   ;;  %v51_v13 = vsel %vm17_vm3, %v1183_v5, %v47_v9  ;;  %v1199_v17 = vld [vmem:[%s2522_s0 + $0x99] sm:$0x10]   ;;  %v117_v24 = vsel %vm13_vm2, %v1198_v16, %v113_v19  ;;  %v1191_v32 = vld [vmem:[%s2522_s0 + $0x9a] sm:$0x10]   ;;  %v82_v39 = vsel %vm13_vm2, %v1190_v31, %v78_v34 }
   0x7   :  { %v1185_v8 = vld [vmem:[%s2522_s0 + $0xd9] sm:$0x40]   ;;  %v55_v18 = vsel %vm21_vm4, %v1184_v7, %v51_v13  ;;  %v1200_v20 = vld [vmem:[%s2522_s0 + $0xb8] sm:$0x20]   ;;  %v121_v29 = vsel %vm17_vm3, %v1199_v17, %v117_v24  ;;  %v1192_v35 = vld [vmem:[%s2522_s0 + $0xb9] sm:$0x20]   ;;  %v86_v44 = vsel %vm17_vm3, %v1191_v32, %v82_v39 }
   0x8   :  { %v1186_v14 = vld [vmem:[%s2522_s0 + $0xf8] sm:$0x80]   ;;  %v1201_v21 = vld [vmem:[%s2522_s0 + $0xd7] sm:$0x40]   ;;  %v59_v23 = vsel %vm25_vm5, %v1185_v8, %v55_v18  ;;  %v125_v33 = vsel %vm21_vm4, %v1200_v20, %v121_v29  ;;  %v1193_v36 = vld [vmem:[%s2522_s0 + $0xd8] sm:$0x40]   ;;  %v90_v49 = vsel %vm21_vm4, %v1192_v35, %v86_v44 }
   0x9   :  { %v1202_v22 = vld [vmem:[%s2522_s0 + $0xf6] sm:$0x80]   ;;  %v63_v28 = vsel %vm29_vm6, %v1186_v14, %v59_v23  ;;  %v1203_v37 = vld [vmem:[%s2522_s0 + $0x1c] sm:$0x1]   ;;  %v129_v38 = vsel %vm25_vm5, %v1201_v21, %v125_v33  ;;  %v1194_v45 = vld [vmem:[%s2522_s0 + $0xf7] sm:$0x80]   ;;  %v94_v54 = vsel %vm25_vm5, %v1193_v36, %v90_v49 }
   0xa   :  { %64 = vrot.lane.b32.xlu0 %v63_v28, %s1465_s19  ;;  %v1204_v40 = vld [vmem:[%s2522_s0 + $0x3b] sm:$0x2]   ;;  %v133_v43 = vsel %vm29_vm6, %v1202_v22, %v129_v38  ;;  %v1211_v53 = vld [vmem:[%s2522_s0 + $0x1b] sm:$0x1]   ;;  %v98_v59 = vsel %vm29_vm6, %v1194_v45, %v94_v54  ;;  %v1219_v3 = vld [vmem:[%s2522_s0 + $0x1a] sm:$0x1]  }
   0xb   :  { %v1205_v41 = vld [vmem:[%s2522_s0 + $0x5a] sm:$0x4]   ;;  %v144_v46 = vsel %vm5_vm0, %v1204_v40, %v1203_v37  ;;  %134 = vrot.lane.b32.xlu1 %v133_v43, %s1466_s9  ;;  %v1212_v56 = vld [vmem:[%s2522_s0 + $0x3a] sm:$0x2]   ;;  %v1220_v4 = vld [vmem:[%s2522_s0 + $0x39] sm:$0x2]  }
   0xc   :  { %v1206_v42 = vld [vmem:[%s2522_s0 + $0x79] sm:$0x8]   ;;  %v148_v50 = vsel %vm9_vm1, %v1205_v41, %v144_v46  ;;  %v1213_v57 = vld [vmem:[%s2522_s0 + $0x59] sm:$0x4]   ;;  %v179_v61 = vsel %vm5_vm0, %v1212_v56, %v1211_v53  ;;  %v214_v7 = vsel %vm5_vm0, %v1220_v4, %v1219_v3  ;;  %v1221_v8 = vld [vmem:[%s2522_s0 + $0x58] sm:$0x4]  }
   0xd   :  { %v1207_v47 = vld [vmem:[%s2522_s0 + $0x98] sm:$0x10]   ;;  %v152_v55 = vsel %vm13_vm2, %v1206_v42, %v148_v50  ;;  %v1214_v58 = vld [vmem:[%s2522_s0 + $0x78] sm:$0x8]   ;;  %v183_v1 = vsel %vm9_vm1, %v1213_v57, %v179_v61  ;;  %v1222_v9 = vld [vmem:[%s2522_s0 + $0x77] sm:$0x8]   ;;  %v218_v14 = vsel %vm9_vm1, %v1221_v8, %v214_v7 }
   0xe   :  { %v1208_v48 = vld [vmem:[%s2522_s0 + $0xb7] sm:$0x20]   ;;  %v156_v60 = vsel %vm17_vm3, %v1207_v47, %v152_v55  ;;  %v1215_v62 = vld [vmem:[%s2522_s0 + $0x97] sm:$0x10]   ;;  %99 = vrot.lane.b32.xlu0 %v98_v59, %s1467_s26  ;;  %v187_v6 = vsel %vm13_vm2, %v1214_v58, %v183_v1  ;;  %v1223_v10 = vld [vmem:[%s2522_s0 + $0x96] sm:$0x10]   ;;  %v222_v18 = vsel %vm13_vm2, %v1222_v9, %v218_v14 }
   0xf   :  { %v1209_v51 = vld [vmem:[%s2522_s0 + $0xd6] sm:$0x40]   ;;  %v1216_v63 = vld [vmem:[%s2522_s0 + $0xb6] sm:$0x20]   ;;  %v160_v0 = vsel %vm21_vm4, %v1208_v48, %v156_v60  ;;  %v191_v12 = vsel %vm17_vm3, %v1215_v62, %v187_v6  ;;  %v1224_v15 = vld [vmem:[%s2522_s0 + $0xb5] sm:$0x20]   ;;  %v226_v23 = vsel %vm17_vm3, %v1223_v10, %v222_v18 }
  0x10   :  { %v1210_v52 = vld [vmem:[%s2522_s0 + $0xf5] sm:$0x80]   ;;  %v1217_v2 = vld [vmem:[%s2522_s0 + $0xd5] sm:$0x40]   ;;  %v164_v5 = vsel %vm25_vm5, %v1209_v51, %v160_v0  ;;  %v1225_v16 = vld [vmem:[%s2522_s0 + $0xd4] sm:$0x40]   ;;  %v195_v17 = vsel %vm21_vm4, %v1216_v63, %v191_v12  ;;  %v230_v29 = vsel %vm21_vm4, %v1224_v15, %v226_v23 }
  0x11   :  { %v168_v11 = vsel %vm29_vm6, %v1210_v52, %v164_v5  ;;  %v1218_v13 = vld [vmem:[%s2522_s0 + $0xf4] sm:$0x80]   ;;  %s1468_s16 = smov 112   ;;  %v1226_v19 = vld [vmem:[%s2522_s0 + $0xf3] sm:$0x80]   ;;  %v199_v22 = vsel %vm25_vm5, %v1217_v2, %v195_v17  ;;  %s1469_s4 = smov 108   ;;  %v234_v33 = vsel %vm25_vm5, %v1225_v16, %v230_v29 }
  0x12   :  { %169 = vrot.lane.b32.xlu1 %v168_v11, %s1468_s16  ;;  %v1227_v20 = vld [vmem:[%s2522_s0 + $0x19] sm:$0x1]   ;;  %v203_v28 = vsel %vm29_vm6, %v1218_v13, %v199_v22  ;;  %v1235_v35 = vld [vmem:[%s2522_s0 + $0x18] sm:$0x1]   ;;  %v238_v38 = vsel %vm29_vm6, %v1226_v19, %v234_v33  ;;  %s1470_s17 = smov 104   ;;  %s1471_s5 = smov 100  }
  0x13   :  { %v1228_v21 = vld [vmem:[%s2522_s0 + $0x38] sm:$0x2]   ;;  %204 = vrot.lane.b32.xlu0 %v203_v28, %s1469_s4  ;;  %v1236_v36 = vld [vmem:[%s2522_s0 + $0x37] sm:$0x2]   ;;  %v1243_v51 = vld [vmem:[%s2522_s0 + $0x17] sm:$0x1]  }
  0x14   :  { %v249_v24 = vsel %vm5_vm0, %v1228_v21, %v1227_v20  ;;  %v1229_v25 = vld [vmem:[%s2522_s0 + $0x57] sm:$0x4]   ;;  %v1237_v37 = vld [vmem:[%s2522_s0 + $0x56] sm:$0x4]   ;;  %v284_v41 = vsel %vm5_vm0, %v1236_v36, %v1235_v35  ;;  %v1244_v52 = vld [vmem:[%s2522_s0 + $0x36] sm:$0x2]  }
  0x15   :  { %v1230_v26 = vld [vmem:[%s2522_s0 + $0x76] sm:$0x8]   ;;  %v253_v30 = vsel %vm9_vm1, %v1229_v25, %v249_v24  ;;  %v1238_v42 = vld [vmem:[%s2522_s0 + $0x75] sm:$0x8]   ;;  %v288_v45 = vsel %vm9_vm1, %v1237_v37, %v284_v41  ;;  %v1245_v53 = vld [vmem:[%s2522_s0 + $0x55] sm:$0x4]   ;;  %v319_v56 = vsel %vm5_vm0, %v1244_v52, %v1243_v51 }
  0x16   :  { %v1231_v27 = vld [vmem:[%s2522_s0 + $0x95] sm:$0x10]   ;;  %v257_v34 = vsel %vm13_vm2, %v1230_v26, %v253_v30  ;;  %v1239_v43 = vld [vmem:[%s2522_s0 + $0x94] sm:$0x10]   ;;  %239 = vrot.lane.b32.xlu1 %v238_v38, %s1470_s17  ;;  %v292_v50 = vsel %vm13_vm2, %v1238_v42, %v288_v45  ;;  %v1246_v57 = vld [vmem:[%s2522_s0 + $0x74] sm:$0x8]   ;;  %v323_v60 = vsel %vm9_vm1, %v1245_v53, %v319_v56 }
  0x17   :  { %v1232_v31 = vld [vmem:[%s2522_s0 + $0xb4] sm:$0x20]   ;;  %v261_v39 = vsel %vm17_vm3, %v1231_v27, %v257_v34  ;;  %v1240_v46 = vld [vmem:[%s2522_s0 + $0xb3] sm:$0x20]   ;;  %v296_v55 = vsel %vm17_vm3, %v1239_v43, %v292_v50  ;;  %v1247_v58 = vld [vmem:[%s2522_s0 + $0x93] sm:$0x10]   ;;  %v327_v1 = vsel %vm13_vm2, %v1246_v57, %v323_v60 }
  0x18   :  { %v1233_v32 = vld [vmem:[%s2522_s0 + $0xd3] sm:$0x40]   ;;  %v265_v44 = vsel %vm21_vm4, %v1232_v31, %v261_v39  ;;  %v1241_v47 = vld [vmem:[%s2522_s0 + $0xd2] sm:$0x40]   ;;  %v300_v59 = vsel %vm21_vm4, %v1240_v46, %v296_v55  ;;  %v1248_v61 = vld [vmem:[%s2522_s0 + $0xb2] sm:$0x20]   ;;  %v331_v6 = vsel %vm17_vm3, %v1247_v58, %v327_v1 }
  0x19   :  { %v1234_v40 = vld [vmem:[%s2522_s0 + $0xf2] sm:$0x80]   ;;  %v1242_v48 = vld [vmem:[%s2522_s0 + $0xf1] sm:$0x80]   ;;  %v269_v49 = vsel %vm25_vm5, %v1233_v32, %v265_v44  ;;  %v1249_v62 = vld [vmem:[%s2522_s0 + $0xd1] sm:$0x40]   ;;  %v304_v0 = vsel %vm25_vm5, %v1241_v47, %v300_v59  ;;  %v335_v11 = vsel %vm21_vm4, %v1248_v61, %v331_v6 }
  0x1a   :  { %v273_v54 = vsel %vm29_vm6, %v1234_v40, %v269_v49  ;;  %v1251_v63 = vld [vmem:[%s2522_s0 + $0x16] sm:$0x1]   ;;  %v308_v5 = vsel %vm29_vm6, %v1242_v48, %v304_v0  ;;  %v1250_v7 = vld [vmem:[%s2522_s0 + $0xf0] sm:$0x80]   ;;  %s1472_s24 = smov 96   ;;  %v339_v16 = vsel %vm25_vm5, %v1249_v62, %v335_v11  ;;  %s1473_s12 = smov 92  }
  0x1b   :  { %274 = vrot.lane.b32.xlu0 %v273_v54, %s1471_s5  ;;  %v1252_v2 = vld [vmem:[%s2522_s0 + $0x35] sm:$0x2]   ;;  %309 = vrot.lane.b32.xlu1 %v308_v5, %s1472_s24  ;;  %v1259_v15 = vld [vmem:[%s2522_s0 + $0x15] sm:$0x1]   ;;  %v343_v21 = vsel %vm29_vm6, %v1250_v7, %v339_v16  ;;  %s1474_s2 = smov 88   ;;  %s1475_s19 = smov 84  }
  0x1c   :  { %v1253_v3 = vld [vmem:[%s2522_s0 + $0x54] sm:$0x4]   ;;  %v354_v8 = vsel %vm5_vm0, %v1252_v2, %v1251_v63  ;;  %v1260_v18 = vld [vmem:[%s2522_s0 + $0x34] sm:$0x2]   ;;  %v1267_v29 = vld [vmem:[%s2522_s0 + $0x14] sm:$0x1]  }
  0x1d   :  { %v1254_v4 = vld [vmem:[%s2522_s0 + $0x73] sm:$0x8]   ;;  %v358_v12 = vsel %vm9_vm1, %v1253_v3, %v354_v8  ;;  %v1261_v19 = vld [vmem:[%s2522_s0 + $0x53] sm:$0x4]   ;;  %v389_v23 = vsel %vm5_vm0, %v1260_v18, %v1259_v15  ;;  %v1268_v30 = vld [vmem:[%s2522_s0 + $0x33] sm:$0x2]  }
  0x1e   :  { %v1255_v9 = vld [vmem:[%s2522_s0 + $0x92] sm:$0x10]   ;;  %v362_v17 = vsel %vm13_vm2, %v1254_v4, %v358_v12  ;;  %v1262_v20 = vld [vmem:[%s2522_s0 + $0x72] sm:$0x8]   ;;  %v393_v27 = vsel %vm9_vm1, %v1261_v19, %v389_v23  ;;  %v424_v33 = vsel %vm5_vm0, %v1268_v30, %v1267_v29  ;;  %v1269_v34 = vld [vmem:[%s2522_s0 + $0x52] sm:$0x4]  }
  0x1f   :  { %v1256_v10 = vld [vmem:[%s2522_s0 + $0xb1] sm:$0x20]   ;;  %v366_v22 = vsel %vm17_vm3, %v1255_v9, %v362_v17  ;;  %v1263_v24 = vld [vmem:[%s2522_s0 + $0x91] sm:$0x10]   ;;  %344 = vrot.lane.b32.xlu0 %v343_v21, %s1473_s12  ;;  %v397_v32 = vsel %vm13_vm2, %v1262_v20, %v393_v27  ;;  %v1270_v35 = vld [vmem:[%s2522_s0 + $0x71] sm:$0x8]   ;;  %v428_v40 = vsel %vm9_vm1, %v1269_v34, %v424_v33 }
  0x20   :  { %v1257_v13 = vld [vmem:[%s2522_s0 + $0xd0] sm:$0x40]   ;;  %v1264_v25 = vld [vmem:[%s2522_s0 + $0xb0] sm:$0x20]   ;;  %v370_v26 = vsel %vm21_vm4, %v1256_v10, %v366_v22  ;;  %v1271_v36 = vld [vmem:[%s2522_s0 + $0x90] sm:$0x10]   ;;  %v401_v38 = vsel %vm17_vm3, %v1263_v24, %v397_v32  ;;  %v432_v44 = vsel %vm13_vm2, %v1270_v35, %v428_v40 }
  0x21   :  { %v1258_v14 = vld [vmem:[%s2522_s0 + $0xef] sm:$0x80]   ;;  %v1265_v28 = vld [vmem:[%s2522_s0 + $0xcf] sm:$0x40]   ;;  %v374_v31 = vsel %vm25_vm5, %v1257_v13, %v370_v26  ;;  %v1272_v41 = vld [vmem:[%s2522_s0 + $0xaf] sm:$0x20]   ;;  %v405_v43 = vsel %vm21_vm4, %v1264_v25, %v401_v38  ;;  %v436_v49 = vsel %vm17_vm3, %v1271_v36, %v432_v44 }
  0x22   :  { %v378_v37 = vsel %vm29_vm6, %v1258_v14, %v374_v31  ;;  %v1266_v39 = vld [vmem:[%s2522_s0 + $0xee] sm:$0x80]   ;;  %v1273_v42 = vld [vmem:[%s2522_s0 + $0xce] sm:$0x40]   ;;  %v1275_v46 = vld [vmem:[%s2522_s0 + $0x13] sm:$0x1]   ;;  %v409_v48 = vsel %vm25_vm5, %v1265_v28, %v405_v43  ;;  %v440_v55 = vsel %vm21_vm4, %v1272_v41, %v436_v49 }
  0x23   :  { %379 = vrot.lane.b32.xlu1 %v378_v37, %s1474_s2  ;;  %v1274_v45 = vld [vmem:[%s2522_s0 + $0xed] sm:$0x80]   ;;  %v1276_v47 = vld [vmem:[%s2522_s0 + $0x32] sm:$0x2]   ;;  %v413_v54 = vsel %vm29_vm6, %v1266_v39, %v409_v48  ;;  %v444_v59 = vsel %vm25_vm5, %v1273_v42, %v440_v55  ;;  %v1283_v61 = vld [vmem:[%s2522_s0 + $0x12] sm:$0x1]  }
  0x24   :  { %v459_v50 = vsel %vm5_vm0, %v1276_v47, %v1275_v46  ;;  %v1277_v51 = vld [vmem:[%s2522_s0 + $0x51] sm:$0x4]   ;;  %414 = vrot.lane.b32.xlu0 %v413_v54, %s1475_s19  ;;  %v1284_v62 = vld [vmem:[%s2522_s0 + $0x31] sm:$0x2]   ;;  %v448_v0 = vsel %vm29_vm6, %v1274_v45, %v444_v59  ;;  %s1476_s3 = smov 80   ;;  %s1477_s20 = smov 76  }
  0x25   :  { %v1278_v52 = vld [vmem:[%s2522_s0 + $0x70] sm:$0x8]   ;;  %v463_v56 = vsel %vm9_vm1, %v1277_v51, %v459_v50  ;;  %v1285_v63 = vld [vmem:[%s2522_s0 + $0x50] sm:$0x4]   ;;  %v494_v3 = vsel %vm5_vm0, %v1284_v62, %v1283_v61  ;;  %v1291_v13 = vld [vmem:[%s2522_s0 + $0x11] sm:$0x1]  }
  0x26   :  { %v1279_v53 = vld [vmem:[%s2522_s0 + $0x8f] sm:$0x10]   ;;  %v467_v60 = vsel %vm13_vm2, %v1278_v52, %v463_v56  ;;  %v1286_v4 = vld [vmem:[%s2522_s0 + $0x6f] sm:$0x8]   ;;  %v498_v7 = vsel %vm9_vm1, %v1285_v63, %v494_v3  ;;  %v1292_v14 = vld [vmem:[%s2522_s0 + $0x30] sm:$0x2]  }
  0x27   :  { %v1280_v57 = vld [vmem:[%s2522_s0 + $0xae] sm:$0x20]   ;;  %v471_v1 = vsel %vm17_vm3, %v1279_v53, %v467_v60  ;;  %v1287_v5 = vld [vmem:[%s2522_s0 + $0x8e] sm:$0x10]   ;;  %449 = vrot.lane.b32.xlu1 %v448_v0, %s1476_s3  ;;  %v502_v12 = vsel %vm13_vm2, %v1286_v4, %v498_v7  ;;  %v1293_v15 = vld [vmem:[%s2522_s0 + $0x4f] sm:$0x4]   ;;  %v529_v18 = vsel %vm5_vm0, %v1292_v14, %v1291_v13 }
  0x28   :  { %v1281_v58 = vld [vmem:[%s2522_s0 + $0xcd] sm:$0x40]   ;;  %v475_v6 = vsel %vm21_vm4, %v1280_v57, %v471_v1  ;;  %v1288_v8 = vld [vmem:[%s2522_s0 + $0xad] sm:$0x20]   ;;  %v506_v17 = vsel %vm17_vm3, %v1287_v5, %v502_v12  ;;  %v1294_v19 = vld [vmem:[%s2522_s0 + $0x6e] sm:$0x8]   ;;  %v533_v22 = vsel %vm9_vm1, %v1293_v15, %v529_v18 }
  0x29   :  { %v1282_v2 = vld [vmem:[%s2522_s0 + $0xec] sm:$0x80]   ;;  %v1289_v9 = vld [vmem:[%s2522_s0 + $0xcc] sm:$0x40]   ;;  %v479_v11 = vsel %vm25_vm5, %v1281_v58, %v475_v6  ;;  %v1295_v20 = vld [vmem:[%s2522_s0 + $0x8d] sm:$0x10]   ;;  %v510_v21 = vsel %vm21_vm4, %v1288_v8, %v506_v17  ;;  %v537_v27 = vsel %vm13_vm2, %v1294_v19, %v533_v22 }
  0x2a   :  { %v1290_v10 = vld [vmem:[%s2522_s0 + $0xeb] sm:$0x80]   ;;  %v483_v16 = vsel %vm29_vm6, %v1282_v2, %v479_v11  ;;  %v1296_v23 = vld [vmem:[%s2522_s0 + $0xac] sm:$0x20]   ;;  %v1299_v25 = vld [vmem:[%s2522_s0 + $0x10] sm:$0x1]   ;;  %v514_v26 = vsel %vm25_vm5, %v1289_v9, %v510_v21  ;;  %v541_v32 = vsel %vm17_vm3, %v1295_v20, %v537_v27 }
  0x2b   :  { %484 = vrot.lane.b32.xlu0 %v483_v16, %s1477_s20  ;;  %v1297_v24 = vld [vmem:[%s2522_s0 + $0xcb] sm:$0x40]   ;;  %v1300_v28 = vld [vmem:[%s2522_s0 + $0x2f] sm:$0x2]   ;;  %v518_v31 = vsel %vm29_vm6, %v1290_v10, %v514_v26  ;;  %s1478_s10 = smov 72   ;;  %v545_v37 = vsel %vm21_vm4, %v1296_v23, %v541_v32  ;;  %s1479_s27 = smov 68  }
  0x2c   :  { %v1301_v29 = vld [vmem:[%s2522_s0 + $0x4e] sm:$0x4]   ;;  %v1298_v33 = vld [vmem:[%s2522_s0 + $0xea] sm:$0x80]   ;;  %v564_v34 = vsel %vm5_vm0, %v1300_v28, %v1299_v25  ;;  %519 = vrot.lane.b32.xlu1 %v518_v31, %s1478_s10  ;;  %v1307_v41 = vld [vmem:[%s2522_s0 + $0xf] sm:$0x1]   ;;  %v549_v42 = vsel %vm25_vm5, %v1297_v24, %v545_v37 }
  0x2d   :  { %v1302_v30 = vld [vmem:[%s2522_s0 + $0x6d] sm:$0x8]   ;;  %v568_v38 = vsel %vm9_vm1, %v1301_v29, %v564_v34  ;;  %v1308_v44 = vld [vmem:[%s2522_s0 + $0x2e] sm:$0x2]   ;;  %v553_v47 = vsel %vm29_vm6, %v1298_v33, %v549_v42  ;;  %v1315_v55 = vld [vmem:[%s2522_s0 + $0xe] sm:$0x1]  }
  0x2e   :  { %v1303_v35 = vld [vmem:[%s2522_s0 + $0x8c] sm:$0x10]   ;;  %v572_v43 = vsel %vm13_vm2, %v1302_v30, %v568_v38  ;;  %v1309_v45 = vld [vmem:[%s2522_s0 + $0x4d] sm:$0x4]   ;;  %v599_v49 = vsel %vm5_vm0, %v1308_v44, %v1307_v41  ;;  %v1316_v56 = vld [vmem:[%s2522_s0 + $0x2d] sm:$0x2]  }
  0x2f   :  { %v1304_v36 = vld [vmem:[%s2522_s0 + $0xab] sm:$0x20]   ;;  %v1310_v46 = vld [vmem:[%s2522_s0 + $0x6c] sm:$0x8]   ;;  %v576_v48 = vsel %vm17_vm3, %v1303_v35, %v572_v43  ;;  %554 = vrot.lane.b32.xlu0 %v553_v47, %s1479_s27  ;;  %v603_v53 = vsel %vm9_vm1, %v1309_v45, %v599_v49  ;;  %v634_v59 = vsel %vm5_vm0, %v1316_v56, %v1315_v55  ;;  %v1317_v60 = vld [vmem:[%s2522_s0 + $0x4c] sm:$0x4]  }
  0x30   :  { %v1305_v39 = vld [vmem:[%s2522_s0 + $0xca] sm:$0x40]   ;;  %v1311_v50 = vld [vmem:[%s2522_s0 + $0x8b] sm:$0x10]   ;;  %v580_v52 = vsel %vm21_vm4, %v1304_v36, %v576_v48  ;;  %v607_v58 = vsel %vm13_vm2, %v1310_v46, %v603_v53  ;;  %v1318_v61 = vld [vmem:[%s2522_s0 + $0x6b] sm:$0x8]   ;;  %v638_v2 = vsel %vm9_vm1, %v1317_v60, %v634_v59 }
  0x31   :  { %v1306_v40 = vld [vmem:[%s2522_s0 + $0xe9] sm:$0x80]   ;;  %v1312_v51 = vld [vmem:[%s2522_s0 + $0xaa] sm:$0x20]   ;;  %v584_v57 = vsel %vm25_vm5, %v1305_v39, %v580_v52  ;;  %v1319_v62 = vld [vmem:[%s2522_s0 + $0x8a] sm:$0x10]   ;;  %v611_v0 = vsel %vm17_vm3, %v1311_v50, %v607_v58  ;;  %v642_v6 = vsel %vm13_vm2, %v1318_v61, %v638_v2 }
  0x32   :  { %v1313_v54 = vld [vmem:[%s2522_s0 + $0xc9] sm:$0x40]   ;;  %v588_v63 = vsel %vm29_vm6, %v1306_v40, %v584_v57  ;;  %v1320_v3 = vld [vmem:[%s2522_s0 + $0xa9] sm:$0x20]   ;;  %s1480_s17 = smov 64   ;;  %v615_v5 = vsel %vm21_vm4, %v1312_v51, %v611_v0  ;;  %v646_v11 = vsel %vm17_vm3, %v1319_v62, %v642_v6  ;;  %s1481_s5 = smov 60  }
  0x33   :  { %v1314_v1 = vld [vmem:[%s2522_s0 + $0xe8] sm:$0x80]   ;;  %v1321_v4 = vld [vmem:[%s2522_s0 + $0xc8] sm:$0x40]   ;;  %589 = vrot.lane.b32.xlu1 %v588_v63, %s1480_s17  ;;  %v1323_v8 = vld [vmem:[%s2522_s0 + $0xd] sm:$0x1]   ;;  %v619_v10 = vsel %vm25_vm5, %v1313_v54, %v615_v5  ;;  %v650_v17 = vsel %vm21_vm4, %v1320_v3, %v646_v11 }
  0x34   :  { %v1322_v7 = vld [vmem:[%s2522_s0 + $0xe7] sm:$0x80]   ;;  %v1324_v9 = vld [vmem:[%s2522_s0 + $0x2c] sm:$0x2]   ;;  %v623_v16 = vsel %vm29_vm6, %v1314_v1, %v619_v10  ;;  %v654_v21 = vsel %vm25_vm5, %v1321_v4, %v650_v17  ;;  %v1331_v23 = vld [vmem:[%s2522_s0 + $0xc] sm:$0x1]  }
  0x35   :  { %v669_v12 = vsel %vm5_vm0, %v1324_v9, %v1323_v8  ;;  %v1325_v13 = vld [vmem:[%s2522_s0 + $0x4b] sm:$0x4]   ;;  %624 = vrot.lane.b32.xlu0 %v623_v16, %s1481_s5  ;;  %v1332_v24 = vld [vmem:[%s2522_s0 + $0x2b] sm:$0x2]   ;;  %v658_v26 = vsel %vm29_vm6, %v1322_v7, %v654_v21  ;;  %s1482_s18 = smov 56   ;;  %s1483_s6 = smov 52  }
  0x36   :  { %v1326_v14 = vld [vmem:[%s2522_s0 + $0x6a] sm:$0x8]   ;;  %v673_v18 = vsel %vm9_vm1, %v1325_v13, %v669_v12  ;;  %v1333_v25 = vld [vmem:[%s2522_s0 + $0x4a] sm:$0x4]   ;;  %v704_v29 = vsel %vm5_vm0, %v1332_v24, %v1331_v23  ;;  %v1339_v39 = vld [vmem:[%s2522_s0 + $0xb] sm:$0x1]  }
  0x37   :  { %v1327_v15 = vld [vmem:[%s2522_s0 + $0x89] sm:$0x10]   ;;  %v677_v22 = vsel %vm13_vm2, %v1326_v14, %v673_v18  ;;  %v1334_v30 = vld [vmem:[%s2522_s0 + $0x69] sm:$0x8]   ;;  %659 = vrot.lane.b32.xlu1 %v658_v26, %s1482_s18  ;;  %v708_v33 = vsel %vm9_vm1, %v1333_v25, %v704_v29  ;;  %v1340_v40 = vld [vmem:[%s2522_s0 + $0x2a] sm:$0x2]  }
  0x38   :  { %v1328_v19 = vld [vmem:[%s2522_s0 + $0xa8] sm:$0x20]   ;;  %v681_v27 = vsel %vm17_vm3, %v1327_v15, %v677_v22  ;;  %v1335_v31 = vld [vmem:[%s2522_s0 + $0x88] sm:$0x10]   ;;  %v712_v38 = vsel %vm13_vm2, %v1334_v30, %v708_v33  ;;  %v1341_v41 = vld [vmem:[%s2522_s0 + $0x49] sm:$0x4]   ;;  %v739_v44 = vsel %vm5_vm0, %v1340_v40, %v1339_v39 }
  0x39   :  { %v1329_v20 = vld [vmem:[%s2522_s0 + $0xc7] sm:$0x40]   ;;  %v685_v32 = vsel %vm21_vm4, %v1328_v19, %v681_v27  ;;  %v1336_v34 = vld [vmem:[%s2522_s0 + $0xa7] sm:$0x20]   ;;  %v716_v43 = vsel %vm17_vm3, %v1335_v31, %v712_v38  ;;  %v1342_v45 = vld [vmem:[%s2522_s0 + $0x68] sm:$0x8]   ;;  %v743_v48 = vsel %vm9_vm1, %v1341_v41, %v739_v44 }
  0x3a   :  { %v1330_v28 = vld [vmem:[%s2522_s0 + $0xe6] sm:$0x80]   ;;  %v1337_v35 = vld [vmem:[%s2522_s0 + $0xc6] sm:$0x40]   ;;  %v689_v37 = vsel %vm25_vm5, %v1329_v20, %v685_v32  ;;  %v1343_v46 = vld [vmem:[%s2522_s0 + $0x87] sm:$0x10]   ;;  %v720_v47 = vsel %vm21_vm4, %v1336_v34, %v716_v43  ;;  %v747_v53 = vsel %vm13_vm2, %v1342_v45, %v743_v48 }
  0x3b   :  { %v1338_v36 = vld [vmem:[%s2522_s0 + $0xe5] sm:$0x80]   ;;  %v693_v42 = vsel %vm29_vm6, %v1330_v28, %v689_v37  ;;  %v1344_v49 = vld [vmem:[%s2522_s0 + $0xa6] sm:$0x20]   ;;  %v1347_v51 = vld [vmem:[%s2522_s0 + $0xa] sm:$0x1]   ;;  %v724_v52 = vsel %vm25_vm5, %v1337_v35, %v720_v47  ;;  %v751_v58 = vsel %vm17_vm3, %v1343_v46, %v747_v53 }
  0x3c   :  { %694 = vrot.lane.b32.xlu0 %v693_v42, %s1483_s6  ;;  %v1345_v50 = vld [vmem:[%s2522_s0 + $0xc5] sm:$0x40]   ;;  %v1348_v54 = vld [vmem:[%s2522_s0 + $0x29] sm:$0x2]   ;;  %v728_v57 = vsel %vm29_vm6, %v1338_v36, %v724_v52  ;;  %s1484_s25 = smov 48   ;;  %v755_v63 = vsel %vm21_vm4, %v1344_v49, %v751_v58  ;;  %s1485_s13 = smov 44  }
  0x3d   :  { %v1349_v55 = vld [vmem:[%s2522_s0 + $0x48] sm:$0x4]   ;;  %v1346_v59 = vld [vmem:[%s2522_s0 + $0xe4] sm:$0x80]   ;;  %v774_v60 = vsel %vm5_vm0, %v1348_v54, %v1347_v51  ;;  %729 = vrot.lane.b32.xlu1 %v728_v57, %s1484_s25  ;;  %v1355_v3 = vld [vmem:[%s2522_s0 + $0x9] sm:$0x1]   ;;  %v759_v4 = vsel %vm25_vm5, %v1345_v50, %v755_v63 }
  0x3e   :  { %v1350_v56 = vld [vmem:[%s2522_s0 + $0x67] sm:$0x8]   ;;  %v778_v0 = vsel %vm9_vm1, %v1349_v55, %v774_v60  ;;  %v1356_v6 = vld [vmem:[%s2522_s0 + $0x28] sm:$0x2]   ;;  %v763_v9 = vsel %vm29_vm6, %v1346_v59, %v759_v4  ;;  %v1363_v17 = vld [vmem:[%s2522_s0 + $0x8] sm:$0x1]  }
  0x3f   :  { %v1351_v61 = vld [vmem:[%s2522_s0 + $0x86] sm:$0x10]   ;;  %v782_v5 = vsel %vm13_vm2, %v1350_v56, %v778_v0  ;;  %v1357_v7 = vld [vmem:[%s2522_s0 + $0x47] sm:$0x4]   ;;  %v809_v11 = vsel %vm5_vm0, %v1356_v6, %v1355_v3  ;;  %v1364_v18 = vld [vmem:[%s2522_s0 + $0x27] sm:$0x2]  }
  0x40   :  { %v1352_v62 = vld [vmem:[%s2522_s0 + $0xa5] sm:$0x20]   ;;  %v1358_v8 = vld [vmem:[%s2522_s0 + $0x66] sm:$0x8]   ;;  %v786_v10 = vsel %vm17_vm3, %v1351_v61, %v782_v5  ;;  %764 = vrot.lane.b32.xlu0 %v763_v9, %s1485_s13  ;;  %v813_v15 = vsel %vm9_vm1, %v1357_v7, %v809_v11  ;;  %v844_v21 = vsel %vm5_vm0, %v1364_v18, %v1363_v17  ;;  %v1365_v22 = vld [vmem:[%s2522_s0 + $0x46] sm:$0x4]  }
  0x41   :  { %v1353_v1 = vld [vmem:[%s2522_s0 + $0xc4] sm:$0x40]   ;;  %v1359_v12 = vld [vmem:[%s2522_s0 + $0x85] sm:$0x10]   ;;  %v790_v14 = vsel %vm21_vm4, %v1352_v62, %v786_v10  ;;  %v817_v20 = vsel %vm13_vm2, %v1358_v8, %v813_v15  ;;  %v1366_v23 = vld [vmem:[%s2522_s0 + $0x65] sm:$0x8]   ;;  %v848_v28 = vsel %vm9_vm1, %v1365_v22, %v844_v21 }
  0x42   :  { %v1354_v2 = vld [vmem:[%s2522_s0 + $0xe3] sm:$0x80]   ;;  %v1360_v13 = vld [vmem:[%s2522_s0 + $0xa4] sm:$0x20]   ;;  %v794_v19 = vsel %vm25_vm5, %v1353_v1, %v790_v14  ;;  %v1367_v24 = vld [vmem:[%s2522_s0 + $0x84] sm:$0x10]   ;;  %v821_v26 = vsel %vm17_vm3, %v1359_v12, %v817_v20  ;;  %v852_v32 = vsel %vm13_vm2, %v1366_v23, %v848_v28 }
  0x43   :  { %v1361_v16 = vld [vmem:[%s2522_s0 + $0xc3] sm:$0x40]   ;;  %v798_v25 = vsel %vm29_vm6, %v1354_v2, %v794_v19  ;;  %v1368_v29 = vld [vmem:[%s2522_s0 + $0xa3] sm:$0x20]   ;;  %s1486_s3 = smov 40   ;;  %v825_v31 = vsel %vm21_vm4, %v1360_v13, %v821_v26  ;;  %v856_v37 = vsel %vm17_vm3, %v1367_v24, %v852_v32  ;;  %s1487_s20 = smov 36  }
  0x44   :  { %v1362_v27 = vld [vmem:[%s2522_s0 + $0xe2] sm:$0x80]   ;;  %v1369_v30 = vld [vmem:[%s2522_s0 + $0xc2] sm:$0x40]   ;;  %799 = vrot.lane.b32.xlu1 %v798_v25, %s1486_s3  ;;  %v1371_v34 = vld [vmem:[%s2522_s0 + $0x7] sm:$0x1]   ;;  %v829_v36 = vsel %vm25_vm5, %v1361_v16, %v825_v31  ;;  %v860_v43 = vsel %vm21_vm4, %v1368_v29, %v856_v37 }
  0x45   :  { %v1370_v33 = vld [vmem:[%s2522_s0 + $0xe1] sm:$0x80]   ;;  %v1372_v35 = vld [vmem:[%s2522_s0 + $0x26] sm:$0x2]   ;;  %v833_v42 = vsel %vm29_vm6, %v1362_v27, %v829_v36  ;;  %v864_v47 = vsel %vm25_vm5, %v1369_v30, %v860_v43  ;;  %v1379_v49 = vld [vmem:[%s2522_s0 + $0x6] sm:$0x1]  }
  0x46   :  { %v879_v38 = vsel %vm5_vm0, %v1372_v35, %v1371_v34  ;;  %v1373_v39 = vld [vmem:[%s2522_s0 + $0x45] sm:$0x4]   ;;  %834 = vrot.lane.b32.xlu0 %v833_v42, %s1487_s20  ;;  %v1380_v50 = vld [vmem:[%s2522_s0 + $0x25] sm:$0x2]   ;;  %v868_v52 = vsel %vm29_vm6, %v1370_v33, %v864_v47  ;;  %s1488_s4 = smov 32   ;;  %s1489_s21 = smov 28  }
  0x47   :  { %v1374_v40 = vld [vmem:[%s2522_s0 + $0x64] sm:$0x8]   ;;  %v883_v44 = vsel %vm9_vm1, %v1373_v39, %v879_v38  ;;  %v1381_v51 = vld [vmem:[%s2522_s0 + $0x44] sm:$0x4]   ;;  %v914_v55 = vsel %vm5_vm0, %v1380_v50, %v1379_v49  ;;  %v1387_v1 = vld [vmem:[%s2522_s0 + $0x5] sm:$0x1]  }
  0x48   :  { %v1375_v41 = vld [vmem:[%s2522_s0 + $0x83] sm:$0x10]   ;;  %v887_v48 = vsel %vm13_vm2, %v1374_v40, %v883_v44  ;;  %v1382_v56 = vld [vmem:[%s2522_s0 + $0x63] sm:$0x8]   ;;  %869 = vrot.lane.b32.xlu1 %v868_v52, %s1488_s4  ;;  %v918_v59 = vsel %vm9_vm1, %v1381_v51, %v914_v55  ;;  %v1388_v2 = vld [vmem:[%s2522_s0 + $0x24] sm:$0x2]  }
  0x49   :  { %v1376_v45 = vld [vmem:[%s2522_s0 + $0xa2] sm:$0x20]   ;;  %v891_v53 = vsel %vm17_vm3, %v1375_v41, %v887_v48  ;;  %v1383_v57 = vld [vmem:[%s2522_s0 + $0x82] sm:$0x10]   ;;  %v922_v0 = vsel %vm13_vm2, %v1382_v56, %v918_v59  ;;  %v1389_v3 = vld [vmem:[%s2522_s0 + $0x43] sm:$0x4]   ;;  %v949_v6 = vsel %vm5_vm0, %v1388_v2, %v1387_v1 }
  0x4a   :  { %v1377_v46 = vld [vmem:[%s2522_s0 + $0xc1] sm:$0x40]   ;;  %v895_v58 = vsel %vm21_vm4, %v1376_v45, %v891_v53  ;;  %v1384_v60 = vld [vmem:[%s2522_s0 + $0xa1] sm:$0x20]   ;;  %v926_v5 = vsel %vm17_vm3, %v1383_v57, %v922_v0  ;;  %v1390_v7 = vld [vmem:[%s2522_s0 + $0x62] sm:$0x8]   ;;  %v953_v10 = vsel %vm9_vm1, %v1389_v3, %v949_v6 }
  0x4b   :  { %v1378_v54 = vld [vmem:[%s2522_s0 + $0xe0] sm:$0x80]   ;;  %v1385_v61 = vld [vmem:[%s2522_s0 + $0xc0] sm:$0x40]   ;;  %v899_v63 = vsel %vm25_vm5, %v1377_v46, %v895_v58  ;;  %v1391_v8 = vld [vmem:[%s2522_s0 + $0x81] sm:$0x10]   ;;  %v930_v9 = vsel %vm21_vm4, %v1384_v60, %v926_v5  ;;  %v957_v15 = vsel %vm13_vm2, %v1390_v7, %v953_v10 }
  0x4c   :  { %v1386_v62 = vld [vmem:[%s2522_s0 + $0xdf] sm:$0x80]   ;;  %v903_v4 = vsel %vm29_vm6, %v1378_v54, %v899_v63  ;;  %v1392_v11 = vld [vmem:[%s2522_s0 + $0xa0] sm:$0x20]   ;;  %v1395_v13 = vld [vmem:[%s2522_s0 + $0x4] sm:$0x1]   ;;  %v934_v14 = vsel %vm25_vm5, %v1385_v61, %v930_v9  ;;  %v961_v20 = vsel %vm17_vm3, %v1391_v8, %v957_v15 }
  0x4d   :  { %904 = vrot.lane.b32.xlu0 %v903_v4, %s1489_s21  ;;  %v1393_v12 = vld [vmem:[%s2522_s0 + $0xbf] sm:$0x40]   ;;  %v1396_v16 = vld [vmem:[%s2522_s0 + $0x23] sm:$0x2]   ;;  %v938_v19 = vsel %vm29_vm6, %v1386_v62, %v934_v14  ;;  %s1490_s11 = smov 24   ;;  %v965_v25 = vsel %vm21_vm4, %v1392_v11, %v961_v20  ;;  %s1491_s28 = smov 20  }
  0x4e   :  { %v1397_v17 = vld [vmem:[%s2522_s0 + $0x42] sm:$0x4]   ;;  %v1394_v21 = vld [vmem:[%s2522_s0 + $0xde] sm:$0x80]   ;;  %v984_v22 = vsel %vm5_vm0, %v1396_v16, %v1395_v13  ;;  %939 = vrot.lane.b32.xlu1 %v938_v19, %s1490_s11  ;;  %v1403_v29 = vld [vmem:[%s2522_s0 + $0x3] sm:$0x1]   ;;  %v969_v30 = vsel %vm25_vm5, %v1393_v12, %v965_v25 }
  0x4f   :  { %v1398_v18 = vld [vmem:[%s2522_s0 + $0x61] sm:$0x8]   ;;  %v988_v26 = vsel %vm9_vm1, %v1397_v17, %v984_v22  ;;  %v1404_v32 = vld [vmem:[%s2522_s0 + $0x22] sm:$0x2]   ;;  %v973_v35 = vsel %vm29_vm6, %v1394_v21, %v969_v30  ;;  %v1411_v43 = vld [vmem:[%s2522_s0 + $0x2] sm:$0x1]  }
  0x50   :  { %v1399_v23 = vld [vmem:[%s2522_s0 + $0x80] sm:$0x10]   ;;  %v992_v31 = vsel %vm13_vm2, %v1398_v18, %v988_v26  ;;  %v1405_v33 = vld [vmem:[%s2522_s0 + $0x41] sm:$0x4]   ;;  %v1019_v37 = vsel %vm5_vm0, %v1404_v32, %v1403_v29  ;;  %v1412_v44 = vld [vmem:[%s2522_s0 + $0x21] sm:$0x2]  }
  0x51   :  { %v1400_v24 = vld [vmem:[%s2522_s0 + $0x9f] sm:$0x20]   ;;  %v1406_v34 = vld [vmem:[%s2522_s0 + $0x60] sm:$0x8]   ;;  %v996_v36 = vsel %vm17_vm3, %v1399_v23, %v992_v31  ;;  %974 = vrot.lane.b32.xlu0 %v973_v35, %s1491_s28  ;;  %v1023_v41 = vsel %vm9_vm1, %v1405_v33, %v1019_v37  ;;  %v1054_v47 = vsel %vm5_vm0, %v1412_v44, %v1411_v43  ;;  %v1413_v48 = vld [vmem:[%s2522_s0 + $0x40] sm:$0x4]  }
  0x52   :  { %v1401_v27 = vld [vmem:[%s2522_s0 + $0xbe] sm:$0x40]   ;;  %v1407_v38 = vld [vmem:[%s2522_s0 + $0x7f] sm:$0x10]   ;;  %v1000_v40 = vsel %vm21_vm4, %v1400_v24, %v996_v36  ;;  %v1027_v46 = vsel %vm13_vm2, %v1406_v34, %v1023_v41  ;;  %v1414_v49 = vld [vmem:[%s2522_s0 + $0x5f] sm:$0x8]   ;;  %v1058_v54 = vsel %vm9_vm1, %v1413_v48, %v1054_v47 }
  0x53   :  { %v1402_v28 = vld [vmem:[%s2522_s0 + $0xdd] sm:$0x80]   ;;  %v1408_v39 = vld [vmem:[%s2522_s0 + $0x9e] sm:$0x20]   ;;  %v1004_v45 = vsel %vm25_vm5, %v1401_v27, %v1000_v40  ;;  %v1415_v50 = vld [vmem:[%s2522_s0 + $0x7e] sm:$0x10]   ;;  %v1031_v52 = vsel %vm17_vm3, %v1407_v38, %v1027_v46  ;;  %v1062_v58 = vsel %vm13_vm2, %v1414_v49, %v1058_v54 }
  0x54   :  { %v1409_v42 = vld [vmem:[%s2522_s0 + $0xbd] sm:$0x40]   ;;  %v1008_v51 = vsel %vm29_vm6, %v1402_v28, %v1004_v45  ;;  %v1416_v55 = vld [vmem:[%s2522_s0 + $0x9d] sm:$0x20]   ;;  %s1492_s18 = smov 16   ;;  %v1035_v57 = vsel %vm21_vm4, %v1408_v39, %v1031_v52  ;;  %v1066_v63 = vsel %vm17_vm3, %v1415_v50, %v1062_v58  ;;  %s1493_s4 = smov 12  }
  0x55   :  { %v1410_v53 = vld [vmem:[%s2522_s0 + $0xdc] sm:$0x80]   ;;  %v1417_v56 = vld [vmem:[%s2522_s0 + $0xbc] sm:$0x40]   ;;  %1009 = vrot.lane.b32.xlu1 %v1008_v51, %s1492_s18  ;;  %v1419_v60 = vld [vmem:[%s2522_s0 + $0x1] sm:$0x1]   ;;  %v1039_v62 = vsel %vm25_vm5, %v1409_v42, %v1035_v57  ;;  %v1070_v5 = vsel %vm21_vm4, %v1416_v55, %v1066_v63 }
  0x56   :  { %v1418_v59 = vld [vmem:[%s2522_s0 + $0xdb] sm:$0x80]   ;;  %v1420_v61 = vld [vmem:[%s2522_s0 + $0x20] sm:$0x2]   ;;  %v1043_v4 = vsel %vm29_vm6, %v1410_v53, %v1039_v62  ;;  %v1074_v8 = vsel %vm25_vm5, %v1417_v56, %v1070_v5  ;;  %v1173_v14 = vld [vmem:[%s2522_s0 + $0x3e] sm:$0x4]  }
  0x57   :  { %v1089_v0 = vsel %vm5_vm0, %v1420_v61, %v1419_v60  ;;  %v1421_v1 = vld [vmem:[%s2522_s0 + $0x3f] sm:$0x4]   ;;  %1044 = vrot.lane.b32.xlu0 %v1043_v4, %s1493_s4  ;;  %v1078_v11 = vsel %vm29_vm6, %v1418_v59, %v1074_v8  ;;  %s1494_s11 = smov 8   ;;  %v1174_v16 = vld [vmem:[%s2522_s0 + $0x5d] sm:$0x8]   ;;  %s1495_s22 = smov 4  }
  0x58   :  { %v1422_v2 = vld [vmem:[%s2522_s0 + $0x5e] sm:$0x8]   ;;  %v1093_v6 = vsel %vm9_vm1, %v1421_v1, %v1089_v0  ;;  %v2_v17 = vld [vmem:[%s2522_s0] sm:$0x1]   ;;  %vm31_vm7 = vcmask 31744   ;;  %vm66_vm8 = vcmask 1048544  }
  0x59   :  { %v1423_v3 = vld [vmem:[%s2522_s0 + $0x7d] sm:$0x10]   ;;  %v1097_v9 = vsel %vm13_vm2, %v1422_v2, %v1093_v6  ;;  %1079 = vrot.lane.b32.xlu1 %v1078_v11, %s1494_s11  ;;  %v1172_v18 = vld [vmem:[%s2522_s0 + $0x1f] sm:$0x2]   ;;  %vm101_vm9 = vcmask 1015744   ;;  %vm136_vm10 = vcmask 982944  }
  0x5a   :  { %v1424_v7 = vld [vmem:[%s2522_s0 + $0x9c] sm:$0x20]   ;;  %v1101_v12 = vsel %vm17_vm3, %v1423_v3, %v1097_v9  ;;  %v1175_v20 = vld [vmem:[%s2522_s0 + $0x7c] sm:$0x10]   ;;  %v6_v21 = vsel %vm5_vm0, %v1172_v18, %v2_v17  ;;  %vm171_vm11 = vcmask 950144   ;;  %vm206_vm12 = vcmask 917344  }
  0x5b   :  { %v1425_v10 = vld [vmem:[%s2522_s0 + $0xbb] sm:$0x40]   ;;  %v1105_v15 = vsel %vm21_vm4, %v1424_v7, %v1101_v12  ;;  %v1176_v23 = vld [vmem:[%s2522_s0 + $0x9b] sm:$0x20]   ;;  %v10_v24 = vsel %vm9_vm1, %v1173_v14, %v6_v21  ;;  %vm241_vm13 = vcmask 884544   ;;  %vm276_vm14 = vcmask 851744  }
  0x5c   :  { %v1426_v13 = vld [vmem:[%s2522_s0 + $0xda] sm:$0x80]   ;;  %v1109_v19 = vsel %vm25_vm5, %v1425_v10, %v1105_v15  ;;  %v1177_v25 = vld [vmem:[%s2522_s0 + $0xba] sm:$0x40]   ;;  %v14_v26 = vsel %vm13_vm2, %v1174_v16, %v10_v24  ;;  %vm311_vm15 = vcmask 818944   ;;  %vm346_vm0 = vcmask 786144  }
  0x5d   :  { %v1113_v22 = vsel %vm29_vm6, %v1426_v13, %v1109_v19  ;;  %v1178_v27 = vld [vmem:[%s2522_s0 + $0xd9] sm:$0x80]   ;;  %v18_v28 = vsel %vm17_vm3, %v1175_v20, %v14_v26  ;;  %vm381_vm1 = vcmask 753344   ;;  %vm416_vm2 = vcmask 720544  }
  0x5e   :  { %1114 = vrot.lane.b32.xlu0 %v1113_v22, %s1495_s22  ;;  %v22_v29 = vsel %vm21_vm4, %v1176_v23, %v18_v28  ;;  %vm451_vm3 = vcmask 687744   ;;  %vm486_vm4 = vcmask 654944  }
  0x5f   :  { %v26_v30 = vsel %vm25_vm5, %v1177_v25, %v22_v29  ;;  %vm521_vm5 = vcmask 622144  }
  0x60   :  { %v30_v31 = vsel %vm29_vm6, %v1178_v27, %v26_v30  ;;  %vm556_vm6 = vcmask 589344  }
  0x61   :  { %32 = vst.msk [vmem:[#allocation0] ss:$8 sm:$0xf] %vm31_vm7, %v30_v31   ;;  %33 = vst.msk [vmem:[#allocation0] ss:$8 sm:$0xf0] %vm31_vm7, %v30_v31  }
  0x62   :  { %vm591_vm7 = vcmask 556544  }
  0x7c   :  { %v65_v32 = vpop.permute.xlu0 %64  }
  0x7d   :  { %67 = vst.msk [vmem:[#allocation0] ss:$8 sm:$0xf] %vm66_vm8, %v65_v32   ;;  %68 = vst.msk [vmem:[#allocation0] ss:$8 sm:$0xf0] %vm66_vm8, %v65_v32   ;;  %v135_v33 = vpop.permute.xlu1 %134  }
  0x7e   :  { %vm626_vm8 = vcmask 523744  }
  0x80   :  { %v100_v34 = vpop.permute.xlu0 %99  }
  0x81   :  { %102 = vst.msk [vmem:[#allocation0] ss:$8 sm:$0xf] %vm101_vm9, %v100_v34   ;;  %103 = vst.msk [vmem:[#allocation0] ss:$8 sm:$0xf0] %vm101_vm9, %v100_v34  }
  0x82   :  { %137 = vst.msk [vmem:[#allocation0] ss:$8 sm:$0xf] %vm136_vm10, %v135_v33   ;;  %138 = vst.msk [vmem:[#allocation0] ss:$8 sm:$0xf0] %vm136_vm10, %v135_v33  }
  0x83   :  { %vm661_vm9 = vcmask 490944   ;;  %vm696_vm10 = vcmask 458144  }
  0x84   :  { %v170_v35 = vpop.permute.xlu1 %169  }
  0x85   :  { %172 = vst.msk [vmem:[#allocation0] ss:$8 sm:$0xf] %vm171_vm11, %v170_v35   ;;  %173 = vst.msk [vmem:[#allocation0] ss:$8 sm:$0xf0] %vm171_vm11, %v170_v35   ;;  %v205_v36 = vpop.permute.xlu0 %204  }
  0x86   :  { %207 = vst.msk [vmem:[#allocation0] ss:$8 sm:$0xf] %vm206_vm12, %v205_v36   ;;  %208 = vst.msk [vmem:[#allocation0] ss:$8 sm:$0xf0] %vm206_vm12, %v205_v36  }
  0x87   :  { %vm731_vm11 = vcmask 425344   ;;  %vm766_vm12 = vcmask 392544  }
  0x88   :  { %v240_v37 = vpop.permute.xlu1 %239  }
  0x89   :  { %242 = vst.msk [vmem:[#allocation0] ss:$8 sm:$0xf] %vm241_vm13, %v240_v37   ;;  %243 = vst.msk [vmem:[#allocation0] ss:$8 sm:$0xf0] %vm241_vm13, %v240_v37  }
  0x8a   :  { %vm801_vm13 = vcmask 359744  }
  0x8d   :  { %v275_v38 = vpop.permute.xlu0 %274   ;;  %v310_v39 = vpop.permute.xlu1 %309  }
  0x8e   :  { %277 = vst.msk [vmem:[#allocation0] ss:$8 sm:$0xf] %vm276_vm14, %v275_v38   ;;  %278 = vst.msk [vmem:[#allocation0] ss:$8 sm:$0xf0] %vm276_vm14, %v275_v38  }
  0x8f   :  { %312 = vst.msk [vmem:[#allocation0] ss:$8 sm:$0xf] %vm311_vm15, %v310_v39   ;;  %313 = vst.msk [vmem:[#allocation0] ss:$8 sm:$0xf0] %vm311_vm15, %v310_v39  }
  0x90   :  { %vm836_vm14 = vcmask 326944   ;;  %vm871_vm15 = vcmask 294144  }
  0x91   :  { %v345_v40 = vpop.permute.xlu0 %344  }
  0x92   :  { %347 = vst.msk [vmem:[#allocation0] ss:$8 sm:$0xf] %vm346_vm0, %v345_v40   ;;  %348 = vst.msk [vmem:[#allocation0] ss:$8 sm:$0xf0] %vm346_vm0, %v345_v40  }
  0x93   :  { %vm906_vm0 = vcmask 261344  }
  0x95   :  { %v380_v41 = vpop.permute.xlu1 %379  }
  0x96   :  { %382 = vst.msk [vmem:[#allocation0] ss:$8 sm:$0xf] %vm381_vm1, %v380_v41   ;;  %383 = vst.msk [vmem:[#allocation0] ss:$8 sm:$0xf0] %vm381_vm1, %v380_v41   ;;  %v415_v42 = vpop.permute.xlu0 %414  }
  0x97   :  { %417 = vst.msk [vmem:[#allocation0] ss:$8 sm:$0xf] %vm416_vm2, %v415_v42   ;;  %418 = vst.msk [vmem:[#allocation0] ss:$8 sm:$0xf0] %vm416_vm2, %v415_v42  }
  0x98   :  { %vm941_vm1 = vcmask 228544   ;;  %vm976_vm2 = vcmask 195744  }
  0x99   :  { %v450_v43 = vpop.permute.xlu1 %449  }
  0x9a   :  { %452 = vst.msk [vmem:[#allocation0] ss:$8 sm:$0xf] %vm451_vm3, %v450_v43   ;;  %453 = vst.msk [vmem:[#allocation0] ss:$8 sm:$0xf0] %vm451_vm3, %v450_v43  }
  0x9b   :  { %vm1011_vm3 = vcmask 162944  }
  0x9d   :  { %v485_v44 = vpop.permute.xlu0 %484  }
  0x9e   :  { %487 = vst.msk [vmem:[#allocation0] ss:$8 sm:$0xf] %vm486_vm4, %v485_v44   ;;  %488 = vst.msk [vmem:[#allocation0] ss:$8 sm:$0xf0] %vm486_vm4, %v485_v44   ;;  %v520_v45 = vpop.permute.xlu1 %519  }
  0x9f   :  { %522 = vst.msk [vmem:[#allocation0] ss:$8 sm:$0xf] %vm521_vm5, %v520_v45   ;;  %523 = vst.msk [vmem:[#allocation0] ss:$8 sm:$0xf0] %vm521_vm5, %v520_v45  }
  0xa0   :  { %vm1046_vm4 = vcmask 130144   ;;  %vm1081_vm5 = vcmask 97344  }
  0xa1   :  { %v555_v46 = vpop.permute.xlu0 %554  }
  0xa2   :  { %557 = vst.msk [vmem:[#allocation0] ss:$8 sm:$0xf] %vm556_vm6, %v555_v46   ;;  %558 = vst.msk [vmem:[#allocation0] ss:$8 sm:$0xf0] %vm556_vm6, %v555_v46  }
  0xa3   :  { %vm1116_vm6 = vcmask 64544  }
  0xa5   :  { %v590_v47 = vpop.permute.xlu1 %589  }
  0xa6   :  { %592 = vst.msk [vmem:[#allocation0] ss:$8 sm:$0xf] %vm591_vm7, %v590_v47   ;;  %593 = vst.msk [vmem:[#allocation0] ss:$8 sm:$0xf0] %vm591_vm7, %v590_v47  }
  0xa7   :  { %v625_v48 = vpop.permute.xlu0 %624  }
  0xa8   :  { %627 = vst.msk [vmem:[#allocation0] ss:$8 sm:$0xf] %vm626_vm8, %v625_v48   ;;  %628 = vst.msk [vmem:[#allocation0] ss:$8 sm:$0xf0] %vm626_vm8, %v625_v48  }
  0xa9   :  { %v660_v49 = vpop.permute.xlu1 %659  }
  0xaa   :  { %662 = vst.msk [vmem:[#allocation0] ss:$8 sm:$0xf] %vm661_vm9, %v660_v49   ;;  %663 = vst.msk [vmem:[#allocation0] ss:$8 sm:$0xf0] %vm661_vm9, %v660_v49  }
  0xae   :  { %v695_v50 = vpop.permute.xlu0 %694  }
  0xaf   :  { %697 = vst.msk [vmem:[#allocation0] ss:$8 sm:$0xf] %vm696_vm10, %v695_v50   ;;  %698 = vst.msk [vmem:[#allocation0] ss:$8 sm:$0xf0] %vm696_vm10, %v695_v50   ;;  %v730_v51 = vpop.permute.xlu1 %729  }
  0xb0   :  { %732 = vst.msk [vmem:[#allocation0] ss:$8 sm:$0xf] %vm731_vm11, %v730_v51   ;;  %733 = vst.msk [vmem:[#allocation0] ss:$8 sm:$0xf0] %vm731_vm11, %v730_v51  }
  0xb2   :  { %v765_v52 = vpop.permute.xlu0 %764  }
  0xb3   :  { %767 = vst.msk [vmem:[#allocation0] ss:$8 sm:$0xf] %vm766_vm12, %v765_v52   ;;  %768 = vst.msk [vmem:[#allocation0] ss:$8 sm:$0xf0] %vm766_vm12, %v765_v52  }
  0xb6   :  { %v800_v53 = vpop.permute.xlu1 %799  }
  0xb7   :  { %802 = vst.msk [vmem:[#allocation0] ss:$8 sm:$0xf] %vm801_vm13, %v800_v53   ;;  %803 = vst.msk [vmem:[#allocation0] ss:$8 sm:$0xf0] %vm801_vm13, %v800_v53  }
  0xb8   :  { %v835_v54 = vpop.permute.xlu0 %834  }
  0xb9   :  { %837 = vst.msk [vmem:[#allocation0] ss:$8 sm:$0xf] %vm836_vm14, %v835_v54   ;;  %838 = vst.msk [vmem:[#allocation0] ss:$8 sm:$0xf0] %vm836_vm14, %v835_v54  }
  0xba   :  { %v870_v55 = vpop.permute.xlu1 %869  }
  0xbb   :  { %872 = vst.msk [vmem:[#allocation0] ss:$8 sm:$0xf] %vm871_vm15, %v870_v55   ;;  %873 = vst.msk [vmem:[#allocation0] ss:$8 sm:$0xf0] %vm871_vm15, %v870_v55  }
  0xbf   :  { %v905_v56 = vpop.permute.xlu0 %904  }
  0xc0   :  { %907 = vst.msk [vmem:[#allocation0] ss:$8 sm:$0xf] %vm906_vm0, %v905_v56   ;;  %908 = vst.msk [vmem:[#allocation0] ss:$8 sm:$0xf0] %vm906_vm0, %v905_v56   ;;  %v940_v57 = vpop.permute.xlu1 %939  }
  0xc1   :  { %942 = vst.msk [vmem:[#allocation0] ss:$8 sm:$0xf] %vm941_vm1, %v940_v57   ;;  %943 = vst.msk [vmem:[#allocation0] ss:$8 sm:$0xf0] %vm941_vm1, %v940_v57  }
  0xc3   :  { %v975_v58 = vpop.permute.xlu0 %974  }
  0xc4   :  { %977 = vst.msk [vmem:[#allocation0] ss:$8 sm:$0xf] %vm976_vm2, %v975_v58   ;;  %978 = vst.msk [vmem:[#allocation0] ss:$8 sm:$0xf0] %vm976_vm2, %v975_v58  }
  0xc7   :  { %v1010_v59 = vpop.permute.xlu1 %1009  }
  0xc8   :  { %1012 = vst.msk [vmem:[#allocation0] ss:$8 sm:$0xf] %vm1011_vm3, %v1010_v59   ;;  %1013 = vst.msk [vmem:[#allocation0] ss:$8 sm:$0xf0] %vm1011_vm3, %v1010_v59  }
  0xc9   :  { %v1045_v60 = vpop.permute.xlu0 %1044  }
  0xca   :  { %1047 = vst.msk [vmem:[#allocation0] ss:$8 sm:$0xf] %vm1046_vm4, %v1045_v60   ;;  %1048 = vst.msk [vmem:[#allocation0] ss:$8 sm:$0xf0] %vm1046_vm4, %v1045_v60  }
  0xcb   :  { %v1080_v61 = vpop.permute.xlu1 %1079  }
  0xcc   :  { %1082 = vst.msk [vmem:[#allocation0] ss:$8 sm:$0xf] %vm1081_vm5, %v1080_v61   ;;  %1083 = vst.msk [vmem:[#allocation0] ss:$8 sm:$0xf0] %vm1081_vm5, %v1080_v61  }
  0xd0   :  { %v1115_v62 = vpop.permute.xlu0 %1114  }
  0xd1   :  { %1117 = vst.msk [vmem:[#allocation0] ss:$8 sm:$0xf] %vm1116_vm6, %v1115_v62   ;;  %1118 = vst.msk [vmem:[#allocation0] ss:$8 sm:$0xf0] %vm1116_vm6, %v1115_v62  }
  0xd8   :  { %v1122_v63 = vld [vmem:[#allocation0] sm:$0x1]  ;;  %v1126_v0 = vld [vmem:[#allocation0 + $0x8] sm:$0x1]  ;;  %v1131_v1 = vld [vmem:[#allocation0 + $0x10] sm:$0x1] }
  0xd9   :  { %1124 = vst [vmem:[%s2523_s1] sm:$0x1] %v1122_v63  ;;  %1427 = vst [vmem:[%s2523_s1 + $0x1] sm:$0x1] %v1126_v0  ;;  %v1137_v2 = vld [vmem:[#allocation0 + $0x18] sm:$0x1] }
  0xda   :  { %1428 = vst [vmem:[%s2523_s1 + $0x2] sm:$0x1] %v1131_v1  ;;  %v1143_v3 = vld [vmem:[#allocation0 + $0x20] sm:$0x1]  ;;  %v1149_v4 = vld [vmem:[#allocation0 + $0x28] sm:$0x1] }
  0xdb   :  { %1429 = vst [vmem:[%s2523_s1 + $0x3] sm:$0x1] %v1137_v2  ;;  %1430 = vst [vmem:[%s2523_s1 + $0x4] sm:$0x1] %v1143_v3  ;;  %v1155_v5 = vld [vmem:[#allocation0 + $0x30] sm:$0x1] }
  0xdc   :  { %1431 = vst [vmem:[%s2523_s1 + $0x5] sm:$0x1] %v1149_v4  ;;  %v1161_v6 = vld [vmem:[#allocation0 + $0x38] sm:$0x1]  ;;  %1432 = vst [vmem:[%s2523_s1 + $0x6] sm:$0x1] %v1155_v5 }
  0xdd   :  { %1433 = vst [vmem:[%s2523_s1 + $0x7] sm:$0x1] %v1161_v6 }

// kernel: up_layer_forward.4
= control target key start
LH: loop header
LB: loop body
LE: loop exit
PB: predicated region body
PF: predicated region fallthrough
CT: control target
= control target key end

     0   :  { %vm58_vm0 = vcmask 588800   ;;  %vm61_vm1 = vcmask 582656   ;;  %v916_v2 = vmov 0.0   ;;  %vm82_vm2 = vcmask 556064   ;;  %s918_s13 = smov 64   ;;  %s919_s14 = smov 120   ;;  %s1144_s0 = inlined_call_operand.vmem [shape: bf16[2,16,64], index: 0, kind: input, shape index: {}]   ;;  %s1145_s3 = inlined_call_operand.vmem [shape: f32[1,64], index: 3, kind: input, shape index: {}]   ;;  %s1146_s4 = inlined_call_operand.vmem [shape: f32[1,64], index: 4, kind: input, shape index: {}]   ;;  %s1147_s1 = inlined_call_operand.vmem [shape: bf16[576,64], index: 1, kind: input, shape index: {}]   ;;  %s1148_s2 = inlined_call_operand.vmem [shape: f32[1,64], index: 2, kind: input, shape index: {}]   ;;  %s1149_s5 = inlined_call_operand.vmem [shape: bf16[2,16,64], index: 5, kind: output, shape index: {0}]   ;;  %s1150_s6 = inlined_call_operand.vmem [shape: f32[1,1,64], index: 6, kind: output, shape index: {1}]   ;;  %s1151_s7 = inlined_call_operand.vmem [shape: f32[1,1,64], index: 7, kind: output, shape index: {2}]  }
   0x1   :  { %v798_v0 = vld [vmem:[%s1144_s0 + $0x8] sm:$0xff]   ;;  %v741_v1 = vld [vmem:[%s1145_s3] ss:$0 sm:$0xff]  ;;  %63 = vst.msk [vmem:[#allocation2 + $0x18] sm:$0xff] %vm58_vm0, %v916_v2  ;;  %64 = vst.msk [vmem:[#allocation2 + $0x20] sm:$0xff] %vm58_vm0, %v916_v2  ;;  %s917_s3 = smov 4  }
   0x2   :  { %59 = vst.msk [vmem:[#allocation2] sm:$0xff] %vm58_vm0, %v916_v2  ;;  %60 = vst.msk [vmem:[#allocation2 + $0x8] sm:$0xff] %vm58_vm0, %v916_v2  ;;  %v796_v3 = vunpack.c.l.bf16 %v798_v0  ;;  %v797_v4 = vunpack.c.h.bf16 %v798_v0  ;;  %v791_v5 = vld [vmem:[%s1144_s0] sm:$0xff]   ;;  %v882_v23 = vld [vmem:[%s1147_s1 + $0x48] sm:$0xff]   ;;  %vm93_vm3 = vcmask 523264   ;;  %s920_s19 = smov 60  }
   0x3   :  { %65 = vst.msk [vmem:[#allocation2 + $0x28] sm:$0x3] %vm61_vm1, %v916_v2  ;;  %62 = vst.msk [vmem:[#allocation2 + $0x10] sm:$0x3] %vm61_vm1, %v916_v2  ;;  %v742_v6 = vld [vmem:[%s1146_s4] ss:$0 sm:$0xff]  ;;  %v792_v7 = vunpack.c.l.bf16 %v791_v5  ;;  %v793_v8 = vunpack.c.h.bf16 %v791_v5 }
   0x4   :  { %v41_v9 = vmul.f32 %v796_v3, %v741_v1  ;;  %v42_v10 = vmul.f32 %v797_v4, %v741_v1  ;;  %v880_v21 = vld [vmem:[%s1147_s1 + $0x40] sm:$0xff]   ;;  %v883_v24 = vld [vmem:[%s1147_s1 + $0x8] sm:$0xff]   ;;  %v884_v25 = vld [vmem:[%s1147_s1 + $0x50] sm:$0xff]   ;;  %s921_s24 = smov 124   ;;  %s922_s25 = smov 56   ;;  %vm110_vm4 = vcmask 1048064  }
   0x5   :  { %v39_v11 = vmul.f32 %v792_v7, %v741_v1  ;;  %v40_v12 = vmul.f32 %v793_v8, %v741_v1  ;;  %v881_v22 = vld [vmem:[%s1147_s1] sm:$0xff]   ;;  %799 = vmatprep.subr.bf16.mxu0 %v880_v21  ;;  %v885_v26 = vld [vmem:[%s1147_s1 + $0x10] sm:$0xff]   ;;  %v886_v28 = vld [vmem:[%s1147_s1 + $0x58] sm:$0xff]   ;;  %vm724_vm5 = vcmask 519168   ;;  %vm688_vm6 = vcmask 516096  }
   0x6   :  { %v52_v13 = vadd.f32 %v742_v6, %v41_v9  ;;  %v53_v14 = vadd.f32 %v742_v6, %v42_v10  ;;  %800 = vmatpush3.bf16.msra.mxu0 %v881_v22  ;;  %v887_v27 = vld [vmem:[%s1147_s1 + $0xc0] sm:$0xff]   ;;  %v888_v30 = vld [vmem:[%s1147_s1 + $0x18] sm:$0xff]   ;;  %v891_v31 = vld [vmem:[%s1147_s1 + $0xc8] sm:$0xff]  }
   0x7   :  { %v50_v15 = vadd.f32 %v742_v6, %v39_v11  ;;  %v51_v16 = vadd.f32 %v742_v6, %v40_v12  ;;  %801 = vmatprep.subr.bf16.mxu0 %v882_v23  ;;  %827 = vmatprep.subr.bf16.mxu1 %v887_v27  ;;  %v889_v29 = vld [vmem:[%s1147_s1 + $0x80] sm:$0xff]   ;;  %v893_v34 = vld [vmem:[%s1147_s1 + $0x88] sm:$0xff]   ;;  %v895_v38 = vld [vmem:[%s1147_s1 + $0xd0] sm:$0xff]  }
   0x8   :  { %v56_v17 = vmax.f32 %v52_v13, 0.0  ;;  %v57_v19 = vmax.f32 %v53_v14, 0.0  ;;  %828 = vmatpush3.bf16.msra.mxu1 %v889_v29  ;;  %v890_v32 = vld [vmem:[%s1147_s1 + $0x60] sm:$0xff]   ;;  %v894_v37 = vld [vmem:[%s1147_s1 + $0x68] sm:$0xff]   ;;  %v897_v40 = vld [vmem:[%s1147_s1 + $0x90] sm:$0xff]  }
   0x9   :  { %v54_v18 = vmax.f32 %v50_v15, 0.0  ;;  %v55_v20 = vmax.f32 %v51_v16, 0.0  ;;  %829 = vmatprep.subr.bf16.mxu1 %v891_v31  ;;  %v892_v33 = vld [vmem:[%s1147_s1 + $0x20] sm:$0xff]   ;;  %v896_v39 = vld [vmem:[%s1147_s1 + $0x28] sm:$0xff]   ;;  %v898_v43 = vld [vmem:[%s1147_s1 + $0x70] sm:$0xff]  }
   0xa   :  { %74 = vrot.lane.b32.xlu1 %v56_v17, %s917_s3  ;;  %802 = vmatpush3.bf16.msra.mxu0 %v883_v24  ;;  %v899_v44 = vld [vmem:[%s1147_s1 + $0xd8] sm:$0xff]   ;;  %v900_v45 = vld [vmem:[%s1147_s1 + $0x30] sm:$0xff]   ;;  %v903_v49 = vld [vmem:[%s1147_s1 + $0xe0] sm:$0xff]  }
   0xb   :  { %70 = vrot.lane.b32.xlu0 %v54_v18, %s917_s3  ;;  %803 = vmatprep.subr.bf16.mxu0 %v884_v25  ;;  %v901_v46 = vld [vmem:[%s1147_s1 + $0x98] sm:$0xff]   ;;  %v905_v52 = vld [vmem:[%s1147_s1 + $0xa0] sm:$0xff]   ;;  %v906_v0 = vld [vmem:[%s1147_s1 + $0xe8] sm:$0xff]  }
   0xc   :  { %830 = vmatpush3.bf16.msra.mxu1 %v893_v34  ;;  %v902_v48 = vld [vmem:[%s1147_s1 + $0x78] sm:$0xff]   ;;  %v907_v3 = vld [vmem:[%s1147_s1 + $0xa8] sm:$0xff]   ;;  %v908_v4 = vld [vmem:[%s1147_s1 + $0x100] sm:$0xff]  }
   0xd   :  { %831 = vmatprep.subr.bf16.mxu1 %v895_v38  ;;  %v904_v51 = vld [vmem:[%s1147_s1 + $0x38] sm:$0xff]   ;;  %v909_v5 = vld [vmem:[%s1147_s1 + $0xf0] sm:$0xff]  }
   0xe   :  { %76 = vrot.lane.b32.xlu1 %v57_v19, %s917_s3  ;;  %804 = vmatpush3.bf16.msra.mxu0 %v885_v26  ;;  %v910_v8 = vld [vmem:[%s1147_s1 + $0xb0] sm:$0xff]   ;;  %v912_v10 = vld [vmem:[%s1147_s1 + $0xf8] sm:$0xff]   ;;  %v911_v19 = vld [vmem:[%s1147_s1 + $0x108] sm:$0xff]  }
   0xf   :  { %72 = vrot.lane.b32.xlu0 %v55_v20, %s917_s3  ;;  %805 = vmatprep.subr.bf16.mxu0 %v886_v28  ;;  %v913_v11 = vld [vmem:[%s1147_s1 + $0xb8] sm:$0xff]   ;;  %v914_v23 = vld [vmem:[%s1147_s1 + $0x110] sm:$0xff]  }
  0x10   :  { %832 = vmatpush3.bf16.msra.mxu1 %v897_v40  ;;  %v915_v27 = vld [vmem:[%s1147_s1 + $0x118] sm:$0xff]  }
  0x11   :  { %833 = vmatprep.subr.bf16.mxu1 %v899_v44 }
  0x12   :  { %806 = vmatpush3.bf16.msra.mxu0 %v888_v30 }
  0x13   :  { %807 = vmatprep.subr.bf16.mxu0 %v890_v32 }
  0x14   :  { %834 = vmatpush3.bf16.msra.mxu1 %v901_v46 }
  0x15   :  { %835 = vmatprep.subr.bf16.mxu1 %v903_v49  ;;  %v743_v49 = vld [vmem:[%s1148_s2] ss:$0 sm:$0xff] }
  0x16   :  { %808 = vmatpush3.bf16.msra.mxu0 %v892_v33 }
  0x17   :  { %809 = vmatprep.subr.bf16.mxu0 %v894_v37 }
  0x18   :  { %836 = vmatpush3.bf16.msra.mxu1 %v905_v52 }
  0x19   :  { %837 = vmatprep.subr.bf16.mxu1 %v906_v0 }
  0x1a   :  { %810 = vmatpush3.bf16.msra.mxu0 %v896_v39 }
  0x1b   :  { %811 = vmatprep.subr.bf16.mxu0 %v898_v43 }
  0x1c   :  { %838 = vmatpush3.bf16.msra.mxu1 %v907_v3 }
  0x1d   :  { %839 = vmatprep.subr.bf16.mxu1 %v909_v5 }
  0x1e   :  { %812 = vmatpush3.bf16.msra.mxu0 %v900_v45 }
  0x1f   :  { %813 = vmatprep.subr.bf16.mxu0 %v902_v48 }
  0x20   :  { %840 = vmatpush3.bf16.msra.mxu1 %v910_v8 }
  0x21   :  { %841 = vmatprep.subr.bf16.mxu1 %v912_v10 }
  0x22   :  { %814 = vmatpush3.bf16.msra.mxu0 %v904_v51 }
  0x23   :  { %861 = vmatprep.subr.bf16.mxu0 %v908_v4 }
  0x24   :  { %842 = vmatpush3.bf16.msra.mxu1 %v913_v11 }
  0x7c   :  { %v75_v35 = vpop.permute.xlu1 %74 }
  0x7d   :  { %85 = vst.msk [vmem:[#allocation2 + $0x19] sm:$0xff] %vm82_vm2, %v75_v35  ;;  %v71_v36 = vpop.permute.xlu0 %70 }
  0x7e   :  { %83 = vst.msk [vmem:[#allocation2 + $0x1] sm:$0xff] %vm82_vm2, %v71_v36 }
  0x80   :  { %v77_v41 = vpop.permute.xlu1 %76 }
  0x81   :  { %86 = vst.msk [vmem:[#allocation2 + $0x21] sm:$0xff] %vm82_vm2, %v77_v41  ;;  %v73_v42 = vpop.permute.xlu0 %72 }
  0x82   :  { %84 = vst.msk [vmem:[#allocation2 + $0x9] sm:$0xff] %vm82_vm2, %v73_v42 }
  0x84   :  { %v115_v47 = vld [vmem:[#allocation2 + $0x18] sm:$0xff] }
  0x85   :  { %v129_v50 = vld [vmem:[#allocation2 + $0x1] sm:$0xff]  ;;  %v131_v6 = vld [vmem:[#allocation2 + $0x19] sm:$0xff] }
  0x86   :  { %v113_v53 = vld [vmem:[#allocation2] sm:$0xff] }
  0x88   :  { %v116_v54 = vld [vmem:[#allocation2 + $0x20] sm:$0xff] }
  0x89   :  { %v187_v55 = vld [vmem:[#allocation2 + $0x1a] sm:$0xff]  ;;  %v130_v56 = vld [vmem:[#allocation2 + $0x9] sm:$0xff]  ;;  %v118_v58 = vpack.c.bf16 %v116_v54, %v115_v47 }
  0x8a   :  { %v114_v57 = vld [vmem:[#allocation2 + $0x8] sm:$0xff]  ;;  %v133_v60 = vpack.c.bf16 %v130_v56, %v129_v50 }
  0x8b   :  { %v185_v59 = vld [vmem:[#allocation2 + $0x2] sm:$0xff]  ;;  %v117_v61 = vpack.c.bf16 %v114_v57, %v113_v53  ;;  %v186_v62 = vld [vmem:[#allocation2 + $0xa] sm:$0xff]  ;;  %95 = vst.msk [vmem:[#allocation3 + $0x28] sm:$0xff] %vm93_vm3, %v118_v58 }
  0x8c   :  { %v188_v63 = vld [vmem:[#allocation2 + $0x22] sm:$0xff]  ;;  %v189_v1 = vpack.c.bf16 %v186_v62, %v185_v59  ;;  %137 = vrot.lane.b32.xlu1 %v133_v60, %s918_s13 }
  0x8d   :  { %v190_v2 = vpack.c.bf16 %v188_v63, %v187_v55  ;;  %121 = vrot.lane.b32.xlu0 %v117_v61, %s919_s14  ;;  %94 = vst.msk [vmem:[#allocation3] sm:$0xff] %vm93_vm3, %v117_v61  ;;  %v132_v7 = vld [vmem:[#allocation2 + $0x21] sm:$0xff] }
  0x8e   :  { %183 = vst.msk [vmem:[#allocation3 + $0x18] sm:$0xff] %vm93_vm3, %v189_v1  ;;  %v134_v9 = vpack.c.bf16 %v132_v7, %v131_v6 }
  0x8f   :  { %184 = vst.msk [vmem:[#allocation3 + $0x40] sm:$0xff] %vm93_vm3, %v190_v2 }
  0x90   :  { %123 = vrot.lane.b32.xlu1 %v118_v58, %s919_s14 }
  0x91   :  { %104 = vrot.lane.b32.xlu0 %v117_v61, %s920_s19 }
  0x94   :  { %153 = vrot.lane.b32.xlu1 %v133_v60, %s921_s24 }
  0x95   :  { %139 = vrot.lane.b32.xlu0 %v134_v9, %s918_s13 }
  0x98   :  { %106 = vrot.lane.b32.xlu1 %v118_v58, %s920_s19 }
  0x99   :  { %193 = vrot.lane.b32.xlu0 %v189_v1, %s920_s19 }
  0x9c   :  { %155 = vrot.lane.b32.xlu1 %v134_v9, %s921_s24 }
  0x9d   :  { %169 = vrot.lane.b32.xlu0 %v133_v60, %s922_s25 }
  0xa0   :  { %209 = vrot.lane.b32.xlu1 %v189_v1, %s919_s14 }
  0xa1   :  { %195 = vrot.lane.b32.xlu0 %v190_v2, %s920_s19 }
  0xa4   :  { %211 = vrot.lane.b32.xlu1 %v190_v2, %s919_s14 }
  0xa5   :  { %171 = vrot.lane.b32.xlu0 %v134_v9, %s922_s25 }
  0xfe   :  { %v138_v12 = vpop.permute.xlu1 %137 }
  0xff   :  { %v122_v13 = vpop.permute.xlu0 %121 }
 0x100   :  { %127 = vst.msk [vmem:[#allocation3 + $0x8] sm:$0xff] %vm93_vm3, %v122_v13 }
 0x101   :  { %143 = vst.msk [vmem:[#allocation3 + $0x8] sm:$0xff] %vm110_vm4, %v138_v12 }
 0x102   :  { %v124_v14 = vpop.permute.xlu1 %123 }
 0x103   :  { %v105_v15 = vpop.permute.xlu0 %104  ;;  %128 = vst.msk [vmem:[#allocation3 + $0x30] sm:$0xff] %vm93_vm3, %v124_v14 }
 0x104   :  { %111 = vst.msk [vmem:[#allocation3] sm:$0xff] %vm110_vm4, %v105_v15 }
 0x106   :  { %v154_v16 = vpop.permute.xlu1 %153 }
 0x107   :  { %v140_v17 = vpop.permute.xlu0 %139  ;;  %159 = vst.msk [vmem:[#allocation3 + $0x10] sm:$0xff] %vm93_vm3, %v154_v16 }
 0x108   :  { %144 = vst.msk [vmem:[#allocation3 + $0x30] sm:$0xff] %vm110_vm4, %v140_v17  ;;  %v218_v18 = vld [vmem:[#allocation3 + $0x8] sm:$0xff] }
 0x109   :  { %560 = vmatprep.mubr.bf16.mxu0 %v218_v18 }
 0x10a   :  { %v107_v20 = vpop.permute.xlu1 %106 }
 0x10b   :  { %v194_v21 = vpop.permute.xlu0 %193  ;;  %v217_v22 = vld [vmem:[#allocation3] sm:$0xff]  ;;  %112 = vst.msk [vmem:[#allocation3 + $0x28] sm:$0xff] %vm110_vm4, %v107_v20 }
 0x10c   :  { %199 = vst.msk [vmem:[#allocation3 + $0x18] sm:$0xff] %vm110_vm4, %v194_v21  ;;  %561 = vmatmul.mubr.bf16.vlgmr.msra.gmra.mrb[0].mxu0 %v217_v22 }
 0x10d   :  { %862 = vmatpush3.bf16.msra.mxu0 %v908_v4 }
 0x10e   :  { %863 = vmatprep.subr.bf16.mxu0 %v911_v19  ;;  %v156_v24 = vpop.permute.xlu1 %155 }
 0x10f   :  { %v170_v25 = vpop.permute.xlu0 %169  ;;  %v223_v26 = vld [vmem:[#allocation3 + $0x30] sm:$0xff]  ;;  %160 = vst.msk [vmem:[#allocation3 + $0x38] sm:$0xff] %vm93_vm3, %v156_v24 }
 0x110   :  { %175 = vst.msk [vmem:[#allocation3 + $0x10] sm:$0xff] %vm110_vm4, %v170_v25  ;;  %568 = vmatprep.mubr.bf16.mxu0 %v223_v26 }
 0x111   :  { %864 = vmatpush3.bf16.msra.mxu0 %v911_v19 }
 0x112   :  { %865 = vmatprep.subr.bf16.mxu0 %v914_v23  ;;  %v210_v28 = vpop.permute.xlu1 %209  ;;  %v222_v30 = vld [vmem:[#allocation3 + $0x28] sm:$0xff] }
 0x113   :  { %v196_v29 = vpop.permute.xlu0 %195  ;;  %v220_v31 = vld [vmem:[#allocation3 + $0x18] sm:$0xff]  ;;  %215 = vst.msk [vmem:[#allocation3 + $0x20] sm:$0xff] %vm93_vm3, %v210_v28 }
 0x114   :  { %200 = vst.msk [vmem:[#allocation3 + $0x40] sm:$0xff] %vm110_vm4, %v196_v29  ;;  %569 = vmatmul.mubr.bf16.gmra.mrb[4].mxu0 %v222_v30  ;;  %609 = vmatprep.mubr.bf16.mxu1 %v220_v31 }
 0x115   :  { %866 = vmatpush3.bf16.msra.mxu0 %v914_v23 }
 0x116   :  { %867 = vmatprep.subr.bf16.mxu0 %v915_v27  ;;  %v212_v32 = vpop.permute.xlu1 %211 }
 0x117   :  { %v172_v33 = vpop.permute.xlu0 %171  ;;  %v219_v34 = vld [vmem:[#allocation3 + $0x10] sm:$0xff]  ;;  %216 = vst.msk [vmem:[#allocation3 + $0x48] sm:$0xff] %vm93_vm3, %v212_v32 }
 0x118   :  { %176 = vst.msk [vmem:[#allocation3 + $0x38] sm:$0xff] %vm110_vm4, %v172_v33  ;;  %610 = vmatmul.mubr.bf16.vlgmr.msra.gmra.mrb[0].mxu1 %v219_v34 }
 0x119   :  { %868 = vmatpush3.bf16.msra.mxu0 %v915_v27 }
 0x11a   :  { %v221_v36 = vld [vmem:[#allocation3 + $0x20] sm:$0xff] }
 0x11b   :  { %v225_v35 = vld [vmem:[#allocation3 + $0x40] sm:$0xff]  ;;  %869 = vmatprep.mubr.msk.bf16.mxu0 %vm93_vm3, %v221_v36 }
 0x11c   :  { %617 = vmatprep.mubr.bf16.mxu1 %v225_v35 }
 0x11e   :  { %v226_v38 = vld [vmem:[#allocation3 + $0x48] sm:$0xff] }
 0x11f   :  { %v224_v37 = vld [vmem:[#allocation3 + $0x38] sm:$0xff]  ;;  %870 = vmatmul.mubr.msk.bf16.vlgmr.msra.gmra.mrb[8].mxu0 %vm93_vm3, %v226_v38 }
 0x120   :  { %618 = vmatmul.mubr.bf16.gmra.mrb[4].mxu1 %v224_v37 }
 0x1df   :  { %v815_v39 = vpop.f32.mrb[0].mxu0 }
 0x1e0   :  { %v816_v40 = vpop.f32.mrb[1].mxu0 }
 0x1e1   :  { %v817_v41 = vadd.f32 %v816_v40, %v815_v39  ;;  %v818_v42 = vpop.f32.mrb[2].mxu0 }
 0x1e2   :  { %v819_v43 = vpop.f32.mrb[3].mxu0 }
 0x1e3   :  { %v820_v44 = vadd.f32 %v819_v43, %v818_v42  ;;  %v563_v54 = vadd.f32 %v817_v41, %v743_v49 }
 0x1e5   :  { %v566_v58 = vadd.f32 %v820_v44, %v743_v49 }
 0x1e7   :  { %v821_v45 = vpop.f32.mrb[4].mxu0 }
 0x1e8   :  { %v822_v46 = vpop.f32.mrb[5].mxu0 }
 0x1e9   :  { %v823_v47 = vadd.f32 %v822_v46, %v821_v45  ;;  %v824_v48 = vpop.f32.mrb[6].mxu0 }
 0x1ea   :  { %v825_v50 = vpop.f32.mrb[7].mxu0 }
 0x1eb   :  { %v826_v51 = vadd.f32 %v825_v50, %v824_v48  ;;  %v843_v52 = vpop.f32.mrb[0].mxu1  ;;  %v571_v2 = vadd.f32 %v823_v47, %v743_v49 }
 0x1ec   :  { %v844_v53 = vpop.f32.mrb[1].mxu1 }
 0x1ed   :  { %v845_v55 = vadd.f32 %v844_v53, %v843_v52  ;;  %v846_v56 = vpop.f32.mrb[2].mxu1  ;;  %v574_v11 = vadd.f32 %v826_v51, %v743_v49 }
 0x1ee   :  { %v847_v57 = vpop.f32.mrb[3].mxu1 }
 0x1ef   :  { %v848_v59 = vadd.f32 %v847_v57, %v846_v56  ;;  %v612_v60 = vadd.f32 %v845_v55, %v563_v54 }
 0x1f1   :  { %v615_v61 = vadd.f32 %v848_v59, %v566_v58 }
 0x1f2   :  { %v871_v63 = vpop.f32.mrb[8].mxu0 }
 0x1f3   :  { %v849_v62 = vpop.f32.mrb[4].mxu1  ;;  %v660_v1 = vpop.f32.mrb[9].mxu0 }
 0x1f4   :  { %v850_v0 = vpop.f32.mrb[5].mxu1  ;;  %v661_v4 = vadd.f32 %v660_v1, %v612_v60  ;;  %v872_v6 = vpop.f32.mrb[10].mxu0 }
 0x1f5   :  { %v851_v3 = vadd.f32 %v850_v0, %v849_v62  ;;  %v852_v5 = vpop.f32.mrb[6].mxu1  ;;  %v663_v8 = vpop.f32.mrb[11].mxu0 }
 0x1f6   :  { %v853_v7 = vpop.f32.mrb[7].mxu1  ;;  %v786_v10 = vpack.c.bf16 %v661_v4, %v661_v4  ;;  %v690_v12 = vmul.f32 %v661_v4, %v661_v4  ;;  %v664_v14 = vadd.f32 %v663_v8, %v615_v61  ;;  %v675_v16 = vsel %vm93_vm3, %v661_v4, 0.0 }
 0x1f7   :  { %v620_v9 = vadd.f32 %v851_v3, %v571_v2  ;;  %v854_v13 = vadd.f32 %v853_v7, %v852_v5 }
 0x1f8   :  { %725 = vst.msk [vmem:[%s1149_s5] sm:$0xf] %vm724_vm5, %v786_v10  ;;  %v676_v18 = vsel %vm93_vm3, %v664_v14, 0.0  ;;  %v691_v19 = vmul.f32 %v664_v14, %v664_v14  ;;  %v787_v20 = vpack.c.bf16 %v664_v14, %v664_v14  ;;  %v694_v25 = vsel %vm93_vm3, %v690_v12, 0.0 }
 0x1f9   :  { %v669_v15 = vadd.f32 %v871_v63, %v620_v9  ;;  %v623_v17 = vadd.f32 %v854_v13, %v574_v11  ;;  %v677_v23 = vadd.f32 %v676_v18, %v675_v16 }
 0x1fa   :  { %v695_v27 = vsel %vm93_vm3, %v691_v19, 0.0  ;;  %726 = vst.msk [vmem:[%s1149_s5 + $0x4] sm:$0xf] %vm724_vm5, %v787_v20 }
 0x1fb   :  { %v692_v21 = vmul.f32 %v669_v15, %v669_v15  ;;  %v788_v22 = vpack.c.bf16 %v669_v15, %v669_v15  ;;  %v678_v24 = vsel %vm93_vm3, %v669_v15, 0.0  ;;  %v672_v26 = vadd.f32 %v872_v6, %v623_v17 }
 0x1fc   :  { %v679_v28 = vadd.f32 %v678_v24, %v677_v23  ;;  %v696_v29 = vadd.f32 %v695_v27, %v694_v25 }
 0x1fd   :  { %727 = vst.msk [vmem:[%s1149_s5 + $0x8] sm:$0xf] %vm724_vm5, %v788_v22  ;;  %v697_v30 = vsel %vm93_vm3, %v692_v21, 0.0  ;;  %v680_v31 = vsel %vm93_vm3, %v672_v26, 0.0  ;;  %v693_v32 = vmul.f32 %v672_v26, %v672_v26  ;;  %v789_v33 = vpack.c.bf16 %v672_v26, %v672_v26 }
 0x1fe   :  { %v681_v34 = vadd.f32 %v680_v31, %v679_v28  ;;  %v698_v35 = vadd.f32 %v697_v30, %v696_v29 }
 0x1ff   :  { %v699_v36 = vsel %vm93_vm3, %v693_v32, 0.0  ;;  %728 = vst.msk [vmem:[%s1149_s5 + $0xc] sm:$0xf] %vm724_vm5, %v789_v33 }
 0x200   :  { %v682_v37 = vrot.slane %v681_v34, 4  ;;  %v700_v38 = vadd.f32 %v699_v36, %v698_v35 }
 0x202   :  { %v683_v39 = vadd.f32 %v682_v37, %v681_v34  ;;  %v701_v40 = vrot.slane %v700_v38, 4 }
 0x204   :  { %v684_v41 = vrot.slane %v683_v39, 2  ;;  %v702_v42 = vadd.f32 %v701_v40, %v700_v38 }
 0x206   :  { %v685_v43 = vadd.f32 %v684_v41, %v683_v39  ;;  %v703_v44 = vrot.slane %v702_v42, 2 }
 0x208   :  { %v686_v45 = vrot.slane %v685_v43, 1  ;;  %v704_v46 = vadd.f32 %v703_v44, %v702_v42 }
 0x20a   :  { %v687_v47 = vadd.f32 %v686_v45, %v685_v43  ;;  %v705_v48 = vrot.slane %v704_v46, 1 }
 0x20c   :  { %689 = vst.msk [vmem:[%s1150_s6] sm:$0x1] %vm688_vm6, %v687_v47  ;;  %v706_v49 = vadd.f32 %v705_v48, %v704_v46 }
 0x20e   :  { %707 = vst.msk [vmem:[%s1151_s7] sm:$0x1] %vm688_vm6, %v706_v49 }

// kernel: up_layer_forward.5
= control target key start
LH: loop header
LB: loop body
LE: loop exit
PB: predicated region body
PF: predicated region fallthrough
CT: control target
= control target key end

     0   :  { %v19_v0 = vlaneseq  ;;  %v170_v2 = vmov 1983009808   ;;  %s206_s0 = inlined_call_operand.vmem [shape: bf16[2,1024], index: 0, kind: input, shape index: {}]   ;;  %s207_s1 = inlined_call_operand.vmem [shape: f32[1,1024], index: 1, kind: input, shape index: {}]   ;;  %s208_s2 = inlined_call_operand.vmem [shape: f32[1,1024], index: 2, kind: input, shape index: {}]   ;;  %s209_s3 = inlined_call_operand.vmem [shape: f32[2,1024], index: 3, kind: output, shape index: {}]  }
   0x1   :  { %v14_v1 = vld [vmem:[%s206_s0] sm:$0xff]  ;;  %v54_v3 = vunpack.c.l.s4 %v170_v2 }
   0x2   :  { %v20_v4 = vshrl.u32 %v19_v0, 7  ;;  %v15_v5 = vunpack.c.l.bf16 %v14_v1  ;;  %v17_v6 = vld [vmem:[%s207_s1] sm:$0xff]  ;;  %v16_v50 = vunpack.c.h.bf16 %v14_v1 }
   0x3   :  { %v55_v7 = vunpack.c.0.s8 %v54_v3  ;;  %v89_v12 = vld [vmem:[%s208_s2] sm:$0xff] }
   0x4   :  { %v21_v8 = vsub.s32 0, %v20_v4  ;;  %v25_v9 = vsub.s32 1, %v20_v4  ;;  %v29_v10 = vsub.s32 2, %v20_v4  ;;  %v33_v11 = vsub.s32 3, %v20_v4 }
   0x5   :  { %v58_v13 = vsub.s32 %v55_v7, %v20_v4  ;;  %v37_v14 = vsub.s32 4, %v20_v4  ;;  %v41_v15 = vsub.s32 5, %v20_v4  ;;  %v45_v16 = vsub.s32 6, %v20_v4 }
   0x6   :  { %v22_v17 = vrot.slane %v17_v6, %v21_v8  ;;  %v26_v18 = vrot.slane %v17_v6, %v25_v9  ;;  %v30_v19 = vrot.slane %v17_v6, %v29_v10  ;;  %v34_v20 = vrot.slane %v17_v6, %v33_v11 }
   0x7   :  { %v94_v21 = vrot.slane %v89_v12, %v21_v8  ;;  %v98_v22 = vrot.slane %v89_v12, %v25_v9  ;;  %v102_v23 = vrot.slane %v89_v12, %v29_v10  ;;  %v106_v24 = vrot.slane %v89_v12, %v33_v11 }
   0x8   :  { %v51_v25 = vcombine.low %v22_v17, %v26_v18  ;;  %v52_v26 = vcombine.low %v30_v19, %v34_v20  ;;  %v38_v27 = vrot.slane %v17_v6, %v37_v14  ;;  %v42_v28 = vrot.slane %v17_v6, %v41_v15 }
   0x9   :  { %v123_v29 = vcombine.low %v94_v21, %v98_v22  ;;  %v124_v30 = vcombine.low %v102_v23, %v106_v24  ;;  %v46_v31 = vrot.slane %v17_v6, %v45_v16  ;;  %v49_v32 = vsub.s32 7, %v20_v4 }
   0xa   :  { %v59_v33 = vrot.slane %v51_v25, %v58_v13  ;;  %v66_v34 = vrot.slane %v52_v26, %v58_v13  ;;  %v68_v35 = vcombine.low %v38_v27, %v42_v28  ;;  %v110_v36 = vrot.slane %v89_v12, %v37_v14 }
   0xb   :  { %v131_v37 = vrot.slane %v123_v29, %v58_v13  ;;  %v138_v38 = vrot.slane %v124_v30, %v58_v13  ;;  %v50_v39 = vrot.slane %v17_v6, %v49_v32  ;;  %v114_v40 = vrot.slane %v89_v12, %v41_v15 }
   0xc   :  { %v67_v41 = vcombine.low %v59_v33, %v66_v34  ;;  %v118_v42 = vrot.slane %v89_v12, %v45_v16  ;;  %v122_v43 = vrot.slane %v89_v12, %v49_v32  ;;  %v76_v46 = vrot.slane %v68_v35, %v58_v13 }
   0xd   :  { %v139_v44 = vcombine.low %v131_v37, %v138_v38  ;;  %v69_v45 = vcombine.low %v46_v31, %v50_v39  ;;  %v140_v47 = vcombine.low %v110_v36, %v114_v40 }
   0xe   :  { %v87_v48 = vmul.f32 %v67_v41, %v15_v5  ;;  %v141_v49 = vcombine.low %v118_v42, %v122_v43 }
   0xf   :  { %v83_v51 = vrot.slane %v69_v45, %v58_v13  ;;  %v148_v52 = vrot.slane %v140_v47, %v58_v13 }
  0x10   :  { %v159_v53 = vadd.f32 %v139_v44, %v87_v48  ;;  %v155_v54 = vrot.slane %v141_v49, %v58_v13 }
  0x11   :  { %v84_v55 = vcombine.low %v76_v46, %v83_v51 }
  0x12   :  { %v161_v56 = vmax.f32 %v159_v53, 0.0  ;;  %v156_v57 = vcombine.low %v148_v52, %v155_v54 }
  0x13   :  { %v88_v58 = vmul.f32 %v84_v55, %v16_v50 }
  0x14   :  { %163 = vst [vmem:[%s209_s3] sm:$0xff] %v161_v56 }
  0x15   :  { %v160_v59 = vadd.f32 %v156_v57, %v88_v58 }
  0x17   :  { %v162_v60 = vmax.f32 %v160_v59, 0.0 }
  0x19   :  { %164 = vst [vmem:[%s209_s3 + $0x8] sm:$0xff] %v162_v60 }

// kernel: up_layer_forward.3
= control target key start
LH: loop header
LB: loop body
LE: loop exit
PB: predicated region body
PF: predicated region fallthrough
CT: control target
= control target key end

     0   :  { %vm60_vm0 = vcmask 130048   ;;  %v1973_v10 = vmov 0   ;;  %vm150_vm1 = vcmask 523264   ;;  %vm358_vm2 = vcmask 588800   ;;  %s1975_s27 = smov 4   ;;  %s1976_s19 = smov 64   ;;  %s2431_s0 = inlined_call_operand.vmem [shape: f32[2,8,64], index: 0, kind: input, shape index: {}]   ;;  %s2432_s2 = inlined_call_operand.vmem [shape: bf16[32,16], index: 2, kind: input, shape index: {}]   ;;  %s2433_s4 = inlined_call_operand.vmem [shape: bf16[64,64], index: 4, kind: input, shape index: {}]   ;;  %s2434_s5 = inlined_call_operand.vmem [shape: bf16[64,64], index: 5, kind: input, shape index: {}]   ;;  %s2435_s3 = inlined_call_operand.vmem [shape: f32[32,1], index: 3, kind: input, shape index: {}]   ;;  %s2436_s6 = inlined_call_operand.vmem [shape: f32[1,64], index: 6, kind: input, shape index: {}]   ;;  %s2437_s1 = inlined_call_operand.vmem [shape: f32[2,16,64], index: 1, kind: input, shape index: {}]   ;;  %s2438_s7 = inlined_call_operand.vmem [shape: bf16[1152,64], index: 7, kind: input, shape index: {}]   ;;  %s2439_s8 = inlined_call_operand.vmem [shape: f32[1,64], index: 8, kind: input, shape index: {}]   ;;  %s2440_s9 = inlined_call_operand.vmem [shape: bf16[2,16,64], index: 9, kind: output, shape index: {0}]   ;;  %s2441_s10 = inlined_call_operand.vmem [shape: f32[1,1,64], index: 10, kind: output, shape index: {1}]   ;;  %s2442_s11 = inlined_call_operand.vmem [shape: f32[1,1,64], index: 11, kind: output, shape index: {2}]  }
   0x1   :  { %v36_v0 = vld [vmem:[%s2431_s0] sm:$0xff]  ;;  %v37_v1 = vld [vmem:[%s2431_s0 + $0x8] sm:$0xff]  ;;  %v1895_v7 = vld [vmem:[%s2433_s4 + $0x10] sm:$0xff]   ;;  %1889 = vset.pattern.permute.xlu0 %v1973_v10  ;;  %1890 = vset.pattern.permute.xlu1 %v1973_v10  ;;  %v1974_v28 = vmov 0.0   ;;  %vm361_vm3 = vcmask 582656   ;;  %vm388_vm4 = vcmask 556064  }
   0x2   :  { %v1689_v2 = vpack.c.bf16 %v37_v1, %v36_v0  ;;  %v1891_v3 = vld [vmem:[%s2432_s2] sm:$0xff]   ;;  %v1892_v4 = vld [vmem:[%s2432_s2 + $0x8] sm:$0xff]   ;;  %v1896_v8 = vld [vmem:[%s2433_s4 + $0x18] sm:$0xff]   ;;  %359 = vst.msk [vmem:[#allocation2] sm:$0xff] %vm358_vm2, %v1974_v28  ;;  %s1977_s20 = smov 120   ;;  %s1978_s22 = smov 60  }
   0x3   :  { %1833 = vmatprep.mubr.msk.bf16.mxu1 %vm60_vm0, %v1891_v3  ;;  %v1893_v5 = vld [vmem:[%s2433_s4] sm:$0xff]   ;;  %v1894_v6 = vld [vmem:[%s2433_s4 + $0x8] sm:$0xff]   ;;  %v290_v14 = vld [vmem:[%s2435_s3 + $0x18] sm:$0xff]  ;;  %360 = vst.msk [vmem:[#allocation2 + $0x8] sm:$0xff] %vm358_vm2, %v1974_v28  ;;  %s1979_s0 = smov 124   ;;  %s1980_s29 = smov 56  }
   0x4   :  { %1831 = vmatprep.subr.bf16.mxu1 %v1689_v2  ;;  %1837 = vmatprep.subr.bf16.mxu0 %v1893_v5  ;;  %v1897_v9 = vld [vmem:[%s2434_s5] sm:$0xff]   ;;  %v288_v12 = vld [vmem:[%s2435_s3 + $0x8] sm:$0xff]  ;;  %v289_v16 = vld [vmem:[%s2435_s3 + $0x10] sm:$0xff]  ;;  %v294_v17 = vsub.f32 1.0, %v290_v14  ;;  %363 = vst.msk [vmem:[#allocation2 + $0x18] sm:$0xff] %vm358_vm2, %v1974_v28  ;;  %vm439_vm5 = vcmask 1048064  }
   0x5   :  { %1832 = vmatpush3.bf16.msra.mxu1 %v1689_v2  ;;  %1838 = vmatpush3.bf16.msra.mxu0 %v1893_v5  ;;  %v287_v11 = vld [vmem:[%s2435_s3] sm:$0xff]  ;;  %v292_v15 = vsub.f32 1.0, %v288_v12  ;;  %v293_v18 = vsub.f32 1.0, %v289_v16  ;;  %v1898_v25 = vld [vmem:[%s2434_s5 + $0x8] sm:$0xff]   ;;  %v1899_v26 = vld [vmem:[%s2434_s5 + $0x10] sm:$0xff]   ;;  %364 = vst.msk [vmem:[#allocation2 + $0x20] sm:$0xff] %vm358_vm2, %v1974_v28 }
   0x6   :  { %1839 = vmatprep.subr.bf16.mxu0 %v1894_v6  ;;  %v291_v13 = vsub.f32 1.0, %v287_v11  ;;  %321 = vperm.xlu1 %1890, %v287_v11   ;;  %v1900_v27 = vld [vmem:[%s2434_s5 + $0x18] sm:$0xff]   ;;  %366 = vst.msk [vmem:[#allocation3] sm:$0xff] %vm358_vm2, %v1974_v28  ;;  %367 = vst.msk [vmem:[#allocation3 + $0x8] sm:$0xff] %vm358_vm2, %v1974_v28  ;;  %v1611_v52 = vld [vmem:[%s2436_s6] ss:$0 sm:$0xff] }
   0x7   :  { %369 = vst.msk [vmem:[#allocation3 + $0x18] sm:$0xff] %vm358_vm2, %v1974_v28  ;;  %370 = vst.msk [vmem:[#allocation3 + $0x20] sm:$0xff] %vm358_vm2, %v1974_v28  ;;  %v393_v62 = vld [vmem:[%s2437_s1] sm:$0xff]  ;;  %v394_v63 = vld [vmem:[%s2437_s1 + $0x8] sm:$0xff]  ;;  %vm1577_vm6 = vcmask 519168   ;;  %vm1541_vm7 = vcmask 516096  }
   0x8   :  { %1834 = vmatmul.mubr.msk.bf16.vlgmr.msra.gmra.mrb[0].mxu1 %vm60_vm0, %v1892_v4  ;;  %297 = vperm.xlu0 %1889, %v291_v13   ;;  %362 = vst.msk [vmem:[#allocation2 + $0x10] sm:$0x3] %vm361_vm3, %v1974_v28  ;;  %365 = vst.msk [vmem:[#allocation2 + $0x28] sm:$0x3] %vm361_vm3, %v1974_v28  ;;  %v395_v0 = vld [vmem:[%s2437_s1 + $0x10] sm:$0xff]  ;;  %v396_v1 = vld [vmem:[%s2437_s1 + $0x18] sm:$0xff] }
   0x9   :  { %1840 = vmatpush3.bf16.msra.mxu0 %v1894_v6  ;;  %368 = vst.msk [vmem:[#allocation3 + $0x10] sm:$0x3] %vm361_vm3, %v1974_v28  ;;  %371 = vst.msk [vmem:[#allocation3 + $0x28] sm:$0x3] %vm361_vm3, %v1974_v28  ;;  %v1901_v2 = vld [vmem:[%s2438_s7 + $0x40] sm:$0xff]   ;;  %v1903_v4 = vld [vmem:[%s2438_s7 + $0x48] sm:$0xff]  }
   0xa   :  { %1841 = vmatprep.subr.bf16.mxu0 %v1895_v7  ;;  %326 = vperm.xlu1 %1890, %v288_v12   ;;  %v1902_v3 = vld [vmem:[%s2438_s7] sm:$0xff]   ;;  %v1904_v5 = vld [vmem:[%s2438_s7 + $0x8] sm:$0xff]   ;;  %v1905_v6 = vld [vmem:[%s2438_s7 + $0x50] sm:$0xff]  }
   0xb   :  { %1709 = vmatprep.subr.bf16.mxu1 %v1901_v2  ;;  %v1910_v10 = vld [vmem:[%s2438_s7 + $0x80] sm:$0xff]   ;;  %v1908_v11 = vld [vmem:[%s2438_s7 + $0x18] sm:$0xff]   ;;  %v1913_v13 = vld [vmem:[%s2438_s7 + $0xc8] sm:$0xff]  }
   0xc   :  { %302 = vperm.xlu0 %1889, %v292_v15   ;;  %1710 = vmatpush3.bf16.msra.mxu1 %v1902_v3  ;;  %v1911_v12 = vld [vmem:[%s2438_s7 + $0x60] sm:$0xff]   ;;  %v1914_v15 = vld [vmem:[%s2438_s7 + $0x88] sm:$0xff]   ;;  %v1938_v3 = vld [vmem:[%s2438_s7 + $0xb8] sm:$0xff]  }
   0xd   :  { %1842 = vmatpush3.bf16.msra.mxu0 %v1895_v7  ;;  %1711 = vmatprep.subr.bf16.mxu1 %v1903_v4  ;;  %v1906_v7 = vld [vmem:[%s2438_s7 + $0x10] sm:$0xff]  }
   0xe   :  { %1843 = vmatprep.subr.bf16.mxu0 %v1896_v8  ;;  %312 = vperm.xlu1 %1890, %v294_v17   ;;  %v1916_v17 = vld [vmem:[%s2438_s7 + $0x28] sm:$0xff]  }
  0x10   :  { %307 = vperm.xlu0 %1889, %v293_v18   ;;  %1712 = vmatpush3.bf16.msra.mxu1 %v1904_v5  ;;  %v1917_v18 = vld [vmem:[%s2438_s7 + $0xd0] sm:$0xff]  }
  0x11   :  { %1844 = vmatpush3.bf16.msra.mxu0 %v1896_v8  ;;  %v1907_v8 = vld [vmem:[%s2438_s7 + $0x58] sm:$0xff]   ;;  %1713 = vmatprep.subr.bf16.mxu1 %v1905_v6  ;;  %v1941_v6 = vld [vmem:[%s2438_s7 + $0x1c0] sm:$0xff]  }
  0x12   :  { %1849 = vmatprep.subr.bf16.mxu0 %v1897_v9  ;;  %336 = vperm.xlu1 %1890, %v290_v14   ;;  %v1912_v14 = vld [vmem:[%s2438_s7 + $0x20] sm:$0xff]  }
  0x14   :  { %331 = vperm.xlu0 %1889, %v289_v16   ;;  %1714 = vmatpush3.bf16.msra.mxu1 %v1906_v7  ;;  %v1915_v16 = vld [vmem:[%s2438_s7 + $0x68] sm:$0xff]  }
  0x15   :  { %1715 = vmatprep.subr.bf16.mxu1 %v1907_v8 }
  0x18   :  { %1716 = vmatpush3.bf16.msra.mxu1 %v1908_v11 }
  0x19   :  { %1717 = vmatprep.subr.bf16.mxu1 %v1911_v12 }
  0x1c   :  { %1718 = vmatpush3.bf16.msra.mxu1 %v1912_v14 }
  0x1d   :  { %1719 = vmatprep.subr.bf16.mxu1 %v1915_v16 }
  0x20   :  { %1720 = vmatpush3.bf16.msra.mxu1 %v1916_v17 }
  0x85   :  { %v322_v32 = vpop.permute.xlu1 %321 }
  0x87   :  { %v298_v29 = vpop.permute.xlu0 %297 }
  0x89   :  { %v327_v36 = vpop.permute.xlu1 %326 }
  0x8b   :  { %v303_v35 = vpop.permute.xlu0 %302 }
  0x8d   :  { %v313_v38 = vpop.permute.xlu1 %312 }
  0x8f   :  { %v308_v37 = vpop.permute.xlu0 %307 }
  0x91   :  { %v337_v45 = vpop.permute.xlu1 %336 }
  0x93   :  { %v332_v39 = vpop.permute.xlu0 %331 }
  0xdb   :  { %v1835_v19 = vpop.f32.mrb[0].mxu1 }
  0xdc   :  { %v101_v20 = vpop.f32.mrb[1].mxu1 }
  0xdd   :  { %v1836_v21 = vpop.f32.mrb[2].mxu1 }
  0xde   :  { %v117_v22 = vpack.c.bf16 %v1836_v21, %v1835_v19  ;;  %v104_v23 = vpop.f32.mrb[3].mxu1  ;;  %v1919_v21 = vld [vmem:[%s2438_s7 + $0x70] sm:$0xff]  }
  0xdf   :  { %v116_v24 = vpack.c.bf16 %v104_v23, %v101_v20  ;;  %v1918_v20 = vld [vmem:[%s2438_s7 + $0x90] sm:$0xff]   ;;  %1721 = vmatprep.subr.bf16.mxu1 %v1919_v21 }
  0xe0   :  { %v1920_v23 = vld [vmem:[%s2438_s7 + $0x30] sm:$0xff]  }
  0xe1   :  { %1845 = vmatprep.mubr.msk.bf16.mxu0 %vm150_vm1, %v116_v24  ;;  %1722 = vmatpush3.bf16.msra.mxu1 %v1920_v23  ;;  %v1929_v23 = vld [vmem:[%s2438_s7 + $0x100] sm:$0xff]  }
  0xe2   :  { %1846 = vmatmul.mubr.msk.bf16.vlgmr.msra.gmra.mrb[0].mxu0 %vm150_vm1, %v117_v22 }
  0xe3   :  { %1850 = vmatpush3.bf16.msra.mxu0 %v1897_v9  ;;  %1857 = vmatprep.mubr.msk.bf16.mxu0 %vm150_vm1, %v116_v24  ;;  %v1909_v9 = vld [vmem:[%s2438_s7 + $0xc0] sm:$0xff]   ;;  %v1921_v24 = vld [vmem:[%s2438_s7 + $0xd8] sm:$0xff]  }
  0xe4   :  { %1851 = vmatprep.subr.bf16.mxu0 %v1898_v25 }
  0xe7   :  { %1852 = vmatpush3.bf16.msra.mxu0 %v1898_v25 }
  0xe8   :  { %1853 = vmatprep.subr.bf16.mxu0 %v1899_v26 }
  0xeb   :  { %1854 = vmatpush3.bf16.msra.mxu0 %v1899_v26  ;;  %v1922_v26 = vld [vmem:[%s2438_s7 + $0x98] sm:$0xff]  }
  0xec   :  { %1855 = vmatprep.subr.bf16.mxu0 %v1900_v27 }
  0xef   :  { %1856 = vmatpush3.bf16.msra.mxu0 %v1900_v27  ;;  %v1923_v27 = vld [vmem:[%s2438_s7 + $0x78] sm:$0xff]  }
  0xf0   :  { %1737 = vmatprep.subr.bf16.mxu0 %v1909_v9  ;;  %1723 = vmatprep.subr.bf16.mxu1 %v1923_v27 }
  0xf2   :  { %1858 = vmatmul.mubr.msk.bf16.vlgmr.msra.gmra.mrb[4].mxu0 %vm150_vm1, %v117_v22 }
  0xf3   :  { %1738 = vmatpush3.bf16.msra.mxu0 %v1910_v10 }
  0xf4   :  { %1739 = vmatprep.subr.bf16.mxu0 %v1913_v13 }
  0xf7   :  { %1740 = vmatpush3.bf16.msra.mxu0 %v1914_v15 }
  0xf8   :  { %1741 = vmatprep.subr.bf16.mxu0 %v1917_v18 }
  0xfb   :  { %1742 = vmatpush3.bf16.msra.mxu0 %v1918_v20 }
  0xfc   :  { %1743 = vmatprep.subr.bf16.mxu0 %v1921_v24  ;;  %v1931_v24 = vld [vmem:[%s2438_s7 + $0x148] sm:$0xff]  }
  0xff   :  { %1744 = vmatpush3.bf16.msra.mxu0 %v1922_v26 }
 0x1b5   :  { %v1847_v30 = vpop.f32.mrb[0].mxu0 }
 0x1b6   :  { %v191_v31 = vpop.f32.mrb[1].mxu0  ;;  %v317_v41 = vmul.f32 %v1847_v30, %v308_v37  ;;  %v1925_v30 = vld [vmem:[%s2438_s7 + $0xe0] sm:$0xff]  }
 0x1b7   :  { %v1848_v33 = vpop.f32.mrb[2].mxu0  ;;  %v315_v44 = vmul.f32 %v298_v29, %v191_v31  ;;  %v1924_v29 = vld [vmem:[%s2438_s7 + $0x38] sm:$0xff]   ;;  %1745 = vmatprep.subr.bf16.mxu0 %v1925_v30 }
 0x1b8   :  { %v194_v34 = vpop.f32.mrb[3].mxu0  ;;  %v318_v48 = vmul.f32 %v1848_v33, %v313_v38  ;;  %1724 = vmatpush3.bf16.msra.mxu1 %v1924_v29  ;;  %v1935_v29 = vld [vmem:[%s2438_s7 + $0x150] sm:$0xff]  }
 0x1b9   :  { %v316_v53 = vmul.f32 %v303_v35, %v194_v34  ;;  %v1927_v35 = vld [vmem:[%s2438_s7 + $0x140] sm:$0xff]  }
 0x1ba   :  { %1765 = vmatprep.subr.bf16.mxu1 %v1927_v35 }
 0x1c5   :  { %v1859_v40 = vpop.f32.mrb[4].mxu0 }
 0x1c6   :  { %v341_v42 = vmul.f32 %v1859_v40, %v332_v39  ;;  %v272_v43 = vpop.f32.mrb[5].mxu0 }
 0x1c7   :  { %v339_v46 = vmul.f32 %v322_v32, %v272_v43  ;;  %v1860_v47 = vpop.f32.mrb[6].mxu0  ;;  %v1926_v32 = vld [vmem:[%s2438_s7 + $0xa0] sm:$0xff]   ;;  %v1928_v43 = vld [vmem:[%s2438_s7 + $0xe8] sm:$0xff]  }
 0x1c8   :  { %v345_v49 = vadd.f32 %v341_v42, %v317_v41  ;;  %v342_v50 = vmul.f32 %v1860_v47, %v337_v45  ;;  %v275_v51 = vpop.f32.mrb[7].mxu0  ;;  %1746 = vmatpush3.bf16.msra.mxu0 %v1926_v32 }
 0x1c9   :  { %v343_v54 = vadd.f32 %v339_v46, %v315_v44  ;;  %v340_v55 = vmul.f32 %v327_v36, %v275_v51  ;;  %v1930_v46 = vld [vmem:[%s2438_s7 + $0xa8] sm:$0xff]   ;;  %1747 = vmatprep.subr.bf16.mxu0 %v1928_v43 }
 0x1ca   :  { %v346_v56 = vadd.f32 %v342_v50, %v318_v48  ;;  %v356_v60 = vadd.f32 %v1611_v52, %v345_v49 }
 0x1cb   :  { %v344_v57 = vadd.f32 %v340_v55, %v316_v53  ;;  %v354_v58 = vadd.f32 %v1611_v52, %v343_v54  ;;  %v1932_v53 = vld [vmem:[%s2438_s7 + $0xf0] sm:$0xff]  }
 0x1cc   :  { %v357_v61 = vadd.f32 %v1611_v52, %v346_v56  ;;  %1748 = vmatpush3.bf16.msra.mxu0 %v1930_v46  ;;  %v1944_v46 = vld [vmem:[%s2438_s7 + $0x120] sm:$0xff]  }
 0x1cd   :  { %376 = vrot.lane.b32.xlu0 %v354_v58, %s1975_s27  ;;  %v355_v59 = vadd.f32 %v1611_v52, %v344_v57  ;;  %v1934_v58 = vld [vmem:[%s2438_s7 + $0xb0] sm:$0xff]   ;;  %1749 = vmatprep.subr.bf16.mxu0 %v1932_v53  ;;  %v1948_v53 = vld [vmem:[%s2438_s7 + $0x128] sm:$0xff]  }
 0x1cf   :  { %378 = vrot.lane.b32.xlu1 %v355_v59, %s1975_s27 }
 0x1d0   :  { %1750 = vmatpush3.bf16.msra.mxu0 %v1934_v58  ;;  %v1953_v58 = vld [vmem:[%s2438_s7 + $0x1d8] sm:$0xff]  }
 0x1d1   :  { %380 = vrot.lane.b32.xlu0 %v356_v60, %s1975_s27 }
 0x1d3   :  { %382 = vrot.lane.b32.xlu1 %v357_v61, %s1975_s27 }
 0x1d5   :  { %401 = vrot.lane.b32.xlu0 %v393_v62, %s1975_s27 }
 0x1d7   :  { %403 = vrot.lane.b32.xlu1 %v394_v63, %s1975_s27 }
 0x1d9   :  { %405 = vrot.lane.b32.xlu0 %v395_v0, %s1975_s27  ;;  %v1936_v0 = vld [vmem:[%s2438_s7 + $0xf8] sm:$0xff]  }
 0x1da   :  { %1751 = vmatprep.subr.bf16.mxu0 %v1936_v0 }
 0x1db   :  { %407 = vrot.lane.b32.xlu1 %v396_v1, %s1975_s27  ;;  %1752 = vmatpush3.bf16.msra.mxu0 %v1938_v3  ;;  %v1956_v3 = vld [vmem:[%s2438_s7 + $0x138] sm:$0xff]  }
 0x1dc   :  { %1793 = vmatprep.subr.bf16.mxu0 %v1941_v6 }
 0x23f   :  { %v377_v19 = vpop.permute.xlu0 %376 }
 0x240   :  { %389 = vst.msk [vmem:[#allocation2 + $0x1] sm:$0xff] %vm388_vm4, %v377_v19 }
 0x241   :  { %v379_v22 = vpop.permute.xlu1 %378 }
 0x242   :  { %390 = vst.msk [vmem:[#allocation2 + $0x9] sm:$0xff] %vm388_vm4, %v379_v22 }
 0x243   :  { %v381_v25 = vpop.permute.xlu0 %380 }
 0x244   :  { %391 = vst.msk [vmem:[#allocation2 + $0x19] sm:$0xff] %vm388_vm4, %v381_v25 }
 0x245   :  { %v383_v28 = vpop.permute.xlu1 %382 }
 0x246   :  { %392 = vst.msk [vmem:[#allocation2 + $0x21] sm:$0xff] %vm388_vm4, %v383_v28  ;;  %v1933_v28 = vld [vmem:[%s2438_s7 + $0x108] sm:$0xff]  }
 0x247   :  { %v402_v31 = vpop.permute.xlu0 %401  ;;  %v506_v33 = vld [vmem:[#allocation2 + $0x1] sm:$0xff] }
 0x248   :  { %v474_v34 = vld [vmem:[#allocation2] sm:$0xff]  ;;  %413 = vst.msk [vmem:[#allocation3 + $0x1] sm:$0xff] %vm388_vm4, %v402_v31 }
 0x249   :  { %v507_v36 = vld [vmem:[#allocation2 + $0x9] sm:$0xff]  ;;  %v404_v38 = vpop.permute.xlu1 %403 }
 0x24a   :  { %v475_v37 = vld [vmem:[#allocation2 + $0x8] sm:$0xff]  ;;  %v514_v40 = vpack.c.bf16 %v507_v36, %v506_v33  ;;  %414 = vst.msk [vmem:[#allocation3 + $0x9] sm:$0xff] %vm388_vm4, %v404_v38  ;;  %v1937_v33 = vld [vmem:[%s2438_s7 + $0x110] sm:$0xff]  }
 0x24b   :  { %v618_v39 = vld [vmem:[#allocation2 + $0x2] sm:$0xff]  ;;  %v482_v41 = vpack.c.bf16 %v475_v37, %v474_v34  ;;  %v619_v42 = vld [vmem:[#allocation2 + $0xa] sm:$0xff]  ;;  %v406_v45 = vpop.permute.xlu0 %405  ;;  %v476_v47 = vld [vmem:[#allocation2 + $0x18] sm:$0xff] }
 0x24c   :  { %v626_v44 = vpack.c.bf16 %v619_v42, %v618_v39  ;;  %518 = vrot.lane.b32.xlu1 %v514_v40, %s1976_s19  ;;  %415 = vst.msk [vmem:[#allocation3 + $0x19] sm:$0xff] %vm388_vm4, %v406_v45  ;;  %v508_v57 = vld [vmem:[#allocation2 + $0x19] sm:$0xff] }
 0x24d   :  { %486 = vrot.lane.b32.xlu0 %v482_v41, %s1977_s20  ;;  %427 = vst.msk [vmem:[#allocation4] sm:$0xff] %vm150_vm1, %v482_v41  ;;  %v477_v48 = vld [vmem:[#allocation2 + $0x20] sm:$0xff]  ;;  %v408_v49 = vpop.permute.xlu1 %407  ;;  %v1939_v34 = vld [vmem:[%s2438_s7 + $0x158] sm:$0xff]  }
 0x24e   :  { %v620_v50 = vld [vmem:[#allocation2 + $0x1a] sm:$0xff]  ;;  %604 = vst.msk [vmem:[#allocation4 + $0x18] sm:$0xff] %vm150_vm1, %v626_v44  ;;  %v483_v51 = vpack.c.bf16 %v477_v48, %v476_v47  ;;  %v621_v52 = vld [vmem:[#allocation2 + $0x22] sm:$0xff] }
 0x24f   :  { %416 = vst.msk [vmem:[#allocation3 + $0x21] sm:$0xff] %vm388_vm4, %v408_v49  ;;  %v509_v54 = vld [vmem:[#allocation2 + $0x21] sm:$0xff]  ;;  %v627_v55 = vpack.c.bf16 %v621_v52, %v620_v50  ;;  %v566_v56 = vld [vmem:[#allocation3 + $0x1] sm:$0xff] }
 0x250   :  { %488 = vrot.lane.b32.xlu1 %v483_v51, %s1977_s20  ;;  %428 = vst.msk [vmem:[#allocation4 + $0x48] sm:$0xff] %vm150_vm1, %v483_v51  ;;  %v446_v59 = vld [vmem:[#allocation3] sm:$0xff]  ;;  %v515_v62 = vpack.c.bf16 %v509_v54, %v508_v57  ;;  %v1940_v39 = vld [vmem:[%s2438_s7 + $0x118] sm:$0xff]   ;;  %v1946_v47 = vld [vmem:[%s2438_s7 + $0x188] sm:$0xff]  }
 0x251   :  { %454 = vrot.lane.b32.xlu0 %v482_v41, %s1978_s22  ;;  %v447_v60 = vld [vmem:[#allocation3 + $0x8] sm:$0xff]  ;;  %605 = vst.msk [vmem:[#allocation4 + $0x60] sm:$0xff] %vm150_vm1, %v627_v55  ;;  %v1943_v41 = vld [vmem:[%s2438_s7 + $0x160] sm:$0xff]   ;;  %v1947_v48 = vld [vmem:[%s2438_s7 + $0x168] sm:$0xff]  }
 0x252   :  { %v567_v61 = vld [vmem:[#allocation3 + $0x9] sm:$0xff]  ;;  %v462_v2 = vpack.c.bf16 %v447_v60, %v446_v59  ;;  %v1949_v52 = vld [vmem:[%s2438_s7 + $0x1d0] sm:$0xff]  }
 0x253   :  { %v582_v63 = vpack.c.bf16 %v567_v61, %v566_v56  ;;  %v568_v1 = vld [vmem:[#allocation3 + $0x19] sm:$0xff]  ;;  %v598_v10 = vld [vmem:[#allocation3 + $0x2] sm:$0xff]  ;;  %v599_v11 = vld [vmem:[#allocation3 + $0xa] sm:$0xff] }
 0x254   :  { %456 = vrot.lane.b32.xlu1 %v483_v51, %s1978_s22  ;;  %v448_v7 = vld [vmem:[#allocation3 + $0x18] sm:$0xff]  ;;  %v606_v12 = vpack.c.bf16 %v599_v11, %v598_v10  ;;  %v1950_v54 = vld [vmem:[%s2438_s7 + $0x190] sm:$0xff]   ;;  %v1954_v60 = vld [vmem:[%s2438_s7 + $0x198] sm:$0xff]  }
 0x255   :  { %520 = vrot.lane.b32.xlu0 %v515_v62, %s1976_s19  ;;  %528 = vst.msk [vmem:[#allocation4 + $0x30] sm:$0xff] %vm150_vm1, %v582_v63  ;;  %v1952_v59 = vld [vmem:[%s2438_s7 + $0x130] sm:$0xff]   ;;  %v1955_v61 = vld [vmem:[%s2438_s7 + $0x178] sm:$0xff]   ;;  %v1962_v10 = vld [vmem:[%s2438_s7 + $0x208] sm:$0xff]  }
 0x256   :  { %v569_v4 = vld [vmem:[#allocation3 + $0x21] sm:$0xff] }
 0x257   :  { %v583_v5 = vpack.c.bf16 %v569_v4, %v568_v1  ;;  %v449_v8 = vld [vmem:[#allocation3 + $0x20] sm:$0xff]  ;;  %v1958_v4 = vld [vmem:[%s2438_s7 + $0x1a0] sm:$0xff]  }
 0x258   :  { %466 = vrot.lane.b32.xlu1 %v462_v2, %s1979_s0  ;;  %v463_v9 = vpack.c.bf16 %v449_v8, %v448_v7  ;;  %v600_v13 = vld [vmem:[#allocation3 + $0x1a] sm:$0xff]  ;;  %v601_v14 = vld [vmem:[#allocation3 + $0x22] sm:$0xff] }
 0x259   :  { %630 = vrot.lane.b32.xlu0 %v626_v44, %s1978_s22  ;;  %529 = vst.msk [vmem:[#allocation4 + $0x78] sm:$0xff] %vm150_vm1, %v583_v5  ;;  %v607_v15 = vpack.c.bf16 %v601_v14, %v600_v13  ;;  %v1960_v8 = vld [vmem:[%s2438_s7 + $0x1e8] sm:$0xff]   ;;  %v1963_v14 = vld [vmem:[%s2438_s7 + $0x1f0] sm:$0xff]  }
 0x25c   :  { %542 = vrot.lane.b32.xlu1 %v514_v40, %s1979_s0 }
 0x25d   :  { %574 = vrot.lane.b32.xlu0 %v514_v40, %s1980_s29  ;;  %v1942_v40 = vld [vmem:[%s2438_s7 + $0x180] sm:$0xff]  }
 0x260   :  { %498 = vrot.lane.b32.xlu1 %v462_v2, %s1980_s29 }
 0x261   :  { %433 = vrot.lane.b32.xlu0 %v462_v2, %s1976_s19  ;;  %v1957_v2 = vld [vmem:[%s2438_s7 + $0x1e0] sm:$0xff]  }
 0x264   :  { %544 = vrot.lane.b32.xlu1 %v515_v62, %s1979_s0 }
 0x265   :  { %662 = vrot.lane.b32.xlu0 %v626_v44, %s1977_s20  ;;  %v1945_v44 = vld [vmem:[%s2438_s7 + $0x1c8] sm:$0xff]  }
 0x268   :  { %576 = vrot.lane.b32.xlu1 %v515_v62, %s1980_s29 }
 0x269   :  { %632 = vrot.lane.b32.xlu0 %v627_v55, %s1978_s22 }
 0x26c   :  { %586 = vrot.lane.b32.xlu1 %v582_v63, %s1977_s20 }
 0x26d   :  { %468 = vrot.lane.b32.xlu0 %v463_v9, %s1979_s0 }
 0x270   :  { %500 = vrot.lane.b32.xlu1 %v463_v9, %s1980_s29 }
 0x271   :  { %435 = vrot.lane.b32.xlu0 %v463_v9, %s1976_s19  ;;  %v1961_v9 = vld [vmem:[%s2438_s7 + $0x1a8] sm:$0xff]  }
 0x274   :  { %554 = vrot.lane.b32.xlu1 %v582_v63, %s1978_s22 }
 0x275   :  { %610 = vrot.lane.b32.xlu0 %v606_v12, %s1976_s19 }
 0x278   :  { %588 = vrot.lane.b32.xlu1 %v583_v5, %s1977_s20 }
 0x279   :  { %664 = vrot.lane.b32.xlu0 %v627_v55, %s1977_s20  ;;  %v1951_v55 = vld [vmem:[%s2438_s7 + $0x170] sm:$0xff]  }
 0x27c   :  { %612 = vrot.lane.b32.xlu1 %v607_v15, %s1976_s19 }
 0x27d   :  { %642 = vrot.lane.b32.xlu0 %v606_v12, %s1979_s0 }
 0x280   :  { %674 = vrot.lane.b32.xlu1 %v606_v12, %s1980_s29 }
 0x281   :  { %644 = vrot.lane.b32.xlu0 %v607_v15, %s1979_s0 }
 0x284   :  { %676 = vrot.lane.b32.xlu1 %v607_v15, %s1980_s29 }
 0x285   :  { %556 = vrot.lane.b32.xlu0 %v583_v5, %s1978_s22  ;;  %v1959_v5 = vld [vmem:[%s2438_s7 + $0x200] sm:$0xff]  }
 0x2be   :  { %v519_v17 = vpop.permute.xlu1 %518 }
 0x2bf   :  { %v487_v16 = vpop.permute.xlu0 %486 }
 0x2c0   :  { %492 = vst.msk [vmem:[#allocation4 + $0x8] sm:$0xff] %vm150_vm1, %v487_v16  ;;  %v1964_v16 = vld [vmem:[%s2438_s7 + $0x1b0] sm:$0xff]  }
 0x2c1   :  { %524 = vst.msk [vmem:[#allocation4 + $0x8] sm:$0xff] %vm439_vm5, %v519_v17  ;;  %v1965_v17 = vld [vmem:[%s2438_s7 + $0x210] sm:$0xff]  }
 0x2c2   :  { %v489_v19 = vpop.permute.xlu1 %488 }
 0x2c3   :  { %v455_v18 = vpop.permute.xlu0 %454  ;;  %493 = vst.msk [vmem:[#allocation4 + $0x50] sm:$0xff] %vm150_vm1, %v489_v19 }
 0x2c4   :  { %460 = vst.msk [vmem:[#allocation4] sm:$0xff] %vm439_vm5, %v455_v18 }
 0x2c6   :  { %v457_v21 = vpop.permute.xlu1 %456 }
 0x2c7   :  { %v521_v20 = vpop.permute.xlu0 %520  ;;  %461 = vst.msk [vmem:[#allocation4 + $0x48] sm:$0xff] %vm439_vm5, %v457_v21  ;;  %v1966_v21 = vld [vmem:[%s2438_s7 + $0x1f8] sm:$0xff]  }
 0x2c8   :  { %525 = vst.msk [vmem:[#allocation4 + $0x50] sm:$0xff] %vm439_vm5, %v521_v20  ;;  %v683_v22 = vld [vmem:[#allocation4 + $0x8] sm:$0xff] }
 0x2c9   :  { %1315 = vmatprep.mubr.bf16.mxu1 %v683_v22  ;;  %v1967_v22 = vld [vmem:[%s2438_s7 + $0x1b8] sm:$0xff]  }
 0x2ca   :  { %v467_v26 = vpop.permute.xlu1 %466 }
 0x2cb   :  { %v631_v25 = vpop.permute.xlu0 %630  ;;  %v682_v27 = vld [vmem:[#allocation4] sm:$0xff]  ;;  %472 = vst.msk [vmem:[#allocation4 + $0x28] sm:$0xff] %vm150_vm1, %v467_v26 }
 0x2cc   :  { %636 = vst.msk [vmem:[#allocation4 + $0x18] sm:$0xff] %vm439_vm5, %v631_v25  ;;  %1316 = vmatmul.mubr.bf16.vlgmr.msra.gmra.mrb[4].mxu1 %v682_v27  ;;  %v1969_v27 = vld [vmem:[%s2438_s7 + $0x220] sm:$0xff]  }
 0x2cd   :  { %1766 = vmatpush3.bf16.msra.mxu1 %v1929_v23  ;;  %v1968_v23 = vld [vmem:[%s2438_s7 + $0x218] sm:$0xff]  }
 0x2ce   :  { %1767 = vmatprep.subr.bf16.mxu1 %v1931_v24  ;;  %v543_v31 = vpop.permute.xlu1 %542  ;;  %v691_v37 = vld [vmem:[#allocation4 + $0x48] sm:$0xff] }
 0x2cf   :  { %v575_v30 = vpop.permute.xlu0 %574  ;;  %v692_v32 = vld [vmem:[#allocation4 + $0x50] sm:$0xff]  ;;  %548 = vst.msk [vmem:[#allocation4 + $0x10] sm:$0xff] %vm150_vm1, %v543_v31 }
 0x2d0   :  { %1323 = vmatprep.mubr.bf16.mxu1 %v692_v32  ;;  %580 = vst.msk [vmem:[#allocation4 + $0x10] sm:$0xff] %vm439_vm5, %v575_v30  ;;  %v1970_v32 = vld [vmem:[%s2438_s7 + $0x228] sm:$0xff]  }
 0x2d1   :  { %1768 = vmatpush3.bf16.msra.mxu1 %v1933_v28 }
 0x2d2   :  { %1769 = vmatprep.subr.bf16.mxu1 %v1935_v29  ;;  %v499_v36 = vpop.permute.xlu1 %498 }
 0x2d3   :  { %v434_v35 = vpop.permute.xlu0 %433  ;;  %v685_v38 = vld [vmem:[#allocation4 + $0x18] sm:$0xff]  ;;  %504 = vst.msk [vmem:[#allocation4 + $0x28] sm:$0xff] %vm439_vm5, %v499_v36 }
 0x2d4   :  { %440 = vst.msk [vmem:[#allocation4 + $0x20] sm:$0xff] %vm439_vm5, %v434_v35  ;;  %1324 = vmatmul.mubr.bf16.gmra.mrb[8].mxu1 %v691_v37  ;;  %1364 = vmatprep.mubr.bf16.mxu0 %v685_v38  ;;  %v1972_v36 = vld [vmem:[%s2438_s7 + $0x238] sm:$0xff]  }
 0x2d5   :  { %1770 = vmatpush3.bf16.msra.mxu1 %v1937_v33 }
 0x2d6   :  { %1771 = vmatprep.subr.bf16.mxu1 %v1939_v34  ;;  %v545_v43 = vpop.permute.xlu1 %544  ;;  %v1971_v34 = vld [vmem:[%s2438_s7 + $0x230] sm:$0xff]  }
 0x2d7   :  { %v663_v42 = vpop.permute.xlu0 %662  ;;  %549 = vst.msk [vmem:[#allocation4 + $0x58] sm:$0xff] %vm150_vm1, %v545_v43  ;;  %v684_v45 = vld [vmem:[#allocation4 + $0x10] sm:$0xff] }
 0x2d8   :  { %668 = vst.msk [vmem:[#allocation4 + $0x20] sm:$0xff] %vm150_vm1, %v663_v42  ;;  %1365 = vmatmul.mubr.bf16.vlgmr.msra.gmra.mrb[8].mxu0 %v684_v45 }
 0x2d9   :  { %1772 = vmatpush3.bf16.msra.mxu1 %v1940_v39  ;;  %1794 = vmatpush3.bf16.msra.mxu0 %v1942_v40 }
 0x2da   :  { %1773 = vmatprep.subr.bf16.mxu1 %v1943_v41  ;;  %v577_v50 = vpop.permute.xlu1 %576  ;;  %1795 = vmatprep.subr.bf16.mxu0 %v1945_v44  ;;  %v687_v51 = vld [vmem:[#allocation4 + $0x28] sm:$0xff] }
 0x2db   :  { %v633_v49 = vpop.permute.xlu0 %632  ;;  %581 = vst.msk [vmem:[#allocation4 + $0x58] sm:$0xff] %vm439_vm5, %v577_v50  ;;  %1413 = vmatprep.mubr.bf16.mxu1 %v687_v51 }
 0x2dc   :  { %637 = vst.msk [vmem:[#allocation4 + $0x60] sm:$0xff] %vm439_vm5, %v633_v49  ;;  %v1612_v49 = vld [vmem:[%s2439_s8] ss:$0 sm:$0xff] }
 0x2dd   :  { %1774 = vmatpush3.bf16.msra.mxu1 %v1944_v46  ;;  %1796 = vmatpush3.bf16.msra.mxu0 %v1946_v47 }
 0x2de   :  { %1775 = vmatprep.subr.bf16.mxu1 %v1947_v48  ;;  %v587_v57 = vpop.permute.xlu1 %586  ;;  %1797 = vmatprep.subr.bf16.mxu0 %v1949_v52 }
 0x2df   :  { %v469_v56 = vpop.permute.xlu0 %468  ;;  %592 = vst.msk [vmem:[#allocation4 + $0x38] sm:$0xff] %vm150_vm1, %v587_v57  ;;  %v686_v12 = vld [vmem:[#allocation4 + $0x20] sm:$0xff] }
 0x2e0   :  { %473 = vst.msk [vmem:[#allocation4 + $0x70] sm:$0xff] %vm150_vm1, %v469_v56 }
 0x2e1   :  { %1776 = vmatpush3.bf16.msra.mxu1 %v1948_v53  ;;  %1798 = vmatpush3.bf16.msra.mxu0 %v1950_v54 }
 0x2e2   :  { %1777 = vmatprep.subr.bf16.mxu1 %v1951_v55  ;;  %v501_v63 = vpop.permute.xlu1 %500  ;;  %1799 = vmatprep.subr.bf16.mxu0 %v1953_v58  ;;  %v693_v1 = vld [vmem:[#allocation4 + $0x58] sm:$0xff] }
 0x2e3   :  { %v436_v62 = vpop.permute.xlu0 %435  ;;  %v694_v0 = vld [vmem:[#allocation4 + $0x60] sm:$0xff]  ;;  %505 = vst.msk [vmem:[#allocation4 + $0x70] sm:$0xff] %vm439_vm5, %v501_v63 }
 0x2e4   :  { %441 = vst.msk [vmem:[#allocation4 + $0x68] sm:$0xff] %vm439_vm5, %v436_v62  ;;  %1372 = vmatprep.mubr.bf16.mxu0 %v694_v0 }
 0x2e5   :  { %1778 = vmatpush3.bf16.msra.mxu1 %v1952_v59  ;;  %1373 = vmatmul.mubr.bf16.gmra.mrb[12].mxu0 %v693_v1 }
 0x2e6   :  { %1800 = vmatpush3.bf16.msra.mxu0 %v1954_v60  ;;  %1779 = vmatprep.subr.bf16.mxu1 %v1955_v61  ;;  %v555_v7 = vpop.permute.xlu1 %554 }
 0x2e7   :  { %v611_v6 = vpop.permute.xlu0 %610  ;;  %1801 = vmatprep.subr.bf16.mxu0 %v1957_v2  ;;  %560 = vst.msk [vmem:[#allocation4 + $0x30] sm:$0xff] %vm439_vm5, %v555_v7 }
 0x2e8   :  { %616 = vst.msk [vmem:[#allocation4 + $0x38] sm:$0xff] %vm439_vm5, %v611_v6 }
 0x2e9   :  { %1780 = vmatpush3.bf16.msra.mxu1 %v1956_v3 }
 0x2ea   :  { %1802 = vmatpush3.bf16.msra.mxu0 %v1958_v4  ;;  %1861 = vmatprep.subr.bf16.mxu1 %v1959_v5  ;;  %v589_v13 = vpop.permute.xlu1 %588  ;;  %v696_v15 = vld [vmem:[#allocation4 + $0x70] sm:$0xff] }
 0x2eb   :  { %v665_v11 = vpop.permute.xlu0 %664  ;;  %1803 = vmatprep.subr.bf16.mxu0 %v1960_v8  ;;  %593 = vst.msk [vmem:[#allocation4 + $0x80] sm:$0xff] %vm150_vm1, %v589_v13 }
 0x2ec   :  { %669 = vst.msk [vmem:[#allocation4 + $0x68] sm:$0xff] %vm150_vm1, %v665_v11  ;;  %1414 = vmatmul.mubr.bf16.vlgmr.msra.gmra.mrb[12].mxu1 %v686_v12 }
 0x2ed   :  { %1862 = vmatpush3.bf16.msra.mxu1 %v1959_v5  ;;  %1421 = vmatprep.mubr.bf16.mxu1 %v696_v15 }
 0x2ee   :  { %1804 = vmatpush3.bf16.msra.mxu0 %v1961_v9  ;;  %1863 = vmatprep.subr.bf16.mxu1 %v1962_v10  ;;  %v613_v19 = vpop.permute.xlu1 %612  ;;  %v688_v31 = vld [vmem:[#allocation4 + $0x30] sm:$0xff] }
 0x2ef   :  { %v643_v18 = vpop.permute.xlu0 %642  ;;  %1805 = vmatprep.subr.bf16.mxu0 %v1963_v14  ;;  %v689_v20 = vld [vmem:[#allocation4 + $0x38] sm:$0xff]  ;;  %617 = vst.msk [vmem:[#allocation4 + $0x80] sm:$0xff] %vm439_vm5, %v613_v19 }
 0x2f0   :  { %648 = vst.msk [vmem:[#allocation4 + $0x40] sm:$0xff] %vm150_vm1, %v643_v18  ;;  %1462 = vmatprep.mubr.bf16.mxu0 %v689_v20 }
 0x2f1   :  { %1864 = vmatpush3.bf16.msra.mxu1 %v1962_v10 }
 0x2f2   :  { %1806 = vmatpush3.bf16.msra.mxu0 %v1964_v16  ;;  %1865 = vmatprep.subr.bf16.mxu1 %v1965_v17  ;;  %v675_v25 = vpop.permute.xlu1 %674 }
 0x2f3   :  { %v645_v24 = vpop.permute.xlu0 %644  ;;  %v695_v26 = vld [vmem:[#allocation4 + $0x68] sm:$0xff]  ;;  %1807 = vmatprep.subr.bf16.mxu0 %v1966_v21  ;;  %680 = vst.msk [vmem:[#allocation4 + $0x40] sm:$0xff] %vm439_vm5, %v675_v25 }
 0x2f4   :  { %649 = vst.msk [vmem:[#allocation4 + $0x88] sm:$0xff] %vm150_vm1, %v645_v24  ;;  %1422 = vmatmul.mubr.bf16.gmra.mrb[16].mxu1 %v695_v26 }
 0x2f5   :  { %1866 = vmatpush3.bf16.msra.mxu1 %v1965_v17 }
 0x2f6   :  { %1808 = vmatpush3.bf16.msra.mxu0 %v1967_v22  ;;  %1867 = vmatprep.subr.bf16.mxu1 %v1968_v23  ;;  %v677_v29 = vpop.permute.xlu1 %676  ;;  %v698_v30 = vld [vmem:[#allocation4 + $0x80] sm:$0xff] }
 0x2f7   :  { %v557_v28 = vpop.permute.xlu0 %556  ;;  %681 = vst.msk [vmem:[#allocation4 + $0x88] sm:$0xff] %vm439_vm5, %v677_v29 }
 0x2f8   :  { %561 = vst.msk [vmem:[#allocation4 + $0x78] sm:$0xff] %vm439_vm5, %v557_v28 }
 0x2f9   :  { %1463 = vmatmul.mubr.bf16.vlgmr.msra.gmra.mrb[16].mxu0 %v688_v31  ;;  %1868 = vmatpush3.bf16.msra.mxu1 %v1968_v23 }
 0x2fa   :  { %1470 = vmatprep.mubr.bf16.mxu0 %v698_v30  ;;  %1869 = vmatprep.subr.bf16.mxu1 %v1969_v27  ;;  %v690_v33 = vld [vmem:[#allocation4 + $0x40] sm:$0xff] }
 0x2fb   :  { %1877 = vmatprep.mubr.bf16.mxu1 %v690_v33 }
 0x2fd   :  { %1870 = vmatpush3.bf16.msra.mxu1 %v1969_v27 }
 0x2fe   :  { %1871 = vmatprep.subr.bf16.mxu1 %v1970_v32  ;;  %v699_v37 = vld [vmem:[#allocation4 + $0x88] sm:$0xff] }
 0x2ff   :  { %v697_v35 = vld [vmem:[#allocation4 + $0x78] sm:$0xff] }
 0x301   :  { %1471 = vmatmul.mubr.bf16.gmra.mrb[20].mxu0 %v697_v35  ;;  %1872 = vmatpush3.bf16.msra.mxu1 %v1970_v32 }
 0x302   :  { %1873 = vmatprep.subr.bf16.mxu1 %v1971_v34 }
 0x305   :  { %1874 = vmatpush3.bf16.msra.mxu1 %v1971_v34 }
 0x306   :  { %1875 = vmatprep.subr.bf16.mxu1 %v1972_v36 }
 0x309   :  { %1876 = vmatpush3.bf16.msra.mxu1 %v1972_v36 }
 0x30c   :  { %1878 = vmatmul.mubr.bf16.vlgmr.msra.gmra.mrb[20].mxu1 %v699_v37 }
 0x39f   :  { %v1725_v38 = vpop.f32.mrb[4].mxu1 }
 0x3a0   :  { %v1726_v39 = vpop.f32.mrb[5].mxu1 }
 0x3a1   :  { %v1727_v40 = vadd.f32 %v1726_v39, %v1725_v38  ;;  %v1728_v41 = vpop.f32.mrb[6].mxu1 }
 0x3a2   :  { %v1729_v42 = vpop.f32.mrb[7].mxu1 }
 0x3a3   :  { %v1730_v43 = vadd.f32 %v1729_v42, %v1728_v41  ;;  %v1318_v53 = vadd.f32 %v1727_v40, %v1612_v49 }
 0x3a5   :  { %v1321_v57 = vadd.f32 %v1730_v43, %v1612_v49 }
 0x3a7   :  { %v1731_v44 = vpop.f32.mrb[8].mxu1 }
 0x3a8   :  { %v1732_v45 = vpop.f32.mrb[9].mxu1 }
 0x3a9   :  { %v1733_v46 = vadd.f32 %v1732_v45, %v1731_v44  ;;  %v1734_v47 = vpop.f32.mrb[10].mxu1 }
 0x3aa   :  { %v1735_v48 = vpop.f32.mrb[11].mxu1 }
 0x3ab   :  { %v1736_v50 = vadd.f32 %v1735_v48, %v1734_v47  ;;  %v1753_v51 = vpop.f32.mrb[8].mxu0  ;;  %v1326_v63 = vadd.f32 %v1733_v46, %v1612_v49 }
 0x3ac   :  { %v1754_v52 = vpop.f32.mrb[9].mxu0 }
 0x3ad   :  { %v1755_v54 = vadd.f32 %v1754_v52, %v1753_v51  ;;  %v1756_v55 = vpop.f32.mrb[10].mxu0  ;;  %v1329_v3 = vadd.f32 %v1736_v50, %v1612_v49 }
 0x3ae   :  { %v1757_v56 = vpop.f32.mrb[11].mxu0 }
 0x3af   :  { %v1367_v58 = vadd.f32 %v1755_v54, %v1318_v53  ;;  %v1758_v59 = vadd.f32 %v1757_v56, %v1756_v55 }
 0x3b1   :  { %v1370_v60 = vadd.f32 %v1758_v59, %v1321_v57 }
 0x3b8   :  { %v1759_v61 = vpop.f32.mrb[12].mxu0 }
 0x3b9   :  { %v1760_v62 = vpop.f32.mrb[13].mxu0 }
 0x3ba   :  { %v1761_v0 = vadd.f32 %v1760_v62, %v1759_v61  ;;  %v1762_v1 = vpop.f32.mrb[14].mxu0 }
 0x3bb   :  { %v1763_v2 = vpop.f32.mrb[15].mxu0 }
 0x3bc   :  { %v1375_v4 = vadd.f32 %v1761_v0, %v1326_v63  ;;  %v1764_v5 = vadd.f32 %v1763_v2, %v1762_v1 }
 0x3be   :  { %v1378_v6 = vadd.f32 %v1764_v5, %v1329_v3 }
 0x3bf   :  { %v1781_v7 = vpop.f32.mrb[12].mxu1 }
 0x3c0   :  { %v1782_v8 = vpop.f32.mrb[13].mxu1 }
 0x3c1   :  { %v1783_v9 = vadd.f32 %v1782_v8, %v1781_v7  ;;  %v1784_v10 = vpop.f32.mrb[14].mxu1 }
 0x3c2   :  { %v1785_v11 = vpop.f32.mrb[15].mxu1 }
 0x3c3   :  { %v1416_v12 = vadd.f32 %v1783_v9, %v1367_v58  ;;  %v1786_v13 = vadd.f32 %v1785_v11, %v1784_v10 }
 0x3c5   :  { %v1419_v14 = vadd.f32 %v1786_v13, %v1370_v60 }
 0x3c7   :  { %v1787_v15 = vpop.f32.mrb[16].mxu1 }
 0x3c8   :  { %v1788_v16 = vpop.f32.mrb[17].mxu1 }
 0x3c9   :  { %v1789_v17 = vadd.f32 %v1788_v16, %v1787_v15  ;;  %v1790_v18 = vpop.f32.mrb[18].mxu1 }
 0x3ca   :  { %v1791_v19 = vpop.f32.mrb[19].mxu1 }
 0x3cb   :  { %v1424_v20 = vadd.f32 %v1789_v17, %v1375_v4  ;;  %v1792_v21 = vadd.f32 %v1791_v19, %v1790_v18 }
 0x3cc   :  { %v1809_v22 = vpop.f32.mrb[16].mxu0 }
 0x3cd   :  { %v1427_v23 = vadd.f32 %v1792_v21, %v1378_v6  ;;  %v1810_v24 = vpop.f32.mrb[17].mxu0 }
 0x3ce   :  { %v1811_v25 = vadd.f32 %v1810_v24, %v1809_v22  ;;  %v1812_v26 = vpop.f32.mrb[18].mxu0 }
 0x3cf   :  { %v1813_v27 = vpop.f32.mrb[19].mxu0 }
 0x3d0   :  { %v1814_v28 = vadd.f32 %v1813_v27, %v1812_v26  ;;  %v1465_v29 = vadd.f32 %v1811_v25, %v1416_v12 }
 0x3d2   :  { %v1468_v30 = vadd.f32 %v1814_v28, %v1419_v14 }
 0x3d4   :  { %v1815_v31 = vpop.f32.mrb[20].mxu0 }
 0x3d5   :  { %v1816_v32 = vpop.f32.mrb[21].mxu0 }
 0x3d6   :  { %v1817_v33 = vadd.f32 %v1816_v32, %v1815_v31  ;;  %v1818_v34 = vpop.f32.mrb[22].mxu0 }
 0x3d7   :  { %v1819_v35 = vpop.f32.mrb[23].mxu0 }
 0x3d8   :  { %v1820_v36 = vadd.f32 %v1819_v35, %v1818_v34  ;;  %v1473_v37 = vadd.f32 %v1817_v33, %v1424_v20 }
 0x3da   :  { %v1476_v38 = vadd.f32 %v1820_v36, %v1427_v23 }
 0x3df   :  { %v1879_v39 = vpop.f32.mrb[20].mxu1 }
 0x3e0   :  { %v1522_v40 = vadd.f32 %v1879_v39, %v1473_v37  ;;  %v1513_v41 = vpop.f32.mrb[21].mxu1 }
 0x3e1   :  { %v1514_v42 = vadd.f32 %v1513_v41, %v1465_v29  ;;  %v1880_v43 = vpop.f32.mrb[22].mxu1 }
 0x3e2   :  { %v1692_v44 = vpack.c.bf16 %v1522_v40, %v1522_v40  ;;  %v1525_v45 = vadd.f32 %v1880_v43, %v1476_v38  ;;  %v1516_v46 = vpop.f32.mrb[23].mxu1  ;;  %v1545_v50 = vmul.f32 %v1522_v40, %v1522_v40  ;;  %v1531_v57 = vsel %vm150_vm1, %v1522_v40, 0.0 }
 0x3e3   :  { %v1543_v47 = vmul.f32 %v1514_v42, %v1514_v42  ;;  %v1690_v48 = vpack.c.bf16 %v1514_v42, %v1514_v42  ;;  %v1517_v49 = vadd.f32 %v1516_v46, %v1468_v30  ;;  %v1528_v52 = vsel %vm150_vm1, %v1514_v42, 0.0 }
 0x3e4   :  { %1580 = vst.msk [vmem:[%s2440_s9 + $0x8] sm:$0xf] %vm1577_vm6, %v1692_v44  ;;  %v1693_v51 = vpack.c.bf16 %v1525_v45, %v1525_v45  ;;  %v1546_v59 = vmul.f32 %v1525_v45, %v1525_v45  ;;  %v1550_v63 = vsel %vm150_vm1, %v1545_v50, 0.0  ;;  %v1533_v0 = vsel %vm150_vm1, %v1525_v45, 0.0 }
 0x3e5   :  { %1578 = vst.msk [vmem:[%s2440_s9] sm:$0xf] %vm1577_vm6, %v1690_v48  ;;  %v1529_v53 = vsel %vm150_vm1, %v1517_v49, 0.0  ;;  %v1544_v54 = vmul.f32 %v1517_v49, %v1517_v49  ;;  %v1691_v55 = vpack.c.bf16 %v1517_v49, %v1517_v49  ;;  %v1547_v58 = vsel %vm150_vm1, %v1543_v47, 0.0 }
 0x3e6   :  { %1581 = vst.msk [vmem:[%s2440_s9 + $0xc] sm:$0xf] %vm1577_vm6, %v1693_v51  ;;  %v1530_v56 = vadd.f32 %v1529_v53, %v1528_v52  ;;  %v1552_v3 = vsel %vm150_vm1, %v1546_v59, 0.0 }
 0x3e7   :  { %v1548_v60 = vsel %vm150_vm1, %v1544_v54, 0.0  ;;  %1579 = vst.msk [vmem:[%s2440_s9 + $0x4] sm:$0xf] %vm1577_vm6, %v1691_v55 }
 0x3e8   :  { %v1532_v61 = vadd.f32 %v1531_v57, %v1530_v56  ;;  %v1549_v62 = vadd.f32 %v1548_v60, %v1547_v58 }
 0x3ea   :  { %v1534_v1 = vadd.f32 %v1533_v0, %v1532_v61  ;;  %v1551_v2 = vadd.f32 %v1550_v63, %v1549_v62 }
 0x3ec   :  { %v1535_v4 = vrot.slane %v1534_v1, 4  ;;  %v1553_v5 = vadd.f32 %v1552_v3, %v1551_v2 }
 0x3ee   :  { %v1536_v6 = vadd.f32 %v1535_v4, %v1534_v1  ;;  %v1554_v7 = vrot.slane %v1553_v5, 4 }
 0x3f0   :  { %v1537_v8 = vrot.slane %v1536_v6, 2  ;;  %v1555_v9 = vadd.f32 %v1554_v7, %v1553_v5 }
 0x3f2   :  { %v1538_v10 = vadd.f32 %v1537_v8, %v1536_v6  ;;  %v1556_v11 = vrot.slane %v1555_v9, 2 }
 0x3f4   :  { %v1539_v12 = vrot.slane %v1538_v10, 1  ;;  %v1557_v13 = vadd.f32 %v1556_v11, %v1555_v9 }
 0x3f6   :  { %v1540_v14 = vadd.f32 %v1539_v12, %v1538_v10  ;;  %v1558_v15 = vrot.slane %v1557_v13, 1 }
 0x3f8   :  { %1542 = vst.msk [vmem:[%s2441_s10] sm:$0x1] %vm1541_vm7, %v1540_v14  ;;  %v1559_v16 = vadd.f32 %v1558_v15, %v1557_v13 }
 0x3fa   :  { %1560 = vst.msk [vmem:[%s2442_s11] sm:$0x1] %vm1541_vm7, %v1559_v16 }

</bundles_post_ra>
